<compile_context>
chip_gen: v5e
topology: v5e:2x2
jax: 0.10.0
libtpu: 0.0.40
codegen_flags: <defaults>
</compile_context>

<pallas_src>
from functools import partial

import jax
import jax.numpy as jnp
import numpy as np
from jax.experimental import pallas as pl
from jax.experimental.pallas import tpu as pltpu


def _layernorm(x, eps=1e-5):
    mu = jnp.mean(x, axis=-1, keepdims=True)
    var = jnp.mean((x - mu) ** 2, axis=-1, keepdims=True)
    return (x - mu) * jax.lax.rsqrt(var + eps)


def encoder_hier_kernel(x_ref, wqkv_ref, wo_ref, w1_ref, w2_ref, out_ref, *,
                        n_layers, B, S, n_head, d_k, d_v):
    BS = B * S
    hq = n_head * d_k                      # width of the Q (and K) block in qkv
    hv = n_head * d_v
    qkv_w = 2 * hq + hv

    # Weights staged in VMEM once (already bf16, Q-scale pre-folded); reused
    # by every layer since EncoderHier shares them across layers.
    wqkv = wqkv_ref[...]                   # [D, 2*H*dk + H*dv]  bf16
    wo = wo_ref[...]                       # [H*dv, D]           bf16
    w1 = w1_ref[...]                       # [D, d_ff]           bf16
    w2 = w2_ref[...]                       # [d_ff, D]           bf16

    def layer(x):
        # ---- fused QKV projection: one wide MXU matmul, bf16 in / f32 acc ----
        qkv = jnp.dot(x.astype(jnp.bfloat16), wqkv,
                      preferred_element_type=jnp.float32)          # [BS, qkv_w]
        qkv3 = qkv.reshape(B, S, qkv_w)

        # Head-batched layout [B*H, S, d]: one relayout per tensor instead of
        # n_head narrow lane slices; the attention einsums below then carry a
        # single batch dim.
        def to_heads(t, d):
            t = t.reshape(B, S, n_head, d)
            return jnp.transpose(t, (0, 2, 1, 3)).reshape(B * n_head, S, d)

        q = to_heads(qkv3[:, :, :hq], d_k)          # [B*H, S, dk] (pre-scaled)
        k = to_heads(qkv3[:, :, hq:2 * hq], d_k)    # [B*H, S, dk]
        v = to_heads(qkv3[:, :, 2 * hq:], d_v)      # [B*H, S, dv]

        # ---- multi-head attention, batched over B*H ----
        # contract last dims of both -> no explicit K^T (no XLU transpose)
        s = jnp.einsum("bqd,bkd->bqk",
                       q.astype(jnp.bfloat16), k.astype(jnp.bfloat16),
                       preferred_element_type=jnp.float32)         # [B*H, S, S]
        m = jnp.max(s, axis=-1, keepdims=True)
        e = jnp.exp(s - m)
        inv = pl.reciprocal(jnp.sum(e, axis=-1, keepdims=True), approx=True)
        p = e * inv                                                 # f32 softmax
        ctx = jnp.einsum("bqk,bkd->bqd",
                         p.astype(jnp.bfloat16), v.astype(jnp.bfloat16),
                         preferred_element_type=jnp.float32)        # [B*H, S, dv]

        # back to [BS, H*dv] and a single output projection
        ctx = jnp.transpose(ctx.reshape(B, n_head, S, d_v),
                            (0, 2, 1, 3)).reshape(BS, hv)
        attn_out = jnp.dot(ctx.astype(jnp.bfloat16), wo,
                           preferred_element_type=jnp.float32)      # [BS, D]

        h1 = _layernorm(attn_out + x)                               # f32

        # ---- position-wise feed-forward ----
        ff = jnp.maximum(jnp.dot(h1.astype(jnp.bfloat16), w1,
                                 preferred_element_type=jnp.float32), 0.0)
        ff = jnp.dot(ff.astype(jnp.bfloat16), w2,
                     preferred_element_type=jnp.float32)
        return _layernorm(ff + h1)

    x = x_ref[...]                                                  # [BS, D] f32
    if n_layers <= 4:
        # small static unroll: full LLO scheduling visibility
        for _ in range(n_layers):
            x = layer(x)
    else:
        # scaling guard: bound code size / live ranges at larger depth
        x = jax.lax.fori_loop(0, n_layers, lambda _, xx: layer(xx), x)

    # TODO(synk): at production sizes present a lane-dense (last dim >= 128)
    # output slab to out_specs; with D=32 this store is a masked vst.msk.
    out_ref[...] = x


def prepare_params(params, *, d_k):
    """One-time weight preprocessing (NOT per-call): fuse W_Q|W_K|W_V into one
    QKV weight, fold the 1/sqrt(d_k) attention scale into the Q columns, and
    cast all weights to bf16 for the MXU."""
    q_scale = 1.0 / float(np.sqrt(d_k))
    wqkv = jnp.concatenate(
        [params["wq"] * q_scale, params["wk"], params["wv"]], axis=1)
    cast = lambda w: w.astype(jnp.bfloat16)
    return {"wqkv": cast(wqkv), "wo": cast(params["wo"]),
            "w1": cast(params["w1"]), "w2": cast(params["w2"])}


def encoder_hier(x, prepared, *, n_layers, d_k, d_v, n_head):
    B, S, D = x.shape
    kernel = partial(encoder_hier_kernel, n_layers=n_layers, B=B, S=S,
                     n_head=n_head, d_k=d_k, d_v=d_v)
    out2d = pl.pallas_call(
        kernel,
        out_shape=jax.ShapeDtypeStruct((B * S, D), jnp.float32),
        # No grid: the whole (tiny) activation slab and all shared weights fit
        # in VMEM; every operand is staged exactly once (no double-buffering
        # of constant weights) and activations never round-trip through HBM
        # between layers.
        # TODO(synk): for production sizes add a "parallel" grid axis over the
        # B*S rows (>=512 rows/tile), keep weights resident via constant
        # index_map blocks, and set vmem_limit_bytes for v7x's 64 MiB VMEM.
        in_specs=[pl.BlockSpec(memory_space=pltpu.MemorySpace.VMEM)] * 5,
        out_specs=pl.BlockSpec(memory_space=pltpu.MemorySpace.VMEM),
    )(x.reshape(B * S, D), prepared["wqkv"], prepared["wo"],
      prepared["w1"], prepared["w2"])
    return out2d.reshape(B, S, D)


# ----- pure-JAX f32 reference (PyTorch semantics) for validation -----
def encoder_hier_ref(x, params, *, n_layers, d_k, d_v, n_head):
    B, S, D = x.shape
    for _ in range(n_layers):
        q = (x @ params["wq"]).reshape(B, S, n_head, d_k).transpose(0, 2, 1, 3)
        k = (x @ params["wk"]).reshape(B, S, n_head, d_k).transpose(0, 2, 1, 3)
        v = (x @ params["wv"]).reshape(B, S, n_head, d_v).transpose(0, 2, 1, 3)
        scores = jnp.einsum("bhqd,bhkd->bhqk", q, k) / np.sqrt(d_k)
        attn = jax.nn.softmax(scores, axis=-1)
        ctx = jnp.einsum("bhqk,bhkd->bhqd", attn, v)
        ctx = ctx.transpose(0, 2, 1, 3).reshape(B, S, n_head * d_v)
        h1 = _layernorm(ctx @ params["wo"] + x)
        ff = jnp.maximum(h1 @ params["w1"], 0.0) @ params["w2"]
        x = _layernorm(ff + h1)
    return x


if __name__ == "__main__":
    # Small config consistent with EncoderHier(__init__) shapes.
    B, S = 2, 8                 # bs * n_vars, num_patch
    d_model, d_k, d_v = 32, 8, 8
    d_ff, n_head, n_layers = 64, 4, 2

    key = jax.random.PRNGKey(0)
    ks = jax.random.split(key, 8)
    scale = 0.1
    params = {
        "wq": scale * jax.random.normal(ks[0], (d_model, d_k * n_head), jnp.float32),
        "wk": scale * jax.random.normal(ks[1], (d_model, d_k * n_head), jnp.float32),
        "wv": scale * jax.random.normal(ks[2], (d_model, d_v * n_head), jnp.float32),
        "wo": scale * jax.random.normal(ks[3], (n_head * d_v, d_model), jnp.float32),
        "w1": scale * jax.random.normal(ks[4], (d_model, d_ff), jnp.float32),
        "w2": scale * jax.random.normal(ks[5], (d_ff, d_model), jnp.float32),
    }
    x = jax.random.normal(ks[6], (B, S, d_model), jnp.float32)

    # One-time parameter preprocessing (hoisted out of the per-call path).
    prepared = prepare_params(params, d_k=d_k)

    out = encoder_hier(x, prepared, n_layers=n_layers, d_k=d_k, d_v=d_v,
                       n_head=n_head)
    out = jax.block_until_ready(out)

    ref = encoder_hier_ref(x, params, n_layers=n_layers, d_k=d_k, d_v=d_v,
                           n_head=n_head)
    # Tolerance reflects bf16 MXU operands (f32 accumulation) and the EUP
    # approximate reciprocal in the softmax denominator, compounded over
    # n_layers=2; the reference is pure f32.
    np.testing.assert_allclose(np.asarray(out), np.asarray(ref),
                               rtol=5e-2, atol=5e-2)
    print("KERNEL_OK")
</pallas_src>

<mosaic_0001>
module attributes {stable_mosaic.version = 11 : i64} {
  func.func @encoder_hier_kernel(%arg0: memref<16x32xf32, #tpu.memory_space<vmem>>, %arg1: memref<32x96xbf16, #tpu.memory_space<vmem>>, %arg2: memref<32x32xbf16, #tpu.memory_space<vmem>>, %arg3: memref<32x64xbf16, #tpu.memory_space<vmem>>, %arg4: memref<64x32xbf16, #tpu.memory_space<vmem>>, %arg5: memref<16x32xf32, #tpu.memory_space<vmem>>) attributes {dimension_semantics = [], scalar_prefetch = 0 : i64, scratch_operands = 0 : i64, tpu.core_type = #tpu.core_type<tc>} {
    %c0 = arith.constant 0 : index
    %c0_0 = arith.constant 0 : index
    %0 = vector.load %arg1[%c0, %c0_0] : memref<32x96xbf16, #tpu.memory_space<vmem>>, vector<32x96xbf16>
    %c0_1 = arith.constant 0 : index
    %c0_2 = arith.constant 0 : index
    %1 = vector.load %arg2[%c0_1, %c0_2] : memref<32x32xbf16, #tpu.memory_space<vmem>>, vector<32x32xbf16>
    %c0_3 = arith.constant 0 : index
    %c0_4 = arith.constant 0 : index
    %2 = vector.load %arg3[%c0_3, %c0_4] : memref<32x64xbf16, #tpu.memory_space<vmem>>, vector<32x64xbf16>
    %c0_5 = arith.constant 0 : index
    %c0_6 = arith.constant 0 : index
    %3 = vector.load %arg4[%c0_5, %c0_6] : memref<64x32xbf16, #tpu.memory_space<vmem>>, vector<64x32xbf16>
    %c0_7 = arith.constant 0 : index
    %c0_8 = arith.constant 0 : index
    %4 = vector.load %arg0[%c0_7, %c0_8] : memref<16x32xf32, #tpu.memory_space<vmem>>, vector<16x32xf32>
    %5 = arith.truncf %4 : vector<16x32xf32> to vector<16x32xbf16>
    %cst = arith.constant dense<0.000000e+00> : vector<16x96xf32>
    %6 = tpu.matmul %5, %0, %cst {dimension_numbers = #tpu.dot_dimension_numbers<[1], [0], [0], [1], [0, 0, 1, 1], [], []>} : vector<16x32xbf16>, vector<32x96xbf16>, vector<16x96xf32> -> vector<16x96xf32>
    %7 = vector.shape_cast %6 : vector<16x96xf32> to vector<2x8x96xf32>
    %8 = vector.extract_strided_slice %7 {offsets = [0, 0, 0], sizes = [2, 8, 32], strides = [1, 1, 1]} : vector<2x8x96xf32> to vector<2x8x32xf32>
    %9 = vector.shape_cast %8 : vector<2x8x32xf32> to vector<2x8x4x8xf32>
    %10 = tpu.transpose %9, [0, 2, 1, 3] : vector<2x8x4x8xf32> -> vector<2x4x8x8xf32>
    %11 = vector.shape_cast %10 : vector<2x4x8x8xf32> to vector<8x8x8xf32>
    %12 = vector.extract_strided_slice %7 {offsets = [0, 0, 32], sizes = [2, 8, 32], strides = [1, 1, 1]} : vector<2x8x96xf32> to vector<2x8x32xf32>
    %13 = vector.shape_cast %12 : vector<2x8x32xf32> to vector<2x8x4x8xf32>
    %14 = tpu.transpose %13, [0, 2, 1, 3] : vector<2x8x4x8xf32> -> vector<2x4x8x8xf32>
    %15 = vector.shape_cast %14 : vector<2x4x8x8xf32> to vector<8x8x8xf32>
    %16 = vector.extract_strided_slice %7 {offsets = [0, 0, 64], sizes = [2, 8, 32], strides = [1, 1, 1]} : vector<2x8x96xf32> to vector<2x8x32xf32>
    %17 = vector.shape_cast %16 : vector<2x8x32xf32> to vector<2x8x4x8xf32>
    %18 = tpu.transpose %17, [0, 2, 1, 3] : vector<2x8x4x8xf32> -> vector<2x4x8x8xf32>
    %19 = vector.shape_cast %18 : vector<2x4x8x8xf32> to vector<8x8x8xf32>
    %20 = arith.truncf %11 : vector<8x8x8xf32> to vector<8x8x8xbf16>
    %21 = arith.truncf %15 : vector<8x8x8xf32> to vector<8x8x8xbf16>
    "tpu.trace_start"() <{level = 10 : i32, message = "bqd,bkd->bqk"}> : () -> ()
    %cst_9 = arith.constant dense<0.000000e+00> : vector<8x8x8xf32>
    %22 = tpu.matmul %20, %21, %cst_9 {dimension_numbers = #tpu.dot_dimension_numbers<[2], [2], [1], [1], [0, 0, 0, 1, 1, 1], [0], [0]>} : vector<8x8x8xbf16>, vector<8x8x8xbf16>, vector<8x8x8xf32> -> vector<8x8x8xf32>
    "tpu.trace_stop"() : () -> ()
    %cst_10 = arith.constant dense<0xFF800000> : vector<8x8xf32>
    %23 = vector.multi_reduction <maximumf>, %22, %cst_10 [2] : vector<8x8x8xf32> to vector<8x8xf32>
    %24 = vector.shape_cast %23 : vector<8x8xf32> to vector<8x8x1xf32>
    %25 = vector.broadcast %24 : vector<8x8x1xf32> to vector<8x8x8xf32>
    %26 = arith.subf %22, %25 : vector<8x8x8xf32>
    %27 = math.exp %26 : vector<8x8x8xf32>
    %cst_11 = arith.constant dense<0.000000e+00> : vector<8x8xf32>
    %28 = vector.multi_reduction <add>, %27, %cst_11 [2] : vector<8x8x8xf32> to vector<8x8xf32>
    %29 = vector.shape_cast %28 : vector<8x8xf32> to vector<8x8x1xf32>
    %30 = tpu.reciprocal %29 {approx = true} : vector<8x8x1xf32> -> vector<8x8x1xf32>
    %31 = vector.broadcast %30 : vector<8x8x1xf32> to vector<8x8x8xf32>
    %32 = arith.mulf %27, %31 : vector<8x8x8xf32>
    %33 = arith.truncf %32 : vector<8x8x8xf32> to vector<8x8x8xbf16>
    %34 = arith.truncf %19 : vector<8x8x8xf32> to vector<8x8x8xbf16>
    "tpu.trace_start"() <{level = 10 : i32, message = "bqk,bkd->bqd"}> : () -> ()
    %cst_12 = arith.constant dense<0.000000e+00> : vector<8x8x8xf32>
    %35 = tpu.matmul %33, %34, %cst_12 {dimension_numbers = #tpu.dot_dimension_numbers<[2], [1], [1], [2], [0, 0, 0, 1, 1, 2], [0], [0]>} : vector<8x8x8xbf16>, vector<8x8x8xbf16>, vector<8x8x8xf32> -> vector<8x8x8xf32>
    "tpu.trace_stop"() : () -> ()
    %36 = vector.shape_cast %35 : vector<8x8x8xf32> to vector<2x4x8x8xf32>
    %37 = tpu.transpose %36, [0, 2, 1, 3] : vector<2x4x8x8xf32> -> vector<2x8x4x8xf32>
    %38 = vector.shape_cast %37 : vector<2x8x4x8xf32> to vector<16x32xf32>
    %39 = arith.truncf %38 : vector<16x32xf32> to vector<16x32xbf16>
    %cst_13 = arith.constant dense<0.000000e+00> : vector<16x32xf32>
    %40 = tpu.matmul %39, %1, %cst_13 {dimension_numbers = #tpu.dot_dimension_numbers<[1], [0], [0], [1], [0, 0, 1, 1], [], []>} : vector<16x32xbf16>, vector<32x32xbf16>, vector<16x32xf32> -> vector<16x32xf32>
    %41 = arith.addf %40, %4 : vector<16x32xf32>
    %cst_14 = arith.constant dense<0.000000e+00> : vector<16xf32>
    %42 = vector.multi_reduction <add>, %41, %cst_14 [1] : vector<16x32xf32> to vector<16xf32>
    %43 = vector.shape_cast %42 : vector<16xf32> to vector<16x1xf32>
    %cst_15 = arith.constant 3.200000e+01 : f32
    %44 = vector.broadcast %cst_15 : f32 to vector<16x1xf32>
    %45 = arith.divf %43, %44 : vector<16x1xf32>
    %46 = vector.broadcast %45 : vector<16x1xf32> to vector<16x32xf32>
    %47 = arith.subf %41, %46 : vector<16x32xf32>
    %48 = arith.mulf %47, %47 : vector<16x32xf32>
    %cst_16 = arith.constant dense<0.000000e+00> : vector<16xf32>
    %49 = vector.multi_reduction <add>, %48, %cst_16 [1] : vector<16x32xf32> to vector<16xf32>
    %50 = vector.shape_cast %49 : vector<16xf32> to vector<16x1xf32>
    %cst_17 = arith.constant 3.200000e+01 : f32
    %51 = vector.broadcast %cst_17 : f32 to vector<16x1xf32>
    %52 = arith.divf %50, %51 : vector<16x1xf32>
    %53 = vector.broadcast %45 : vector<16x1xf32> to vector<16x32xf32>
    %54 = arith.subf %41, %53 : vector<16x32xf32>
    %cst_18 = arith.constant 9.99999974E-6 : f32
    %55 = vector.broadcast %cst_18 : f32 to vector<16x1xf32>
    %56 = arith.addf %52, %55 : vector<16x1xf32>
    %57 = math.rsqrt %56 : vector<16x1xf32>
    %58 = vector.broadcast %57 : vector<16x1xf32> to vector<16x32xf32>
    %59 = arith.mulf %54, %58 : vector<16x32xf32>
    %60 = arith.truncf %59 : vector<16x32xf32> to vector<16x32xbf16>
    %cst_19 = arith.constant dense<0.000000e+00> : vector<16x64xf32>
    %61 = tpu.matmul %60, %2, %cst_19 {dimension_numbers = #tpu.dot_dimension_numbers<[1], [0], [0], [1], [0, 0, 1, 1], [], []>} : vector<16x32xbf16>, vector<32x64xbf16>, vector<16x64xf32> -> vector<16x64xf32>
    %cst_20 = arith.constant 0.000000e+00 : f32
    %62 = vector.broadcast %cst_20 : f32 to vector<16x64xf32>
    %63 = arith.maximumf %61, %62 : vector<16x64xf32>
    %64 = arith.truncf %63 : vector<16x64xf32> to vector<16x64xbf16>
    %cst_21 = arith.constant dense<0.000000e+00> : vector<16x32xf32>
    %65 = tpu.matmul %64, %3, %cst_21 {dimension_numbers = #tpu.dot_dimension_numbers<[1], [0], [0], [1], [0, 0, 1, 1], [], []>} : vector<16x64xbf16>, vector<64x32xbf16>, vector<16x32xf32> -> vector<16x32xf32>
    %66 = arith.addf %65, %59 : vector<16x32xf32>
    %cst_22 = arith.constant dense<0.000000e+00> : vector<16xf32>
    %67 = vector.multi_reduction <add>, %66, %cst_22 [1] : vector<16x32xf32> to vector<16xf32>
    %68 = vector.shape_cast %67 : vector<16xf32> to vector<16x1xf32>
    %cst_23 = arith.constant 3.200000e+01 : f32
    %69 = vector.broadcast %cst_23 : f32 to vector<16x1xf32>
    %70 = arith.divf %68, %69 : vector<16x1xf32>
    %71 = vector.broadcast %70 : vector<16x1xf32> to vector<16x32xf32>
    %72 = arith.subf %66, %71 : vector<16x32xf32>
    %73 = arith.mulf %72, %72 : vector<16x32xf32>
    %cst_24 = arith.constant dense<0.000000e+00> : vector<16xf32>
    %74 = vector.multi_reduction <add>, %73, %cst_24 [1] : vector<16x32xf32> to vector<16xf32>
    %75 = vector.shape_cast %74 : vector<16xf32> to vector<16x1xf32>
    %cst_25 = arith.constant 3.200000e+01 : f32
    %76 = vector.broadcast %cst_25 : f32 to vector<16x1xf32>
    %77 = arith.divf %75, %76 : vector<16x1xf32>
    %78 = vector.broadcast %70 : vector<16x1xf32> to vector<16x32xf32>
    %79 = arith.subf %66, %78 : vector<16x32xf32>
    %cst_26 = arith.constant 9.99999974E-6 : f32
    %80 = vector.broadcast %cst_26 : f32 to vector<16x1xf32>
    %81 = arith.addf %77, %80 : vector<16x1xf32>
    %82 = math.rsqrt %81 : vector<16x1xf32>
    %83 = vector.broadcast %82 : vector<16x1xf32> to vector<16x32xf32>
    %84 = arith.mulf %79, %83 : vector<16x32xf32>
    %85 = arith.truncf %84 : vector<16x32xf32> to vector<16x32xbf16>
    %cst_27 = arith.constant dense<0.000000e+00> : vector<16x96xf32>
    %86 = tpu.matmul %85, %0, %cst_27 {dimension_numbers = #tpu.dot_dimension_numbers<[1], [0], [0], [1], [0, 0, 1, 1], [], []>} : vector<16x32xbf16>, vector<32x96xbf16>, vector<16x96xf32> -> vector<16x96xf32>
    %87 = vector.shape_cast %86 : vector<16x96xf32> to vector<2x8x96xf32>
    %88 = vector.extract_strided_slice %87 {offsets = [0, 0, 0], sizes = [2, 8, 32], strides = [1, 1, 1]} : vector<2x8x96xf32> to vector<2x8x32xf32>
    %89 = vector.shape_cast %88 : vector<2x8x32xf32> to vector<2x8x4x8xf32>
    %90 = tpu.transpose %89, [0, 2, 1, 3] : vector<2x8x4x8xf32> -> vector<2x4x8x8xf32>
    %91 = vector.shape_cast %90 : vector<2x4x8x8xf32> to vector<8x8x8xf32>
    %92 = vector.extract_strided_slice %87 {offsets = [0, 0, 32], sizes = [2, 8, 32], strides = [1, 1, 1]} : vector<2x8x96xf32> to vector<2x8x32xf32>
    %93 = vector.shape_cast %92 : vector<2x8x32xf32> to vector<2x8x4x8xf32>
    %94 = tpu.transpose %93, [0, 2, 1, 3] : vector<2x8x4x8xf32> -> vector<2x4x8x8xf32>
    %95 = vector.shape_cast %94 : vector<2x4x8x8xf32> to vector<8x8x8xf32>
    %96 = vector.extract_strided_slice %87 {offsets = [0, 0, 64], sizes = [2, 8, 32], strides = [1, 1, 1]} : vector<2x8x96xf32> to vector<2x8x32xf32>
    %97 = vector.shape_cast %96 : vector<2x8x32xf32> to vector<2x8x4x8xf32>
    %98 = tpu.transpose %97, [0, 2, 1, 3] : vector<2x8x4x8xf32> -> vector<2x4x8x8xf32>
    %99 = vector.shape_cast %98 : vector<2x4x8x8xf32> to vector<8x8x8xf32>
    %100 = arith.truncf %91 : vector<8x8x8xf32> to vector<8x8x8xbf16>
    %101 = arith.truncf %95 : vector<8x8x8xf32> to vector<8x8x8xbf16>
    "tpu.trace_start"() <{level = 10 : i32, message = "bqd,bkd->bqk"}> : () -> ()
    %cst_28 = arith.constant dense<0.000000e+00> : vector<8x8x8xf32>
    %102 = tpu.matmul %100, %101, %cst_28 {dimension_numbers = #tpu.dot_dimension_numbers<[2], [2], [1], [1], [0, 0, 0, 1, 1, 1], [0], [0]>} : vector<8x8x8xbf16>, vector<8x8x8xbf16>, vector<8x8x8xf32> -> vector<8x8x8xf32>
    "tpu.trace_stop"() : () -> ()
    %cst_29 = arith.constant dense<0xFF800000> : vector<8x8xf32>
    %103 = vector.multi_reduction <maximumf>, %102, %cst_29 [2] : vector<8x8x8xf32> to vector<8x8xf32>
    %104 = vector.shape_cast %103 : vector<8x8xf32> to vector<8x8x1xf32>
    %105 = vector.broadcast %104 : vector<8x8x1xf32> to vector<8x8x8xf32>
    %106 = arith.subf %102, %105 : vector<8x8x8xf32>
    %107 = math.exp %106 : vector<8x8x8xf32>
    %cst_30 = arith.constant dense<0.000000e+00> : vector<8x8xf32>
    %108 = vector.multi_reduction <add>, %107, %cst_30 [2] : vector<8x8x8xf32> to vector<8x8xf32>
    %109 = vector.shape_cast %108 : vector<8x8xf32> to vector<8x8x1xf32>
    %110 = tpu.reciprocal %109 {approx = true} : vector<8x8x1xf32> -> vector<8x8x1xf32>
    %111 = vector.broadcast %110 : vector<8x8x1xf32> to vector<8x8x8xf32>
    %112 = arith.mulf %107, %111 : vector<8x8x8xf32>
    %113 = arith.truncf %112 : vector<8x8x8xf32> to vector<8x8x8xbf16>
    %114 = arith.truncf %99 : vector<8x8x8xf32> to vector<8x8x8xbf16>
    "tpu.trace_start"() <{level = 10 : i32, message = "bqk,bkd->bqd"}> : () -> ()
    %cst_31 = arith.constant dense<0.000000e+00> : vector<8x8x8xf32>
    %115 = tpu.matmul %113, %114, %cst_31 {dimension_numbers = #tpu.dot_dimension_numbers<[2], [1], [1], [2], [0, 0, 0, 1, 1, 2], [0], [0]>} : vector<8x8x8xbf16>, vector<8x8x8xbf16>, vector<8x8x8xf32> -> vector<8x8x8xf32>
    "tpu.trace_stop"() : () -> ()
    %116 = vector.shape_cast %115 : vector<8x8x8xf32> to vector<2x4x8x8xf32>
    %117 = tpu.transpose %116, [0, 2, 1, 3] : vector<2x4x8x8xf32> -> vector<2x8x4x8xf32>
    %118 = vector.shape_cast %117 : vector<2x8x4x8xf32> to vector<16x32xf32>
    %119 = arith.truncf %118 : vector<16x32xf32> to vector<16x32xbf16>
    %cst_32 = arith.constant dense<0.000000e+00> : vector<16x32xf32>
    %120 = tpu.matmul %119, %1, %cst_32 {dimension_numbers = #tpu.dot_dimension_numbers<[1], [0], [0], [1], [0, 0, 1, 1], [], []>} : vector<16x32xbf16>, vector<32x32xbf16>, vector<16x32xf32> -> vector<16x32xf32>
    %121 = arith.addf %120, %84 : vector<16x32xf32>
    %cst_33 = arith.constant dense<0.000000e+00> : vector<16xf32>
    %122 = vector.multi_reduction <add>, %121, %cst_33 [1] : vector<16x32xf32> to vector<16xf32>
    %123 = vector.shape_cast %122 : vector<16xf32> to vector<16x1xf32>
    %cst_34 = arith.constant 3.200000e+01 : f32
    %124 = vector.broadcast %cst_34 : f32 to vector<16x1xf32>
    %125 = arith.divf %123, %124 : vector<16x1xf32>
    %126 = vector.broadcast %125 : vector<16x1xf32> to vector<16x32xf32>
    %127 = arith.subf %121, %126 : vector<16x32xf32>
    %128 = arith.mulf %127, %127 : vector<16x32xf32>
    %cst_35 = arith.constant dense<0.000000e+00> : vector<16xf32>
    %129 = vector.multi_reduction <add>, %128, %cst_35 [1] : vector<16x32xf32> to vector<16xf32>
    %130 = vector.shape_cast %129 : vector<16xf32> to vector<16x1xf32>
    %cst_36 = arith.constant 3.200000e+01 : f32
    %131 = vector.broadcast %cst_36 : f32 to vector<16x1xf32>
    %132 = arith.divf %130, %131 : vector<16x1xf32>
    %133 = vector.broadcast %125 : vector<16x1xf32> to vector<16x32xf32>
    %134 = arith.subf %121, %133 : vector<16x32xf32>
    %cst_37 = arith.constant 9.99999974E-6 : f32
    %135 = vector.broadcast %cst_37 : f32 to vector<16x1xf32>
    %136 = arith.addf %132, %135 : vector<16x1xf32>
    %137 = math.rsqrt %136 : vector<16x1xf32>
    %138 = vector.broadcast %137 : vector<16x1xf32> to vector<16x32xf32>
    %139 = arith.mulf %134, %138 : vector<16x32xf32>
    %140 = arith.truncf %139 : vector<16x32xf32> to vector<16x32xbf16>
    %cst_38 = arith.constant dense<0.000000e+00> : vector<16x64xf32>
    %141 = tpu.matmul %140, %2, %cst_38 {dimension_numbers = #tpu.dot_dimension_numbers<[1], [0], [0], [1], [0, 0, 1, 1], [], []>} : vector<16x32xbf16>, vector<32x64xbf16>, vector<16x64xf32> -> vector<16x64xf32>
    %cst_39 = arith.constant 0.000000e+00 : f32
    %142 = vector.broadcast %cst_39 : f32 to vector<16x64xf32>
    %143 = arith.maximumf %141, %142 : vector<16x64xf32>
    %144 = arith.truncf %143 : vector<16x64xf32> to vector<16x64xbf16>
    %cst_40 = arith.constant dense<0.000000e+00> : vector<16x32xf32>
    %145 = tpu.matmul %144, %3, %cst_40 {dimension_numbers = #tpu.dot_dimension_numbers<[1], [0], [0], [1], [0, 0, 1, 1], [], []>} : vector<16x64xbf16>, vector<64x32xbf16>, vector<16x32xf32> -> vector<16x32xf32>
    %146 = arith.addf %145, %139 : vector<16x32xf32>
    %cst_41 = arith.constant dense<0.000000e+00> : vector<16xf32>
    %147 = vector.multi_reduction <add>, %146, %cst_41 [1] : vector<16x32xf32> to vector<16xf32>
    %148 = vector.shape_cast %147 : vector<16xf32> to vector<16x1xf32>
    %cst_42 = arith.constant 3.200000e+01 : f32
    %149 = vector.broadcast %cst_42 : f32 to vector<16x1xf32>
    %150 = arith.divf %148, %149 : vector<16x1xf32>
    %151 = vector.broadcast %150 : vector<16x1xf32> to vector<16x32xf32>
    %152 = arith.subf %146, %151 : vector<16x32xf32>
    %153 = arith.mulf %152, %152 : vector<16x32xf32>
    %cst_43 = arith.constant dense<0.000000e+00> : vector<16xf32>
    %154 = vector.multi_reduction <add>, %153, %cst_43 [1] : vector<16x32xf32> to vector<16xf32>
    %155 = vector.shape_cast %154 : vector<16xf32> to vector<16x1xf32>
    %cst_44 = arith.constant 3.200000e+01 : f32
    %156 = vector.broadcast %cst_44 : f32 to vector<16x1xf32>
    %157 = arith.divf %155, %156 : vector<16x1xf32>
    %158 = vector.broadcast %150 : vector<16x1xf32> to vector<16x32xf32>
    %159 = arith.subf %146, %158 : vector<16x32xf32>
    %cst_45 = arith.constant 9.99999974E-6 : f32
    %160 = vector.broadcast %cst_45 : f32 to vector<16x1xf32>
    %161 = arith.addf %157, %160 : vector<16x1xf32>
    %162 = math.rsqrt %161 : vector<16x1xf32>
    %163 = vector.broadcast %162 : vector<16x1xf32> to vector<16x32xf32>
    %164 = arith.mulf %159, %163 : vector<16x32xf32>
    %c0_46 = arith.constant 0 : index
    %c0_47 = arith.constant 0 : index
    %165 = vector.load %arg5[%c0_46, %c0_47] : memref<16x32xf32, #tpu.memory_space<vmem>>, vector<16x32xf32>
    tpu.vector_store %arg5[%c0_46, %c0_47], %164 {strides = array<i32>} : memref<16x32xf32, #tpu.memory_space<vmem>>, vector<16x32xf32>,
    return
  }
}

</mosaic_0001>

<bundles_post_ra>
// kernel: tpu_custom_call.1
= control target key start
LH: loop header
LB: loop body
LE: loop exit
PB: predicated region body
PF: predicated region fallthrough
CT: control target
= control target key end

     0   :  { %10 = vsyncpa [#allocation3], 0  ;;  %s4792_s0 = inlined_call_operand.vmem [shape: f32[16,32], index: 0, kind: input, shape index: {}]   ;;  %s4793_s1 = inlined_call_operand.vmem [shape: bf16[32,96], index: 1, kind: input, shape index: {}]   ;;  %s4794_s2 = inlined_call_operand.vmem [shape: bf16[32,32], index: 2, kind: input, shape index: {}]   ;;  %s4795_s3 = inlined_call_operand.hbm [shape: bf16[32,64], index: 3, kind: input, shape index: {}]   ;;  %s4796_s4 = inlined_call_operand.vmem [shape: bf16[64,32], index: 4, kind: input, shape index: {}]   ;;  %s4797_s5 = inlined_call_operand.hbm [shape: f32[16,32], index: 5, kind: output, shape index: {}]  }
   0x1   :  { %11 = vsyncpa [#allocation4], 0  ;;  %s22_s20 = sshll.u32 %s4795_s3, 4  ;;  %s3644_s21 = smov [#allocation2]   ;;  %s23_s20 = int_to_ptr.hbm [resolvable:$true] %s22_s20 }
   0x2   :  { %s24_s22 = sshll.u32 %s3644_s21, 4  ;;  %s3645_s23 = smov 64   ;;  %s25_s22 = int_to_ptr.vmem [resolvable:$true] %s24_s22 }
   0x3   :  { %s3646_s24 = smov 4  }
   0x4   :  { %30 = dma.hbm_to_vmem [thread:$0]  %s23_s20, 256, %s25_s22, [#allocation3], %s3645_s23, %s3645_s23, %s3646_s24  }
   0x5   :  { %3640 = dma.done.wait [#allocation3], 256  }
   0x6   :  { %3641 = vsyncadd [#allocation3], 4294967040  ;;  %v3364_v0 = vld [vmem:[%s4793_s1 + $0x8] sm:$0xff]  ;;  %v3363_v1 = vld [vmem:[%s4793_s1] sm:$0xff]  ;;  %vm73_vm0 = vcmask 261120   ;;  %s3647_s7 = smov 104  }
   0x7   :  { %83 = vmatpush.bf16.msra.mxu0 %v3364_v0  ;;  %v58_v2 = vld [vmem:[%s4792_s0] sm:$0xff]  ;;  %v59_v3 = vld [vmem:[%s4792_s0 + $0x8] sm:$0xff]  ;;  %s3648_s8 = smov 120   ;;  %s3649_s9 = smov 112   ;;  %v3650_v8 = vmov 1983009808  }
   0x8   :  { %v60_v4 = vpack.c.bf16 %v59_v3, %v58_v2  ;;  %v117_v9 = vunpack.c.l.s4 %v3650_v8  ;;  %vm112_vm1 = vcmask 1047556   ;;  %s3651_s10 = smov 96   ;;  %v3652_v20 = vmov 1934713408   ;;  %s3654_s15 = smov 24  }
   0x9   :  { %v141_v21 = vunpack.c.l.s4 %v3652_v20  ;;  %vm836_vm2 = vcmask 64512   ;;  %vm1096_vm3 = vcmask 1043456   ;;  %s3655_s16 = smov 8   ;;  %vm1492_vm4 = vcmask 130048   ;;  %s3657_s19 = smov [#allocation5]  }
   0xa   :  { %v3726_v17 = vunpack.c.0.s8 %v117_v9  ;;  %vm1495_vm5 = vcmask 195584   ;;  %vm1636_vm13 = vcmask 523264   ;;  %s3268_s20 = sshll.u32 %s3657_s19, 4  ;;  %s3658_s21 = smov 128   ;;  %s3269_s20 = int_to_ptr.vmem [resolvable:$true] %s3268_s20 }
   0xb   :  { %84 = vmatpush.bf16.msra.mxu0 %v3363_v1  ;;  %v3746_v33 = vunpack.c.0.s8 %v141_v21 }
   0xe   :  { %3291 = vmatmul.msk.bf16.vlgmr.msra.gmra.mxu0 %vm73_vm0, %v60_v4 }
  0x8b   :  { %v86_v5 = vpop.f32.mrf.mxu0 }
  0x8c   :  { %105 = vrot.lane.b32.xlu1 %v86_v5, %s3647_s7  ;;  %93 = vrot.lane.b32.xlu0 %v86_v5, %s3648_s8  ;;  %v114_v22 = vrot.slane %v86_v5, 4 }
  0x93   :  { %v3709_v6 = vpop.f32.mrf.mxu0 }
  0x94   :  { %99 = vrot.lane.b32.xlu0 %v86_v5, %s3649_s9  ;;  %101 = vrot.lane.b32.xlu2 %v3709_v6, %s3649_s9 }
  0x95   :  { %95 = vrot.lane.b32.xlu1 %v3709_v6, %s3648_s8 }
  0x9c   :  { %107 = vrot.lane.b32.xlu2 %v3709_v6, %s3647_s7 }
  0xee   :  { %v3718_v7 = vpop.permute.xlu2 %101 }
  0xf6   :  { %v3728_v18 = vpop.permute.xlu2 %107 }
  0xf7   :  { %v3737_v28 = vpack.i.bf16 %v3728_v18, %v3718_v7 }
  0xfe   :  { %v106_v10 = vpop.permute.xlu1 %105  ;;  %v94_v11 = vpop.permute.xlu0 %93 }
  0xff   :  { %v124_v12 = vrot.slane %v106_v10, 4  ;;  %v126_v13 = vrot.slane %v94_v11, 4  ;;  %v3720_v14 = vpack.i.bf16 %v94_v11, %v86_v5 }
 0x101   :  { %v125_v15 = vsel %vm112_vm1, %v124_v12, %v94_v11  ;;  %v127_v16 = vsel %vm112_vm1, %v106_v10, %v126_v13  ;;  %3389 = vrot.lane.b32.xlu0 %v3720_v14, %s3651_s10 }
 0x102   :  { %v135_v19 = vperm.slane %v127_v16, %v3726_v17  ;;  %v131_v23 = vperm.slane %v125_v15, %v3726_v17 }
 0x104   :  { %v148_v30 = vrot.slane %v135_v19, 4  ;;  %v136_v35 = vrot.slane %v131_v23, 4 }
 0x106   :  { %v100_v24 = vpop.permute.xlu0 %99 }
 0x107   :  { %v111_v25 = vrot.slane %v100_v24, 4  ;;  %v115_v26 = vsel %vm112_vm1, %v100_v24, %v114_v22  ;;  %v3733_v27 = vpop.permute.xlu1 %95  ;;  %v3739_v29 = vpack.i.bf16 %v106_v10, %v100_v24 }
 0x108   :  { %v123_v31 = vperm.slane %v115_v26, %v3726_v17  ;;  %v3744_v32 = vpack.i.bf16 %v3733_v27, %v3709_v6  ;;  %v168_v26 = vrot.slane %v3718_v7, 4 }
 0x109   :  { %v113_v34 = vsel %vm112_vm1, %v111_v25, %v86_v5  ;;  %3404 = vrot.lane.b32.xlu0 %v3737_v28, %s3651_s10  ;;  %3394 = vrot.lane.b32.xlu1 %v3739_v29, %s3651_s10 }
 0x10a   :  { %v119_v36 = vperm.slane %v113_v34, %v3726_v17  ;;  %v149_v37 = vsel %vm112_vm1, %v148_v30, %v123_v31  ;;  %v150_v38 = vrot.slane %v123_v31, 4  ;;  %3399 = vrot.lane.b32.xlu2 %v3744_v32, %s3651_s10  ;;  %v182_v30 = vrot.slane %v3733_v27, 4 }
 0x10b   :  { %v155_v42 = vperm.slane %v149_v37, %v3746_v33  ;;  %v169_v31 = vsel %vm112_vm1, %v168_v26, %v3709_v6  ;;  %v170_v34 = vrot.slane %v3709_v6, 4 }
 0x10c   :  { %v137_v39 = vsel %vm112_vm1, %v136_v35, %v119_v36  ;;  %v138_v40 = vrot.slane %v119_v36, 4  ;;  %v151_v41 = vsel %vm112_vm1, %v135_v19, %v150_v38  ;;  %v180_v35 = vrot.slane %v3728_v18, 4 }
 0x10d   :  { %v159_v43 = vperm.slane %v151_v41, %v3746_v33  ;;  %v143_v45 = vperm.slane %v137_v39, %v3746_v33  ;;  %v164_v49 = vrot.slane %v155_v42, 4  ;;  %v171_v36 = vsel %vm112_vm1, %v3718_v7, %v170_v34 }
 0x10e   :  { %v139_v44 = vsel %vm112_vm1, %v131_v23, %v138_v40  ;;  %v181_v37 = vsel %vm112_vm1, %v180_v35, %v3733_v27  ;;  %v175_v38 = vperm.slane %v169_v31, %v3726_v17  ;;  %v183_v39 = vsel %vm112_vm1, %v3728_v18, %v182_v30 }
 0x10f   :  { %v147_v46 = vperm.slane %v139_v44, %v3746_v33  ;;  %v166_v47 = vrot.slane %v159_v43, 4  ;;  %v160_v54 = vrot.slane %v143_v45, 4  ;;  %v165_v57 = vsel %vm112_vm1, 0.0, %v164_v49 }
 0x110   :  { %v179_v40 = vperm.slane %v171_v36, %v3726_v17  ;;  %v187_v41 = vperm.slane %v181_v37, %v3726_v17  ;;  %v194_v6 = vrot.slane %v175_v38, 4 }
 0x111   :  { %v162_v48 = vrot.slane %v147_v46, 4  ;;  %v167_v50 = vsel %vm112_vm1, 0.0, %v166_v47  ;;  %v235_v51 = vsel %vm112_vm1, %v166_v47, %v155_v42  ;;  %v161_v62 = vsel %vm112_vm1, 0.0, %v160_v54 }
 0x112   :  { %v239_v52 = vperm.slane %v235_v51, %v3726_v17  ;;  %v240_v53 = vrot.slane %v167_v50, 4  ;;  %v191_v42 = vperm.slane %v183_v39, %v3726_v17  ;;  %v206_v43 = vrot.slane %v179_v40, 4 }
 0x113   :  { %v163_v55 = vsel %vm112_vm1, 0.0, %v162_v48  ;;  %v224_v56 = vsel %vm112_vm1, %v162_v48, %v143_v45  ;;  %v192_v44 = vrot.slane %v187_v41, 4  ;;  %v195_v45 = vsel %vm112_vm1, %v187_v41, %v194_v6 }
 0x114   :  { %v228_v58 = vperm.slane %v224_v56, %v3726_v17  ;;  %v229_v59 = vrot.slane %v163_v55, 4  ;;  %v241_v60 = vsel %vm112_vm1, %v240_v53, %v165_v57  ;;  %v260_v61 = vrot.slane %v239_v52, 4 }
 0x115   :  { %v245_v63 = vperm.slane %v241_v60, %v3726_v17  ;;  %v204_v7 = vrot.slane %v191_v42, 4  ;;  %v207_v46 = vsel %vm112_vm1, %v191_v42, %v206_v43  ;;  %v203_v27 = vperm.slane %v195_v45, %v3746_v33 }
 0x116   :  { %v248_v0 = vrot.slane %v228_v58, 4  ;;  %v230_v1 = vsel %vm112_vm1, %v229_v59, %v161_v62  ;;  %v193_v47 = vsel %vm112_vm1, %v192_v44, %v175_v38  ;;  %v215_v48 = vperm.slane %v207_v46, %v3746_v33 }
 0x117   :  { %v234_v2 = vperm.slane %v230_v1, %v3726_v17  ;;  %v261_v3 = vsel %vm112_vm1, %v245_v63, %v260_v61  ;;  %v258_v4 = vrot.slane %v245_v63, 4  ;;  %v205_v18 = vsel %vm112_vm1, %v204_v7, %v179_v40 }
 0x118   :  { %v269_v5 = vperm.slane %v261_v3, %v3746_v33  ;;  %v199_v49 = vperm.slane %v193_v47, %v3746_v33  ;;  %v218_v50 = vrot.slane %v203_v27, 4  ;;  %v211_v51 = vperm.slane %v205_v18, %v3746_v33 }
 0x119   :  { %v249_v8 = vsel %vm112_vm1, %v234_v2, %v248_v0  ;;  %v246_v9 = vrot.slane %v234_v2, 4  ;;  %v259_v10 = vsel %vm112_vm1, %v258_v4, %v239_v52  ;;  %v222_v53 = vrot.slane %v215_v48, 4 }
 0x11a   :  { %v257_v11 = vperm.slane %v249_v8, %v3746_v33  ;;  %v274_v12 = vrot.slane %v269_v5, 4  ;;  %v265_v13 = vperm.slane %v259_v10, %v3746_v33  ;;  %v216_v55 = vrot.slane %v199_v49, 4 }
 0x11b   :  { %v247_v15 = vsel %vm112_vm1, %v246_v9, %v228_v58  ;;  %v219_v56 = vsel %vm112_vm1, 0.0, %v218_v50  ;;  %v220_v57 = vrot.slane %v211_v51, 4  ;;  %v278_v58 = vsel %vm112_vm1, %v218_v50, %v199_v49 }
 0x11c   :  { %v3784_v16 = vsel %vm112_vm1, %v274_v12, %v257_v11  ;;  %v276_v19 = vrot.slane %v257_v11, 4  ;;  %v253_v20 = vperm.slane %v247_v15, %v3746_v33  ;;  %v270_v21 = vrot.slane %v265_v13, 4 }
 0x11d   :  { %v223_v61 = vsel %vm112_vm1, 0.0, %v222_v53  ;;  %v283_v62 = vrot.slane %v219_v56, 4  ;;  %v217_v1 = vsel %vm112_vm1, 0.0, %v216_v55  ;;  %v3825_v2 = vperm.slane %v278_v58, %v3726_v17 }
 0x11e   :  { %v3788_v22 = vsel %vm112_vm1, %v270_v21, %v253_v20  ;;  %v3791_v23 = vsel %vm112_vm1, %v269_v5, %v276_v19  ;;  %v272_v24 = vrot.slane %v253_v20, 4  ;;  %v289_v3 = vsel %vm112_vm1, %v222_v53, %v211_v51 }
 0x11f   :  { %v221_v4 = vsel %vm112_vm1, 0.0, %v220_v57  ;;  %v294_v5 = vrot.slane %v223_v61, 4  ;;  %v3833_v26 = vperm.slane %v289_v3, %v3726_v17 }
 0x120   :  { %v3794_v25 = vsel %vm112_vm1, %v265_v13, %v272_v24  ;;  %v3830_v24 = vsel %vm112_vm1, %v283_v62, %v217_v1 }
 0x164   :  { %v3400_v54 = vpop.permute.xlu2 %3399 }
 0x165   :  { %v3402_v59 = vunpack.i.h.bf16 %v3400_v54  ;;  %v3401_v60 = vunpack.i.l.bf16 %v3400_v54 }
 0x167   :  { %v426_v8 = vrot.slane %v3402_v59, 4  ;;  %v414_v9 = vrot.slane %v3401_v60, 4 }
 0x173   :  { %v3390_v52 = vpop.permute.xlu0 %3389 }
 0x174   :  { %v3392_v63 = vunpack.i.h.bf16 %v3390_v52  ;;  %v3391_v0 = vunpack.i.l.bf16 %v3390_v52 }
 0x176   :  { %v370_v20 = vrot.slane %v3392_v63, 4  ;;  %v358_v21 = vrot.slane %v3391_v0, 4 }
 0x17b   :  { %v3405_v10 = vpop.permute.xlu0 %3404  ;;  %v3395_v11 = vpop.permute.xlu1 %3394 }
 0x17c   :  { %v3407_v12 = vunpack.i.h.bf16 %v3405_v10  ;;  %v3406_v13 = vunpack.i.l.bf16 %v3405_v10  ;;  %v3397_v15 = vunpack.i.h.bf16 %v3395_v11  ;;  %v3396_v19 = vunpack.i.l.bf16 %v3395_v11 }
 0x17e   :  { %v424_v30 = vrot.slane %v3407_v12, 4  ;;  %v412_v31 = vrot.slane %v3406_v13, 4  ;;  %v415_v34 = vsel %vm112_vm1, %v3406_v13, %v414_v9  ;;  %v427_v35 = vsel %vm112_vm1, %v3407_v12, %v426_v8 }
 0x17f   :  { %v423_v36 = vperm.slane %v415_v34, %v3726_v17  ;;  %v435_v37 = vperm.slane %v427_v35, %v3726_v17  ;;  %v368_v38 = vrot.slane %v3397_v15, 4  ;;  %v371_v39 = vsel %vm112_vm1, %v3397_v15, %v370_v20 }
 0x180   :  { %v413_v40 = vsel %vm112_vm1, %v412_v31, %v3401_v60  ;;  %v425_v41 = vsel %vm112_vm1, %v424_v30, %v3402_v59  ;;  %v379_v42 = vperm.slane %v371_v39, %v3726_v17  ;;  %v356_v6 = vrot.slane %v3396_v19, 4 }
 0x181   :  { %v419_v43 = vperm.slane %v413_v40, %v3726_v17  ;;  %v431_v44 = vperm.slane %v425_v41, %v3726_v17  ;;  %v448_v45 = vrot.slane %v435_v37, 4  ;;  %v450_v7 = vrot.slane %v423_v36, 4 }
 0x182   :  { %v369_v46 = vsel %vm112_vm1, %v368_v38, %v3392_v63  ;;  %v392_v27 = vrot.slane %v379_v42, 4  ;;  %v357_v47 = vsel %vm112_vm1, %v356_v6, %v3391_v0  ;;  %v359_v18 = vsel %vm112_vm1, %v3396_v19, %v358_v21 }
 0x183   :  { %v436_v48 = vrot.slane %v431_v44, 4  ;;  %v438_v49 = vrot.slane %v419_v43, 4  ;;  %v449_v50 = vsel %vm112_vm1, %v448_v45, %v423_v36  ;;  %v451_v51 = vsel %vm112_vm1, %v435_v37, %v450_v7 }
 0x184   :  { %v455_v52 = vperm.slane %v449_v50, %v3746_v33  ;;  %v459_v53 = vperm.slane %v451_v51, %v3746_v33  ;;  %v375_v54 = vperm.slane %v369_v46, %v3726_v17  ;;  %v363_v55 = vperm.slane %v357_v47, %v3726_v17 }
 0x185   :  { %v437_v56 = vsel %vm112_vm1, %v436_v48, %v419_v43  ;;  %v439_v57 = vsel %vm112_vm1, %v431_v44, %v438_v49  ;;  %v367_v58 = vperm.slane %v359_v18, %v3726_v17  ;;  %v3858_v59 = vsel %vm112_vm1, %v294_v5, %v221_v4 }
 0x186   :  { %v443_v60 = vperm.slane %v437_v56, %v3746_v33  ;;  %v447_v61 = vperm.slane %v439_v57, %v3746_v33  ;;  %v464_v62 = vrot.slane %v455_v52, 4  ;;  %v466_v63 = vrot.slane %v459_v53, 4 }
 0x187   :  { %v380_v0 = vrot.slane %v375_v54, 4  ;;  %v382_v1 = vrot.slane %v363_v55, 4  ;;  %v393_v3 = vsel %vm112_vm1, %v392_v27, %v367_v58  ;;  %v394_v8 = vrot.slane %v367_v58, 4 }
 0x188   :  { %v460_v9 = vrot.slane %v443_v60, 4  ;;  %v462_v10 = vrot.slane %v447_v61, 4  ;;  %v465_v11 = vsel %vm112_vm1, 0.0, %v464_v62  ;;  %v467_v12 = vsel %vm112_vm1, 0.0, %v466_v63 }
 0x189   :  { %v533_v4 = vsel %vm112_vm1, %v466_v63, %v455_v52  ;;  %v538_v5 = vrot.slane %v467_v12, 4  ;;  %v381_v13 = vsel %vm112_vm1, %v380_v0, %v363_v55  ;;  %v383_v15 = vsel %vm112_vm1, %v375_v54, %v382_v1 }
 0x18a   :  { %v463_v19 = vsel %vm112_vm1, 0.0, %v462_v10  ;;  %v387_v20 = vperm.slane %v381_v13, %v3746_v33  ;;  %v391_v21 = vperm.slane %v383_v15, %v3746_v33  ;;  %v395_v30 = vsel %vm112_vm1, %v379_v42, %v394_v8 }
 0x18b   :  { %v527_v31 = vrot.slane %v463_v19, 4  ;;  %v399_v34 = vperm.slane %v393_v3, %v3746_v33  ;;  %v403_v35 = vperm.slane %v395_v30, %v3746_v33  ;;  %v461_v36 = vsel %vm112_vm1, 0.0, %v460_v9 }
 0x18c   :  { %v404_v37 = vrot.slane %v387_v20, 4  ;;  %v406_v38 = vrot.slane %v391_v21, 4  ;;  %v522_v39 = vsel %vm112_vm1, %v462_v10, %v443_v60  ;;  %v537_v40 = vperm.slane %v533_v4, %v3726_v17 }
 0x18d   :  { %v408_v41 = vrot.slane %v399_v34, 4  ;;  %v410_v6 = vrot.slane %v403_v35, 4  ;;  %v526_v43 = vperm.slane %v522_v39, %v3726_v17  ;;  %v528_v44 = vsel %vm112_vm1, %v527_v31, %v461_v36 }
 0x18e   :  { %v407_v42 = vsel %vm112_vm1, 0.0, %v406_v38  ;;  %v405_v45 = vsel %vm112_vm1, 0.0, %v404_v37  ;;  %v468_v7 = vsel %vm112_vm1, %v406_v38, %v387_v20  ;;  %v532_v46 = vperm.slane %v528_v44, %v3726_v17 }
 0x18f   :  { %v409_v27 = vsel %vm112_vm1, 0.0, %v408_v41  ;;  %v411_v47 = vsel %vm112_vm1, 0.0, %v410_v6  ;;  %v472_v18 = vperm.slane %v468_v7, %v3726_v17  ;;  %v473_v48 = vrot.slane %v407_v42, 4 }
 0x190   :  { %v484_v49 = vrot.slane %v411_v47, 4  ;;  %v479_v50 = vsel %vm112_vm1, %v410_v6, %v399_v34  ;;  %v539_v51 = vsel %vm112_vm1, %v538_v5, %v465_v11  ;;  %v546_v52 = vrot.slane %v526_v43, 4 }
 0x191   :  { %v474_v53 = vsel %vm112_vm1, %v473_v48, %v405_v45  ;;  %v483_v54 = vperm.slane %v479_v50, %v3726_v17  ;;  %v492_v55 = vrot.slane %v472_v18, 4  ;;  %v543_v56 = vperm.slane %v539_v51, %v3726_v17 }
 0x192   :  { %v478_v57 = vperm.slane %v474_v53, %v3726_v17  ;;  %v485_v58 = vsel %vm112_vm1, %v484_v49, %v409_v27  ;;  %v547_v60 = vsel %vm112_vm1, %v532_v46, %v546_v52  ;;  %v558_v61 = vrot.slane %v537_v40, 4 }
 0x193   :  { %v489_v62 = vperm.slane %v485_v58, %v3726_v17  ;;  %v504_v63 = vrot.slane %v483_v54, 4  ;;  %v555_v0 = vperm.slane %v547_v60, %v3746_v33  ;;  %v544_v1 = vrot.slane %v532_v46, 4 }
 0x194   :  { %v493_v3 = vsel %vm112_vm1, %v478_v57, %v492_v55  ;;  %v559_v8 = vsel %vm112_vm1, %v543_v56, %v558_v61  ;;  %v490_v9 = vrot.slane %v478_v57, 4  ;;  %v556_v10 = vrot.slane %v543_v56, 4 }
 0x195   :  { %v501_v11 = vperm.slane %v493_v3, %v3746_v33  ;;  %v505_v12 = vsel %vm112_vm1, %v489_v62, %v504_v63  ;;  %v567_v4 = vperm.slane %v559_v8, %v3746_v33  ;;  %v574_v5 = vrot.slane %v555_v0, 4 }
 0x196   :  { %v513_v13 = vperm.slane %v505_v12, %v3746_v33  ;;  %v491_v15 = vsel %vm112_vm1, %v490_v9, %v472_v18  ;;  %v502_v19 = vrot.slane %v489_v62, 4  ;;  %v545_v20 = vsel %vm112_vm1, %v544_v1, %v526_v43 }
 0x197   :  { %v572_v21 = vrot.slane %v567_v4, 4  ;;  %v497_v30 = vperm.slane %v491_v15, %v3746_v33  ;;  %v520_v31 = vrot.slane %v501_v11, 4  ;;  %v551_v34 = vperm.slane %v545_v20, %v3746_v33 }
 0x198   :  { %v518_v35 = vrot.slane %v513_v13, 4  ;;  %v503_v36 = vsel %vm112_vm1, %v502_v19, %v483_v54  ;;  %v557_v37 = vsel %vm112_vm1, %v556_v10, %v537_v40  ;;  %v575_v38 = vsel %vm112_vm1, %v567_v4, %v574_v5 }
 0x199   :  { %v573_v39 = vsel %vm112_vm1, %v572_v21, %v555_v0  ;;  %v509_v41 = vperm.slane %v503_v36, %v3746_v33  ;;  %v521_v6 = vsel %vm112_vm1, %v513_v13, %v520_v31  ;;  %v563_v43 = vperm.slane %v557_v37, %v3746_v33 }
 0x19a   :  { %v519_v44 = vsel %vm112_vm1, %v518_v35, %v501_v11  ;;  %v834_v42 = vpack.c.bf16 %v573_v39, %v573_v39  ;;  %v831_v45 = vpack.c.bf16 %v521_v6, %v521_v6  ;;  %v835_v7 = vpack.c.bf16 %v575_v38, %v575_v38 }
 0x19b   :  { %v830_v46 = vpack.c.bf16 %v519_v44, %v519_v44  ;;  %v514_v27 = vrot.slane %v509_v41, 4  ;;  %v568_v47 = vrot.slane %v563_v43, 4  ;;  %v516_v18 = vrot.slane %v497_v30, 4 }
 0x19c   :  { %v955_v40 = vsel %vm836_vm2, %v834_v42, 0  ;;  %v898_v48 = vsel %vm836_vm2, %v831_v45, 0  ;;  %v974_v49 = vsel %vm836_vm2, %v835_v7, 0  ;;  %v570_v50 = vrot.slane %v551_v34, 4 }
 0x19d   :  { %v879_v51 = vsel %vm836_vm2, %v830_v46, 0  ;;  %v515_v52 = vsel %vm112_vm1, %v514_v27, %v497_v30  ;;  %907 = vmatpush.bf16.xpose.msrb.mxu0 %v898_v48  ;;  %v569_v53 = vsel %vm112_vm1, %v568_v47, %v551_v34  ;;  %v517_v54 = vsel %vm112_vm1, %v509_v41, %v516_v18 }
 0x19e   :  { %888 = vmatpush.bf16.xpose.msra.mxu3 %v879_v51  ;;  %v828_v55 = vpack.c.bf16 %v515_v52, %v515_v52  ;;  %v832_v56 = vpack.c.bf16 %v569_v53, %v569_v53  ;;  %v829_v57 = vpack.c.bf16 %v517_v54, %v517_v54  ;;  %v571_v58 = vsel %vm112_vm1, %v563_v43, %v570_v50 }
 0x19f   :  { %v288_v60 = vperm.slane %v3830_v24, %v3726_v17  ;;  %v299_v61 = vperm.slane %v3858_v59, %v3726_v17  ;;  %v302_v62 = vrot.slane %v3825_v2, 4  ;;  %v833_v3 = vpack.c.bf16 %v571_v58, %v571_v58 }
 0x1a0   :  { %v841_v63 = vsel %vm836_vm2, %v828_v55, 0  ;;  %v917_v0 = vsel %vm836_vm2, %v832_v56, 0  ;;  %v860_v1 = vsel %vm836_vm2, %v829_v57, 0  ;;  %v314_v8 = vrot.slane %v3833_v26, 4 }
 0x1a1   :  { %850 = vmatpush.bf16.xpose.msra.mxu1 %v841_v63  ;;  %869 = vmatpush.bf16.xpose.msra.mxu2 %v860_v1  ;;  %v936_v9 = vsel %vm836_vm2, %v833_v3, 0  ;;  %v823_v24 = vpack.c.bf16 %v3791_v23, %v3791_v23  ;;  %v822_v59 = vpack.c.bf16 %v3784_v16, %v3784_v16  ;;  %v303_v10 = vsel %vm112_vm1, %v288_v60, %v302_v62 }
 0x1a2   :  { %v300_v11 = vrot.slane %v288_v60, 4  ;;  %v312_v12 = vrot.slane %v299_v61, 4  ;;  %v315_v4 = vsel %vm112_vm1, %v299_v61, %v314_v8  ;;  %v820_v5 = vpack.c.bf16 %v3788_v22, %v3788_v22 }
 0x1a3   :  { %v821_v23 = vpack.c.bf16 %v3794_v25, %v3794_v25  ;;  %v311_v13 = vperm.slane %v303_v10, %v3746_v33  ;;  %v323_v16 = vperm.slane %v315_v4, %v3746_v33 }
 0x1a4   :  { %3295 = vmatmul.msk.bf16.vlgmr.msrb.gmra.mxu0 %vm836_vm2, %v823_v24  ;;  %v301_v15 = vsel %vm112_vm1, %v300_v11, %v3825_v2  ;;  %v313_v19 = vsel %vm112_vm1, %v312_v12, %v3833_v26 }
 0x1a5   :  { %983 = vmatpush.bf16.xpose.msra.mxu0 %v974_v49  ;;  %3294 = vmatmul.msk.bf16.vlgmr.msra.gmra.mxu3 %vm836_vm2, %v822_v59  ;;  %v330_v20 = vrot.slane %v311_v13, 4  ;;  %v307_v22 = vperm.slane %v301_v15, %v3746_v33  ;;  %v319_v21 = vperm.slane %v313_v19, %v3746_v33  ;;  %v328_v25 = vrot.slane %v323_v16, 4 }
 0x1a6   :  { %964 = vmatpush.bf16.xpose.msrb.mxu3 %v955_v40 }
 0x1a7   :  { %v324_v30 = vrot.slane %v319_v21, 4  ;;  %v331_v31 = vsel %vm112_vm1, %v323_v16, %v330_v20  ;;  %v326_v34 = vrot.slane %v307_v22, 4  ;;  %v329_v35 = vsel %vm112_vm1, %v328_v25, %v311_v13 }
 0x1a8   :  { %3292 = vmatmul.msk.bf16.vlgmr.msra.gmra.mxu1 %vm836_vm2, %v820_v5  ;;  %3293 = vmatmul.msk.bf16.vlgmr.msra.gmra.mxu2 %vm836_vm2, %v821_v23  ;;  %v827_v36 = vpack.c.bf16 %v331_v31, %v331_v31  ;;  %v826_v37 = vpack.c.bf16 %v329_v35, %v329_v35 }
 0x1a9   :  { %926 = vmatpush.bf16.xpose.msrb.mxu1 %v917_v0  ;;  %945 = vmatpush.bf16.xpose.msrb.mxu2 %v936_v9  ;;  %v325_v38 = vsel %vm112_vm1, %v324_v30, %v307_v22  ;;  %v327_v2 = vsel %vm112_vm1, %v319_v21, %v326_v34 }
 0x1aa   :  { %v824_v26 = vpack.c.bf16 %v325_v38, %v325_v38  ;;  %v825_v39 = vpack.c.bf16 %v327_v2, %v327_v2 }
 0x1b4   :  { %3299 = vmatmul.msk.bf16.vlgmr.msra.gmra.mxu0 %vm836_vm2, %v827_v36 }
 0x1b5   :  { %3298 = vmatmul.msk.bf16.vlgmr.msrb.gmra.mxu3 %vm836_vm2, %v826_v37 }
 0x1b8   :  { %3296 = vmatmul.msk.bf16.vlgmr.msrb.gmra.mxu1 %vm836_vm2, %v824_v26  ;;  %3297 = vmatmul.msk.bf16.vlgmr.msrb.gmra.mxu2 %vm836_vm2, %v825_v39 }
 0x221   :  { %v909_v41 = vpop.f32.mrf.mxu0 }
 0x222   :  { %v998_v6 = vsel %vm836_vm2, %v909_v41, -inf }
 0x223   :  { %999 = vmax.xlane.f32.xlu2 %v998_v6 }
 0x225   :  { %v852_v43 = vpop.f32.mrf.mxu1 }
 0x226   :  { %v989_v44 = vsel %vm836_vm2, %v852_v43, -inf }
 0x227   :  { %990 = vmax.xlane.f32.xlu0 %v989_v44 }
 0x228   :  { %v890_v42 = vpop.f32.mrf.mxu3 }
 0x229   :  { %v995_v45 = vsel %vm836_vm2, %v890_v42, -inf  ;;  %v911_v7 = vpop.f32.mrf.mxu0 }
 0x22a   :  { %996 = vmax.xlane.f32.xlu1 %v995_v45 }
 0x22b   :  { %v871_v46 = vpop.f32.mrf.mxu2 }
 0x22c   :  { %v992_v27 = vsel %vm836_vm2, %v871_v46, -inf }
 0x22d   :  { %v854_v47 = vpop.f32.mrf.mxu1  ;;  %993 = vmax.xlane.f32.xlu2 %v992_v27 }
 0x230   :  { %v892_v18 = vpop.f32.mrf.mxu3 }
 0x231   :  { %v985_v40 = vpop.f32.mrf.mxu0 }
 0x232   :  { %v1010_v48 = vsel %vm836_vm2, %v985_v40, -inf }
 0x233   :  { %v873_v49 = vpop.f32.mrf.mxu2  ;;  %1011 = vmax.xlane.f32.xlu1 %v1010_v48 }
 0x235   :  { %v928_v50 = vpop.f32.mrf.mxu1 }
 0x236   :  { %v1001_v51 = vsel %vm836_vm2, %v928_v50, -inf }
 0x237   :  { %1002 = vmax.xlane.f32.xlu0 %v1001_v51 }
 0x238   :  { %v966_v52 = vpop.f32.mrf.mxu3 }
 0x239   :  { %v987_v53 = vpop.f32.mrf.mxu0  ;;  %v1007_v54 = vsel %vm836_vm2, %v966_v52, -inf }
 0x23b   :  { %v947_v55 = vpop.f32.mrf.mxu2  ;;  %1008 = vmax.xlane.f32.xlu1 %v1007_v54 }
 0x23c   :  { %v1004_v56 = vsel %vm836_vm2, %v947_v55, -inf }
 0x23d   :  { %v930_v57 = vpop.f32.mrf.mxu1  ;;  %1005 = vmax.xlane.f32.xlu2 %v1004_v56 }
 0x240   :  { %v968_v58 = vpop.f32.mrf.mxu3 }
 0x243   :  { %v949_v60 = vpop.f32.mrf.mxu2 }
 0x24b   :  { %3414 = vrot.lane.b32.xlu0 %v3739_v29, %s3645_s23 }
 0x253   :  { %3424 = vrot.lane.b32.xlu0 %v3737_v28, %s3645_s23 }
 0x254   :  { %3419 = vrot.lane.b32.xlu1 %v3744_v32, %s3645_s23 }
 0x255   :  { %3409 = vrot.lane.b32.xlu2 %v3720_v14, %s3645_s23 }
 0x296   :  { %v1000_v61 = vpop.xlane.xlu2 %999 }
 0x297   :  { %v1016_v8 = vsub.f32 %v909_v41, %v1000_v61 }
 0x299   :  { %v1027_v28 = vmul.f32 1.442695, %v1016_v8 }
 0x29a   :  { %v991_v62 = vpop.xlane.xlu0 %990 }
 0x29b   :  { %v1013_v63 = vsub.f32 %v852_v43, %v991_v62 }
 0x29d   :  { %v1021_v0 = vmul.f32 1.442695, %v1013_v63  ;;  %v997_v1 = vpop.xlane.xlu1 %996 }
 0x29e   :  { %v1015_v3 = vsub.f32 %v890_v42, %v997_v1 }
 0x29f   :  { %3498 = vpow2.f32 %v1021_v0 }
 0x2a0   :  { %v1025_v9 = vmul.f32 1.442695, %v1015_v3  ;;  %v994_v24 = vpop.xlane.xlu2 %993 }
 0x2a1   :  { %v1014_v29 = vsub.f32 %v871_v46, %v994_v24 }
 0x2a2   :  { %3500 = vpow2.f32 %v1025_v9 }
 0x2a3   :  { %v1023_v59 = vmul.f32 1.442695, %v1014_v29 }
 0x2a5   :  { %v3978_v10 = vpop.eup %3498  ;;  %3502 = vpow2.f32 %v1023_v59 }
 0x2a6   :  { %v1037_v14 = vsel %vm836_vm2, %v3978_v10, 0.0  ;;  %v1012_v32 = vpop.xlane.xlu1 %1011  ;;  %3504 = vpow2.f32 %v1027_v28 }
 0x2a7   :  { %1038 = vadd.xlane.f32.xlu0 %v1037_v14  ;;  %v1020_v21 = vsub.f32 %v985_v40, %v1012_v32 }
 0x2a8   :  { %v3982_v11 = vpop.eup %3500 }
 0x2a9   :  { %v1043_v12 = vsel %vm836_vm2, %v3982_v11, 0.0  ;;  %v1035_v35 = vmul.f32 1.442695, %v1020_v21 }
 0x2aa   :  { %v1003_v4 = vpop.xlane.xlu0 %1002  ;;  %1044 = vadd.xlane.f32.xlu2 %v1043_v12 }
 0x2ab   :  { %v3986_v5 = vpop.eup %3502  ;;  %v1017_v23 = vsub.f32 %v928_v50, %v1003_v4 }
 0x2ac   :  { %v1040_v13 = vsel %vm836_vm2, %v3986_v5, 0.0  ;;  %v3990_v15 = vpop.eup %3504 }
 0x2ad   :  { %v1029_v16 = vmul.f32 1.442695, %v1017_v23  ;;  %1041 = vadd.xlane.f32.xlu1 %v1040_v13  ;;  %v1046_v31 = vsel %vm836_vm2, %v3990_v15, 0.0 }
 0x2ae   :  { %v1009_v19 = vpop.xlane.xlu1 %1008 }
 0x2af   :  { %v1019_v20 = vsub.f32 %v966_v52, %v1009_v19  ;;  %3506 = vpow2.f32 %v1029_v16 }
 0x2b0   :  { %v1006_v22 = vpop.xlane.xlu2 %1005 }
 0x2b1   :  { %v1033_v25 = vmul.f32 1.442695, %v1019_v20  ;;  %v1018_v30 = vsub.f32 %v947_v55, %v1006_v22 }
 0x2b2   :  { %1047 = vadd.xlane.f32.xlu2 %v1046_v31 }
 0x2b3   :  { %3508 = vpow2.f32 %v1033_v25  ;;  %v1031_v34 = vmul.f32 1.442695, %v1018_v30 }
 0x2b5   :  { %3510 = vpow2.f32 %v1031_v34  ;;  %v3994_v36 = vpop.eup %3506 }
 0x2b6   :  { %3512 = vpow2.f32 %v1035_v35  ;;  %v1049_v39 = vsel %vm836_vm2, %v3994_v36, 0.0 }
 0x2b8   :  { %v3410_v37 = vpop.permute.xlu2 %3409 }
 0x2b9   :  { %v3996_v38 = vpop.eup %3508  ;;  %v3412_v2 = vunpack.i.h.bf16 %v3410_v37  ;;  %v3411_v26 = vunpack.i.l.bf16 %v3410_v37 }
 0x2ba   :  { %1050 = vadd.xlane.f32.xlu2 %v1049_v39  ;;  %v1055_v41 = vsel %vm836_vm2, %v3996_v38, 0.0 }
 0x2bb   :  { %v4002_v6 = vpop.eup %3510  ;;  %1056 = vadd.xlane.f32.xlu1 %v1055_v41  ;;  %v614_v43 = vrot.slane %v3412_v2, 4  ;;  %v602_v44 = vrot.slane %v3411_v26, 4 }
 0x2bc   :  { %v1052_v42 = vsel %vm836_vm2, %v4002_v6, 0.0  ;;  %v4006_v27 = vpop.eup %3512 }
 0x2bd   :  { %v3415_v45 = vpop.permute.xlu0 %3414  ;;  %1053 = vadd.xlane.f32.xlu0 %v1052_v42  ;;  %v1058_v53 = vsel %vm836_vm2, %v4006_v27, 0.0 }
 0x2be   :  { %v3417_v7 = vunpack.i.h.bf16 %v3415_v45  ;;  %v3416_v46 = vunpack.i.l.bf16 %v3415_v45 }
 0x2c0   :  { %v612_v47 = vrot.slane %v3417_v7, 4  ;;  %v615_v18 = vsel %vm112_vm1, %v3417_v7, %v614_v43  ;;  %v600_v40 = vrot.slane %v3416_v46, 4  ;;  %v603_v48 = vsel %vm112_vm1, %v3416_v46, %v602_v44 }
 0x2c1   :  { %v623_v49 = vperm.slane %v615_v18, %v3726_v17  ;;  %v611_v50 = vperm.slane %v603_v48, %v3726_v17 }
 0x2c2   :  { %v613_v51 = vsel %vm112_vm1, %v612_v47, %v3412_v2  ;;  %v601_v52 = vsel %vm112_vm1, %v600_v40, %v3411_v26 }
 0x2c3   :  { %v619_v54 = vperm.slane %v613_v51, %v3726_v17  ;;  %v636_v55 = vrot.slane %v623_v49, 4  ;;  %v607_v56 = vperm.slane %v601_v52, %v3726_v17  ;;  %v638_v57 = vrot.slane %v611_v50, 4  ;;  %1059 = vadd.xlane.f32.xlu1 %v1058_v53 }
 0x2c5   :  { %v624_v58 = vrot.slane %v619_v54, 4  ;;  %v626_v60 = vrot.slane %v607_v56, 4  ;;  %v637_v61 = vsel %vm112_vm1, %v636_v55, %v611_v50  ;;  %v639_v62 = vsel %vm112_vm1, %v623_v49, %v638_v57  ;;  %v3425_v63 = vpop.permute.xlu0 %3424 }
 0x2c6   :  { %v643_v0 = vperm.slane %v637_v61, %v3746_v33  ;;  %v647_v1 = vperm.slane %v639_v62, %v3746_v33  ;;  %v3427_v3 = vunpack.i.h.bf16 %v3425_v63  ;;  %v3426_v8 = vunpack.i.l.bf16 %v3425_v63  ;;  %v3420_v9 = vpop.permute.xlu1 %3419 }
 0x2c7   :  { %v625_v24 = vsel %vm112_vm1, %v624_v58, %v607_v56  ;;  %v627_v29 = vsel %vm112_vm1, %v619_v54, %v626_v60  ;;  %v3422_v59 = vunpack.i.h.bf16 %v3420_v9  ;;  %v3421_v28 = vunpack.i.l.bf16 %v3420_v9 }
 0x2c8   :  { %v631_v14 = vperm.slane %v625_v24, %v3746_v33  ;;  %v635_v32 = vperm.slane %v627_v29, %v3746_v33  ;;  %v652_v12 = vrot.slane %v643_v0, 4  ;;  %v654_v4 = vrot.slane %v647_v1, 4 }
 0x2c9   :  { %v668_v23 = vrot.slane %v3427_v3, 4  ;;  %v656_v13 = vrot.slane %v3426_v8, 4  ;;  %v670_v16 = vrot.slane %v3422_v59, 4  ;;  %v658_v19 = vrot.slane %v3421_v28, 4 }
 0x2ca   :  { %v648_v20 = vrot.slane %v631_v14, 4  ;;  %v650_v22 = vrot.slane %v635_v32, 4  ;;  %v653_v21 = vsel %vm112_vm1, 0.0, %v652_v12  ;;  %v655_v25 = vsel %vm112_vm1, 0.0, %v654_v4 }
 0x2cb   :  { %v723_v30 = vsel %vm112_vm1, %v654_v4, %v643_v0  ;;  %v728_v31 = vrot.slane %v655_v25, 4  ;;  %v657_v34 = vsel %vm112_vm1, %v656_v13, %v3421_v28  ;;  %v659_v35 = vsel %vm112_vm1, %v3426_v8, %v658_v19 }
 0x2cc   :  { %v649_v37 = vsel %vm112_vm1, 0.0, %v648_v20  ;;  %v651_v2 = vsel %vm112_vm1, 0.0, %v650_v22  ;;  %v727_v26 = vperm.slane %v723_v30, %v3726_v17  ;;  %v663_v39 = vperm.slane %v657_v34, %v3726_v17 }
 0x2cd   :  { %v717_v41 = vrot.slane %v651_v2, 4  ;;  %v667_v43 = vperm.slane %v659_v35, %v3726_v17  ;;  %v669_v44 = vsel %vm112_vm1, %v668_v23, %v3422_v59  ;;  %v671_v42 = vsel %vm112_vm1, %v3427_v3, %v670_v16 }
 0x2ce   :  { %v675_v45 = vperm.slane %v669_v44, %v3726_v17  ;;  %v679_v7 = vperm.slane %v671_v42, %v3726_v17  ;;  %v682_v46 = vrot.slane %v663_v39, 4  ;;  %v712_v47 = vsel %vm112_vm1, %v650_v22, %v631_v14 }
 0x2cf   :  { %v694_v18 = vrot.slane %v667_v43, 4  ;;  %v716_v40 = vperm.slane %v712_v47, %v3726_v17  ;;  %v718_v48 = vsel %vm112_vm1, %v717_v41, %v649_v37  ;;  %v729_v49 = vsel %vm112_vm1, %v728_v31, %v653_v21 }
 0x2d0   :  { %v680_v50 = vrot.slane %v675_v45, 4  ;;  %v683_v51 = vsel %vm112_vm1, %v675_v45, %v682_v46  ;;  %v692_v52 = vrot.slane %v679_v7, 4  ;;  %v722_v53 = vperm.slane %v718_v48, %v3726_v17 }
 0x2d1   :  { %v691_v54 = vperm.slane %v683_v51, %v3746_v33  ;;  %v695_v55 = vsel %vm112_vm1, %v679_v7, %v694_v18  ;;  %v733_v56 = vperm.slane %v729_v49, %v3726_v17  ;;  %v736_v57 = vrot.slane %v716_v40, 4 }
 0x2d2   :  { %v681_v58 = vsel %vm112_vm1, %v680_v50, %v663_v39  ;;  %v693_v60 = vsel %vm112_vm1, %v692_v52, %v667_v43  ;;  %v703_v61 = vperm.slane %v695_v55, %v3746_v33  ;;  %v748_v62 = vrot.slane %v727_v26, 4 }
 0x2d3   :  { %v687_v63 = vperm.slane %v681_v58, %v3746_v33  ;;  %v699_v0 = vperm.slane %v693_v60, %v3746_v33  ;;  %v706_v1 = vrot.slane %v691_v54, 4  ;;  %v737_v3 = vsel %vm112_vm1, %v722_v53, %v736_v57 }
 0x2d4   :  { %v710_v8 = vrot.slane %v703_v61, 4  ;;  %v745_v9 = vperm.slane %v737_v3, %v3746_v33  ;;  %v749_v24 = vsel %vm112_vm1, %v733_v56, %v748_v62  ;;  %v734_v29 = vrot.slane %v722_v53, 4 }
 0x2d5   :  { %v704_v59 = vrot.slane %v687_v63, 4  ;;  %v707_v28 = vsel %vm112_vm1, 0.0, %v706_v1  ;;  %v708_v14 = vrot.slane %v699_v0, 4  ;;  %v766_v32 = vsel %vm112_vm1, %v706_v1, %v687_v63 }
 0x2d6   :  { %v711_v12 = vsel %vm112_vm1, 0.0, %v710_v8  ;;  %v770_v4 = vperm.slane %v766_v32, %v3726_v17  ;;  %v771_v23 = vrot.slane %v707_v28, 4  ;;  %v757_v13 = vperm.slane %v749_v24, %v3746_v33 }
 0x2d7   :  { %v705_v16 = vsel %vm112_vm1, 0.0, %v704_v59  ;;  %v709_v19 = vsel %vm112_vm1, 0.0, %v708_v14  ;;  %v782_v20 = vrot.slane %v711_v12, 4  ;;  %v735_v22 = vsel %vm112_vm1, %v734_v29, %v716_v40 }
 0x2d8   :  { %v762_v21 = vrot.slane %v757_v13, 4  ;;  %v741_v25 = vperm.slane %v735_v22, %v3746_v33  ;;  %v746_v30 = vrot.slane %v733_v56, 4  ;;  %v764_v31 = vrot.slane %v745_v9, 4 }
 0x2d9   :  { %v772_v34 = vsel %vm112_vm1, %v771_v23, %v705_v16  ;;  %v777_v35 = vsel %vm112_vm1, %v710_v8, %v699_v0  ;;  %v783_v37 = vsel %vm112_vm1, %v782_v20, %v709_v19  ;;  %v790_v2 = vrot.slane %v770_v4, 4 }
 0x2da   :  { %v763_v39 = vsel %vm112_vm1, %v762_v21, %v745_v9  ;;  %v747_v41 = vsel %vm112_vm1, %v746_v30, %v727_v26  ;;  %v765_v43 = vsel %vm112_vm1, %v757_v13, %v764_v31  ;;  %v760_v44 = vrot.slane %v741_v25, 4 }
 0x2db   :  { %v1087_v42 = vpack.c.bf16 %v763_v39, %v763_v39  ;;  %v753_v45 = vperm.slane %v747_v41, %v3746_v33  ;;  %v1088_v7 = vpack.c.bf16 %v765_v43, %v765_v43  ;;  %v776_v46 = vperm.slane %v772_v34, %v3726_v17 }
 0x2dc   :  { %v781_v47 = vperm.slane %v777_v35, %v3726_v17  ;;  %v787_v18 = vperm.slane %v783_v37, %v3726_v17 }
 0x2dd   :  { %v1136_v40 = vsel %vm1096_vm3, %v1087_v42, 0  ;;  %v758_v48 = vrot.slane %v753_v45, 4  ;;  %v1155_v49 = vsel %vm1096_vm3, %v1088_v7, 0  ;;  %v761_v26 = vsel %vm112_vm1, %v753_v45, %v760_v44 }
 0x2de   :  { %1145 = vmatpush.bf16.msra.mxu3 %v1136_v40  ;;  %1164 = vmatpush.bf16.msrb.mxu0 %v1155_v49  ;;  %v1086_v50 = vpack.c.bf16 %v761_v26, %v761_v26  ;;  %v791_v51 = vsel %vm112_vm1, %v776_v46, %v790_v2  ;;  %v802_v52 = vrot.slane %v781_v47, 4  ;;  %v788_v53 = vrot.slane %v776_v46, 4  ;;  %v3581_v26 = vld [vmem:[%s4793_s1] sm:$0xff] }
 0x2df   :  { %v759_v54 = vsel %vm112_vm1, %v758_v48, %v741_v25  ;;  %v799_v55 = vperm.slane %v791_v51, %v3746_v33  ;;  %v800_v56 = vrot.slane %v787_v18, 4 }
 0x2e0   :  { %v1085_v57 = vpack.c.bf16 %v759_v54, %v759_v54  ;;  %v1117_v58 = vsel %vm1096_vm3, %v1086_v50, 0  ;;  %v803_v60 = vsel %vm112_vm1, %v787_v18, %v802_v52  ;;  %v789_v61 = vsel %vm112_vm1, %v788_v53, %v770_v4 }
 0x2e1   :  { %1126 = vmatpush.bf16.msra.mxu2 %v1117_v58  ;;  %v811_v62 = vperm.slane %v803_v60, %v3746_v33  ;;  %v818_v63 = vrot.slane %v799_v55, 4  ;;  %v795_v0 = vperm.slane %v789_v61, %v3746_v33  ;;  %v801_v1 = vsel %vm112_vm1, %v800_v56, %v781_v47 }
 0x2e2   :  { %v1098_v3 = vsel %vm1096_vm3, %v1085_v57, 0  ;;  %v807_v8 = vperm.slane %v801_v1, %v3746_v33 }
 0x2e3   :  { %1107 = vmatpush.bf16.msra.mxu1 %v1098_v3  ;;  %v819_v9 = vsel %vm112_vm1, %v811_v62, %v818_v63  ;;  %v814_v24 = vrot.slane %v795_v0, 4  ;;  %v816_v29 = vrot.slane %v811_v62, 4 }
 0x2e4   :  { %v1092_v59 = vpack.c.bf16 %v819_v9, %v819_v9  ;;  %v812_v28 = vrot.slane %v807_v8, 4 }
 0x2e5   :  { %v815_v14 = vsel %vm112_vm1, %v807_v8, %v814_v24  ;;  %v817_v32 = vsel %vm112_vm1, %v816_v29, %v799_v55 }
 0x2e6   :  { %v1231_v12 = vsel %vm1096_vm3, %v1092_v59, 0  ;;  %v1090_v4 = vpack.c.bf16 %v815_v14, %v815_v14  ;;  %v1091_v23 = vpack.c.bf16 %v817_v32, %v817_v32  ;;  %v813_v13 = vsel %vm112_vm1, %v812_v28, %v795_v0 }
 0x2e7   :  { %1240 = vmatpush.bf16.msra.mxu0 %v1231_v12  ;;  %v1089_v16 = vpack.c.bf16 %v813_v13, %v813_v13 }
 0x2e8   :  { %v1193_v19 = vsel %vm1096_vm3, %v1090_v4, 0  ;;  %v1212_v20 = vsel %vm1096_vm3, %v1091_v23, 0 }
 0x2e9   :  { %1202 = vmatpush.bf16.msrb.mxu2 %v1193_v19  ;;  %1221 = vmatpush.bf16.msrb.mxu3 %v1212_v20  ;;  %v1174_v22 = vsel %vm1096_vm3, %v1089_v16, 0 }
 0x2ea   :  { %1183 = vmatpush.bf16.msrb.mxu1 %v1174_v22 }
 0x31a   :  { %v1039_v21 = vpop.xlane.xlu0 %1038 }
 0x31b   :  { %3514 = vrcp.f32 %v1039_v21 }
 0x31d   :  { %v1045_v25 = vpop.xlane.xlu2 %1044 }
 0x31e   :  { %3516 = vrcp.f32 %v1045_v25 }
 0x320   :  { %v1042_v30 = vpop.xlane.xlu1 %1041 }
 0x321   :  { %v3515_v31 = vpop.eup %3514  ;;  %3518 = vrcp.f32 %v1042_v30 }
 0x322   :  { %v1069_v34 = vmul.f32 %v3515_v31, %v3978_v10 }
 0x324   :  { %v3517_v35 = vpop.eup %3516  ;;  %v1077_v37 = vpack.c.bf16 %v1069_v34, %v1069_v34 }
 0x325   :  { %v1071_v2 = vmul.f32 %v3517_v35, %v3982_v11  ;;  %v1048_v39 = vpop.xlane.xlu2 %1047 }
 0x326   :  { %3520 = vrcp.f32 %v1048_v39  ;;  %3300 = vmatmul.msk.bf16.vlgmr.msra.gmra.mxu1 %vm836_vm2, %v1077_v37 }
 0x327   :  { %v3519_v41 = vpop.eup %3518  ;;  %v1079_v43 = vpack.c.bf16 %v1071_v2, %v1071_v2 }
 0x328   :  { %v1070_v44 = vmul.f32 %v3519_v41, %v3986_v5  ;;  %v3580_v5 = vld [vmem:[%s4793_s1 + $0x8] sm:$0xff]  ;;  %s3653_s1 = smov 16  }
 0x329   :  { %3302 = vmatmul.msk.bf16.vlgmr.msra.gmra.mxu3 %vm836_vm2, %v1079_v43 }
 0x32a   :  { %v1078_v42 = vpack.c.bf16 %v1070_v44, %v1070_v44 }
 0x32c   :  { %v3521_v45 = vpop.eup %3520  ;;  %3301 = vmatmul.msk.bf16.vlgmr.msra.gmra.mxu2 %vm836_vm2, %v1078_v42 }
 0x32d   :  { %v1072_v10 = vmul.f32 %v3521_v45, %v3990_v15  ;;  %v1051_v7 = vpop.xlane.xlu2 %1050 }
 0x32e   :  { %3522 = vrcp.f32 %v1051_v7  ;;  %v1057_v46 = vpop.xlane.xlu1 %1056 }
 0x32f   :  { %v1080_v11 = vpack.c.bf16 %v1072_v10, %v1072_v10  ;;  %3524 = vrcp.f32 %v1057_v46 }
 0x330   :  { %v1054_v47 = vpop.xlane.xlu0 %1053 }
 0x331   :  { %3526 = vrcp.f32 %v1054_v47  ;;  %3303 = vmatmul.msk.bf16.vlgmr.msrb.gmra.mxu0 %vm836_vm2, %v1080_v11 }
 0x332   :  { %1708 = vmatpush.bf16.msrb.mxu0 %v3580_v5 }
 0x334   :  { %v3523_v18 = vpop.eup %3522 }
 0x335   :  { %v3525_v40 = vpop.eup %3524  ;;  %v1073_v48 = vmul.f32 %v3523_v18, %v3994_v36 }
 0x336   :  { %v1075_v15 = vmul.f32 %v3525_v40, %v3996_v38  ;;  %v1060_v49 = vpop.xlane.xlu1 %1059  ;;  %1709 = vmatpush.bf16.msrb.mxu0 %v3581_v26 }
 0x337   :  { %v3527_v50 = vpop.eup %3526  ;;  %v1081_v51 = vpack.c.bf16 %v1073_v48, %v1073_v48  ;;  %3528 = vrcp.f32 %v1060_v49 }
 0x338   :  { %v1083_v52 = vpack.c.bf16 %v1075_v15, %v1075_v15  ;;  %v1074_v53 = vmul.f32 %v3527_v50, %v4002_v6 }
 0x339   :  { %3304 = vmatmul.msk.bf16.vlgmr.msrb.gmra.mxu1 %vm836_vm2, %v1081_v51 }
 0x33a   :  { %v1082_v54 = vpack.c.bf16 %v1074_v53, %v1074_v53  ;;  %3306 = vmatmul.msk.bf16.vlgmr.msrb.gmra.mxu3 %vm836_vm2, %v1083_v52 }
 0x33c   :  { %3305 = vmatmul.msk.bf16.vlgmr.msrb.gmra.mxu2 %vm836_vm2, %v1082_v54 }
 0x33d   :  { %v3529_v36 = vpop.eup %3528 }
 0x33e   :  { %v1076_v38 = vmul.f32 %v3529_v36, %v4006_v27 }
 0x340   :  { %v1084_v55 = vpack.c.bf16 %v1076_v38, %v1076_v38 }
 0x342   :  { %3307 = vmatmul.msk.bf16.vlgmr.msra.gmra.mxu0 %vm836_vm2, %v1084_v55 }
 0x3a3   :  { %v1109_v56 = vpop.f32.mrf.mxu1 }
 0x3a4   :  { %v1248_v57 = vrot.slane %v1109_v56, 4 }
 0x3ab   :  { %v1111_v58 = vpop.f32.mrf.mxu1 }
 0x3ac   :  { %v1147_v60 = vpop.f32.mrf.mxu3 }
 0x3ad   :  { %v1246_v61 = vrot.slane %v1147_v60, 4  ;;  %v1249_v6 = vsel %vm112_vm1, %v1147_v60, %v1248_v57 }
 0x3ae   :  { %v1166_v62 = vpop.f32.mrf.mxu0  ;;  %v1257_v0 = vperm.slane %v1249_v6, %v3726_v17 }
 0x3af   :  { %v1247_v63 = vsel %vm112_vm1, %v1246_v61, %v1109_v56  ;;  %v1258_v1 = vrot.slane %v1166_v62, 4  ;;  %v1128_v3 = vpop.f32.mrf.mxu2 }
 0x3b0   :  { %v1253_v8 = vperm.slane %v1247_v63, %v3726_v17  ;;  %v1260_v27 = vrot.slane %v1128_v3, 4  ;;  %v1284_v28 = vrot.slane %v1257_v0, 4 }
 0x3b1   :  { %v1259_v9 = vsel %vm112_vm1, %v1258_v1, %v1128_v3 }
 0x3b2   :  { %v1272_v24 = vrot.slane %v1253_v8, 4  ;;  %v1261_v29 = vsel %vm112_vm1, %v1166_v62, %v1260_v27  ;;  %v1265_v59 = vperm.slane %v1259_v9, %v3726_v17 }
 0x3b3   :  { %v1269_v14 = vperm.slane %v1261_v29, %v3726_v17 }
 0x3b4   :  { %v1270_v32 = vrot.slane %v1265_v59, 4  ;;  %v1273_v12 = vsel %vm112_vm1, %v1265_v59, %v1272_v24  ;;  %v1149_v4 = vpop.f32.mrf.mxu3 }
 0x3b5   :  { %v1281_v23 = vperm.slane %v1273_v12, %v3746_v33  ;;  %v1282_v13 = vrot.slane %v1269_v14, 4  ;;  %v1285_v16 = vsel %vm112_vm1, %v1269_v14, %v1284_v28 }
 0x3b6   :  { %v1271_v19 = vsel %vm112_vm1, %v1270_v32, %v1253_v8  ;;  %v1293_v20 = vperm.slane %v1285_v16, %v3746_v33  ;;  %v1168_v22 = vpop.f32.mrf.mxu0  ;;  %v1185_v21 = vpop.f32.mrf.mxu1 }
 0x3b7   :  { %v1277_v25 = vperm.slane %v1271_v19, %v3746_v33  ;;  %v1283_v30 = vsel %vm112_vm1, %v1282_v13, %v1257_v0  ;;  %v1296_v31 = vrot.slane %v1281_v23, 4  ;;  %v1130_v34 = vpop.f32.mrf.mxu2  ;;  %v1304_v18 = vrot.slane %v1185_v21, 4 }
 0x3b8   :  { %v1289_v35 = vperm.slane %v1283_v30, %v3746_v33  ;;  %v1300_v37 = vrot.slane %v1293_v20, 4 }
 0x3b9   :  { %v1294_v2 = vrot.slane %v1277_v25, 4  ;;  %v1297_v39 = vsel %vm112_vm1, 0.0, %v1296_v31  ;;  %v1358_v41 = vsel %vm112_vm1, %v1296_v31, %v1277_v25 }
 0x3ba   :  { %v1298_v43 = vrot.slane %v1289_v35, 4  ;;  %v1301_v44 = vsel %vm112_vm1, 0.0, %v1300_v37  ;;  %v1363_v42 = vrot.slane %v1297_v39, 4  ;;  %v1362_v10 = vperm.slane %v1358_v41, %v3726_v17 }
 0x3bb   :  { %v1295_v45 = vsel %vm112_vm1, 0.0, %v1294_v2  ;;  %v1369_v7 = vsel %vm112_vm1, %v1300_v37, %v1289_v35  ;;  %v1374_v46 = vrot.slane %v1301_v44, 4 }
 0x3bc   :  { %v1299_v11 = vsel %vm112_vm1, 0.0, %v1298_v43  ;;  %v1364_v47 = vsel %vm112_vm1, %v1363_v42, %v1295_v45  ;;  %v1373_v5 = vperm.slane %v1369_v7, %v3726_v17  ;;  %v1382_v36 = vrot.slane %v1362_v10, 4 }
 0x3bd   :  { %v1223_v40 = vpop.f32.mrf.mxu3  ;;  %v1375_v48 = vsel %vm112_vm1, %v1374_v46, %v1299_v11  ;;  %v1368_v50 = vperm.slane %v1364_v47, %v3726_v17 }
 0x3be   :  { %v1187_v15 = vpop.f32.mrf.mxu1  ;;  %v1302_v49 = vrot.slane %v1223_v40, 4  ;;  %v1305_v26 = vsel %vm112_vm1, %v1223_v40, %v1304_v18  ;;  %v1379_v54 = vperm.slane %v1375_v48, %v3726_v17  ;;  %v1394_v57 = vrot.slane %v1373_v5, 4 }
 0x3bf   :  { %v1204_v51 = vpop.f32.mrf.mxu2  ;;  %v1313_v52 = vperm.slane %v1305_v26, %v3726_v17  ;;  %v1242_v53 = vpop.f32.mrf.mxu0  ;;  %v1380_v62 = vrot.slane %v1368_v50, 4  ;;  %v1383_v3 = vsel %vm112_vm1, %v1368_v50, %v1382_v36 }
 0x3c0   :  { %v1316_v38 = vrot.slane %v1204_v51, 4  ;;  %v1303_v55 = vsel %vm112_vm1, %v1302_v49, %v1185_v21  ;;  %v1314_v56 = vrot.slane %v1242_v53, 4  ;;  %v1395_v8 = vsel %vm112_vm1, %v1379_v54, %v1394_v57 }
 0x3c1   :  { %v1309_v58 = vperm.slane %v1303_v55, %v3726_v17  ;;  %v1340_v60 = vrot.slane %v1313_v52, 4  ;;  %v1392_v27 = vrot.slane %v1379_v54, 4  ;;  %v1381_v12 = vsel %vm112_vm1, %v1380_v62, %v1362_v10 }
 0x3c2   :  { %v1315_v61 = vsel %vm112_vm1, %v1314_v56, %v1204_v51  ;;  %v1317_v6 = vsel %vm112_vm1, %v1242_v53, %v1316_v38  ;;  %v1391_v31 = vperm.slane %v1383_v3, %v3746_v33  ;;  %v1403_v34 = vperm.slane %v1395_v8, %v3746_v33 }
 0x3c3   :  { %v1328_v63 = vrot.slane %v1309_v58, 4  ;;  %v1321_v0 = vperm.slane %v1315_v61, %v3726_v17  ;;  %v1325_v1 = vperm.slane %v1317_v6, %v3726_v17  ;;  %v1393_v4 = vsel %vm112_vm1, %v1392_v27, %v1373_v5 }
 0x3c4   :  { %v1399_v20 = vperm.slane %v1393_v4, %v3746_v33  ;;  %v1387_v35 = vperm.slane %v1381_v12, %v3746_v33  ;;  %v1408_v50 = vrot.slane %v1403_v34, 4  ;;  %v1410_v51 = vrot.slane %v1391_v31, 4  ;;  %v3365_v12 = vld [vmem:[%s4794_s2] sm:$0xff] }
 0x3c5   :  { %v1326_v9 = vrot.slane %v1321_v0, 4  ;;  %v1329_v24 = vsel %vm112_vm1, %v1321_v0, %v1328_v63  ;;  %v1338_v29 = vrot.slane %v1325_v1, 4  ;;  %v1341_v59 = vsel %vm112_vm1, %v1325_v1, %v1340_v60  ;;  %v1225_v28 = vpop.f32.mrf.mxu3 }
 0x3c6   :  { %v1337_v14 = vperm.slane %v1329_v24, %v3746_v33  ;;  %v1349_v32 = vperm.slane %v1341_v59, %v3746_v33  ;;  %v1404_v37 = vrot.slane %v1399_v20, 4  ;;  %v1406_v56 = vrot.slane %v1387_v35, 4 }
 0x3c7   :  { %v1327_v23 = vsel %vm112_vm1, %v1326_v9, %v1309_v58  ;;  %v1339_v13 = vsel %vm112_vm1, %v1338_v29, %v1313_v52  ;;  %v1206_v16 = vpop.f32.mrf.mxu2  ;;  %v1244_v19 = vpop.f32.mrf.mxu0  ;;  %v1409_v63 = vsel %vm112_vm1, %v1408_v50, %v1391_v31  ;;  %v1411_v0 = vsel %vm112_vm1, %v1403_v34, %v1410_v51 }
 0x3c8   :  { %v1333_v22 = vperm.slane %v1327_v23, %v3746_v33  ;;  %v1345_v21 = vperm.slane %v1339_v13, %v3746_v33  ;;  %v1352_v25 = vrot.slane %v1337_v14, 4  ;;  %v1356_v30 = vrot.slane %v1349_v32, 4  ;;  %v3366_v32 = vld [vmem:[%s4794_s2 + $0x8] sm:$0xff] }
 0x3c9   :  { %v1405_v40 = vsel %vm112_vm1, %v1404_v37, %v1387_v35  ;;  %v1407_v29 = vsel %vm112_vm1, %v1399_v20, %v1406_v56  ;;  %1520 = vmatpush.bf16.msra.mxu1 %v3366_v32 }
 0x3ca   :  { %v1350_v2 = vrot.slane %v1333_v22, 4  ;;  %v1353_v39 = vsel %vm112_vm1, 0.0, %v1352_v25  ;;  %v1354_v41 = vrot.slane %v1345_v21, 4  ;;  %v1357_v43 = vsel %vm112_vm1, 0.0, %v1356_v30 }
 0x3cb   :  { %v1412_v44 = vsel %vm112_vm1, %v1352_v25, %v1333_v22  ;;  %v1417_v42 = vrot.slane %v1353_v39, 4  ;;  %v1423_v45 = vsel %vm112_vm1, %v1356_v30, %v1345_v21  ;;  %v1428_v10 = vrot.slane %v1357_v43, 4  ;;  %v3582_v43 = vld [vmem:[%s4792_s0] sm:$0xff] }
 0x3cc   :  { %v1355_v7 = vsel %vm112_vm1, 0.0, %v1354_v41  ;;  %v1427_v46 = vperm.slane %v1423_v45, %v3726_v17  ;;  %v1351_v11 = vsel %vm112_vm1, 0.0, %v1350_v2  ;;  %v1416_v47 = vperm.slane %v1412_v44, %v3726_v17 }
 0x3cd   :  { %v1429_v5 = vsel %vm112_vm1, %v1428_v10, %v1355_v7  ;;  %v1418_v18 = vsel %vm112_vm1, %v1417_v42, %v1351_v11  ;;  %1521 = vmatpush.bf16.msra.mxu1 %v3365_v12  ;;  %v3583_v10 = vld [vmem:[%s4792_s0 + $0x8] sm:$0xff]  ;;  %v3656_v11 = vmov 32.0  }
 0x3ce   :  { %v1433_v48 = vperm.slane %v1429_v5, %v3726_v17  ;;  %v1448_v15 = vrot.slane %v1427_v46, 4  ;;  %v1422_v49 = vperm.slane %v1418_v18, %v3726_v17  ;;  %v1436_v26 = vrot.slane %v1416_v47, 4 }
 0x3cf   :  { %3530 = vrcp.f32 %v3656_v11 }
 0x3d0   :  { %v1437_v52 = vsel %vm112_vm1, %v1422_v49, %v1436_v26  ;;  %v1449_v53 = vsel %vm112_vm1, %v1433_v48, %v1448_v15  ;;  %v1434_v54 = vrot.slane %v1422_v49, 4  ;;  %v1446_v36 = vrot.slane %v1433_v48, 4 }
 0x3d1   :  { %v1445_v38 = vperm.slane %v1437_v52, %v3746_v33  ;;  %v1457_v55 = vperm.slane %v1449_v53, %v3746_v33 }
 0x3d2   :  { %v1435_v57 = vsel %vm112_vm1, %v1434_v54, %v1416_v47  ;;  %v1447_v58 = vsel %vm112_vm1, %v1446_v36, %v1427_v46 }
 0x3d3   :  { %v1462_v60 = vrot.slane %v1457_v55, 4  ;;  %v1464_v61 = vrot.slane %v1445_v38, 4  ;;  %v1441_v6 = vperm.slane %v1435_v57, %v3746_v33  ;;  %v1453_v62 = vperm.slane %v1447_v58, %v3746_v33  ;;  %v3368_v58 = vld [vmem:[#allocation2 + $0x8] sm:$0xff] }
 0x3d4   :  { %1601 = vmatpush.bf16.msra.mxu2 %v3368_v58 }
 0x3d5   :  { %v1463_v1 = vsel %vm112_vm1, %v1462_v60, %v1445_v38  ;;  %v1465_v3 = vsel %vm112_vm1, %v1457_v55, %v1464_v61  ;;  %v1458_v8 = vrot.slane %v1453_v62, 4  ;;  %v1460_v27 = vrot.slane %v1441_v6, 4  ;;  %v3531_v47 = vpop.eup %3530  ;;  %v3367_v61 = vld [vmem:[#allocation2] sm:$0xff] }
 0x3d6   :  { %v3433_v9 = vpack.i.bf16 %v1463_v1, %v1409_v63  ;;  %v3438_v24 = vpack.i.bf16 %v1465_v3, %v1411_v0  ;;  %v1535_v5 = vmul.f32 32.0, %v3531_v47  ;;  %vm1539_vm6 = vweird.f32 %v3531_v47 }
 0x3d7   :  { %v1461_v59 = vsel %vm112_vm1, %v1453_v62, %v1460_v27  ;;  %v1459_v28 = vsel %vm112_vm1, %v1458_v8, %v1441_v6  ;;  %v3372_v6 = vld [vmem:[%s4796_s4 + $0x18] sm:$0xff] }
 0x3d8   :  { %3434 = vrot.lane.b32.xlu2 %v3433_v9, %s3653_s1  ;;  %3439 = vrot.lane.b32.xlu1 %v3438_v24, %s3654_s15  ;;  %v3428_v14 = vpack.i.bf16 %v1461_v59, %v1407_v29  ;;  %v1536_v18 = vsub.f32 1.0, %v1535_v5 }
 0x3d9   :  { %1644 = vmatpush.bf16.msra.mxu3 %v3372_v6  ;;  %1602 = vmatpush.bf16.msra.mxu2 %v3367_v61 }
 0x3da   :  { %3429 = vrot.lane.b32.xlu0 %v3428_v14, %s3655_s16 }
 0x432   :  { %v3435_v4 = vpop.permute.xlu2 %3434 }
 0x433   :  { %v3437_v20 = vunpack.i.h.bf16 %v3435_v4  ;;  %v3436_v22 = vunpack.i.l.bf16 %v3435_v4 }
 0x44a   :  { %v3440_v23 = vpop.permute.xlu1 %3439 }
 0x44b   :  { %v3442_v21 = vunpack.i.h.bf16 %v3440_v23  ;;  %v3441_v25 = vunpack.i.l.bf16 %v3440_v23 }
 0x44c   :  { %v3430_v13 = vpop.permute.xlu0 %3429 }
 0x44d   :  { %v3432_v16 = vunpack.i.h.bf16 %v3430_v13  ;;  %v3431_v19 = vunpack.i.l.bf16 %v3430_v13 }
 0x44f   :  { %v1490_v30 = vsel %vm836_vm2, %v1405_v40, %v3431_v19  ;;  %v1491_v31 = vsel %vm836_vm2, %v1459_v28, %v3432_v16  ;;  %v1537_v40 = vmul.f32 %v3531_v47, %v1536_v18 }
 0x450   :  { %v1493_v34 = vsel %vm1492_vm4, %v1490_v30, %v3436_v22  ;;  %v1494_v35 = vsel %vm1492_vm4, %v1491_v31, %v3437_v20  ;;  %v3371_v20 = vld [vmem:[%s4796_s4 + $0x10] sm:$0xff]  ;;  %v3370_v22 = vld [vmem:[%s4796_s4 + $0x8] sm:$0xff] }
 0x451   :  { %v1496_v37 = vsel %vm1495_vm5, %v1493_v34, %v3441_v25  ;;  %v1497_v2 = vsel %vm1495_vm5, %v1494_v35, %v3442_v21  ;;  %v1538_v48 = vadd.f32 %v3531_v47, %v1537_v40  ;;  %1645 = vmatpush.bf16.msra.mxu3 %v3371_v20  ;;  %v3369_v21 = vld [vmem:[%s4796_s4] sm:$0xff] }
 0x452   :  { %v1498_v39 = vpack.c.bf16 %v1497_v2, %v1496_v37 }
 0x453   :  { %v4224_v15 = vsel %vm1539_vm6, %v3531_v47, %v1538_v48 }
 0x454   :  { %3316 = vmatmul.msk.bf16.vlgmr.msra.gmra.mxu1 %vm73_vm0, %v1498_v39 }
 0x455   :  { %1646 = vmatpush.bf16.msra.mxu3 %v3370_v22 }
 0x459   :  { %1647 = vmatpush.bf16.msra.mxu3 %v3369_v21 }
 0x4d1   :  { %v1523_v41 = vpop.f32.mrf.mxu1 }
 0x4d2   :  { %v1524_v44 = vadd.f32 %v3582_v43, %v1523_v41 }
 0x4d4   :  { %v1528_v42 = vsel %vm73_vm0, %v1524_v44, 0.0 }
 0x4d5   :  { %1529 = vadd.xlane.f32.xlu0 %v1528_v42 }
 0x4d9   :  { %v1525_v45 = vpop.f32.mrf.mxu1 }
 0x4da   :  { %v1526_v7 = vadd.f32 %v3583_v10, %v1525_v45 }
 0x4dc   :  { %v1531_v46 = vsel %vm73_vm0, %v1526_v7, 0.0 }
 0x4dd   :  { %1532 = vadd.xlane.f32.xlu2 %v1531_v46 }
 0x548   :  { %v1530_v49 = vpop.xlane.xlu0 %1529 }
 0x549   :  { %v1541_v26 = vmul.f32 %v4224_v15, %v1530_v49 }
 0x54b   :  { %v1543_v50 = vsub.f32 %v1524_v44, %v1541_v26 }
 0x54d   :  { %v1545_v51 = vmul.f32 %v1543_v50, %v1543_v50 }
 0x54f   :  { %v1547_v52 = vsel %vm73_vm0, %v1545_v51, 0.0 }
 0x550   :  { %v1533_v53 = vpop.xlane.xlu2 %1532  ;;  %1548 = vadd.xlane.f32.xlu1 %v1547_v52 }
 0x551   :  { %v1542_v54 = vmul.f32 %v4224_v15, %v1533_v53 }
 0x553   :  { %v1544_v36 = vsub.f32 %v1526_v7, %v1542_v54 }
 0x555   :  { %v1546_v38 = vmul.f32 %v1544_v36, %v1544_v36 }
 0x557   :  { %v1550_v55 = vsel %vm73_vm0, %v1546_v38, 0.0 }
 0x558   :  { %1551 = vadd.xlane.f32.xlu0 %v1550_v55 }
 0x5c3   :  { %v1549_v56 = vpop.xlane.xlu1 %1548 }
 0x5c4   :  { %v1553_v57 = vmul.f32 %v1549_v56, %v4224_v15 }
 0x5c6   :  { %v1555_v60 = vadd.f32 1e-05, %v1553_v57 }
 0x5c8   :  { %3532 = vrsqrt.f32 %v1555_v60  ;;  %vm1563_vm8 = vweird.f32 %v1555_v60 }
 0x5cb   :  { %v1552_v62 = vpop.xlane.xlu0 %1551 }
 0x5cc   :  { %v1554_v63 = vmul.f32 %v1552_v62, %v4224_v15 }
 0x5ce   :  { %v3533_v0 = vpop.eup %3532  ;;  %v1556_v1 = vadd.f32 1e-05, %v1554_v63 }
 0x5cf   :  { %v1558_v3 = vmul.f32 %v3533_v0, %v1555_v60  ;;  %vm1564_vm7 = vweird.f32 %v3533_v0 }
 0x5d0   :  { %3534 = vrsqrt.f32 %v1556_v1  ;;  %vm1565_vm10 = vmor %vm1563_vm8, %vm1564_vm7  ;;  %vm1573_vm11 = vweird.f32 %v1556_v1 }
 0x5d1   :  { %v1559_v8 = vmul.f32 %v3533_v0, %v1558_v3 }
 0x5d3   :  { %v1560_v27 = vmul.f32 0.5, %v1559_v8 }
 0x5d5   :  { %v1561_v24 = vsub.f32 1.5, %v1560_v27 }
 0x5d6   :  { %v3535_v9 = vpop.eup %3534 }
 0x5d7   :  { %v1568_v29 = vmul.f32 %v3535_v9, %v1556_v1  ;;  %v1562_v28 = vmul.f32 %v3533_v0, %v1561_v24  ;;  %vm1574_vm9 = vweird.f32 %v3535_v9 }
 0x5d8   :  { %vm1575_vm12 = vmor %vm1573_vm11, %vm1574_vm9 }
 0x5d9   :  { %v1569_v59 = vmul.f32 %v3535_v9, %v1568_v29  ;;  %v1566_v12 = vsel %vm1565_vm10, %v3533_v0, %v1562_v28 }
 0x5da   :  { %v1577_v13 = vmul.f32 %v1566_v12, %v1543_v50 }
 0x5db   :  { %v1570_v14 = vmul.f32 0.5, %v1569_v59 }
 0x5dd   :  { %v1571_v32 = vsub.f32 1.5, %v1570_v14 }
 0x5df   :  { %v1572_v4 = vmul.f32 %v3535_v9, %v1571_v32 }
 0x5e1   :  { %v1576_v23 = vsel %vm1575_vm12, %v3535_v9, %v1572_v4 }
 0x5e2   :  { %v1578_v16 = vmul.f32 %v1576_v23, %v1544_v36 }
 0x5e4   :  { %v1579_v19 = vpack.c.bf16 %v1578_v16, %v1577_v13 }
 0x5e6   :  { %3325 = vmatmul.msk.bf16.vlgmr.msra.gmra.mxu2 %vm73_vm0, %v1579_v19 }
 0x669   :  { %v1604_v25 = vpop.f32.mrf.mxu2 }
 0x66a   :  { %v1609_v31 = vmax.f32 %v1604_v25, 0.0 }
 0x671   :  { %v1606_v30 = vpop.f32.mrf.mxu2 }
 0x672   :  { %v1610_v34 = vmax.f32 %v1606_v30, 0.0 }
 0x674   :  { %v1611_v35 = vpack.c.bf16 %v1610_v34, %v1609_v31 }
 0x676   :  { %3342 = vmatmul.msk.bf16.vlgmr.msra.gmra.mxu3 %vm1636_vm13, %v1611_v35 }
 0x6f9   :  { %v1649_v37 = vpop.f32.mrf.mxu3 }
 0x6fa   :  { %v1650_v2 = vadd.f32 %v1649_v37, %v1577_v13 }
 0x6fc   :  { %v1654_v39 = vsel %vm73_vm0, %v1650_v2, 0.0 }
 0x6fd   :  { %1655 = vadd.xlane.f32.xlu2 %v1654_v39 }
 0x701   :  { %v1651_v41 = vpop.f32.mrf.mxu3 }
 0x702   :  { %v1652_v43 = vadd.f32 %v1651_v41, %v1578_v16 }
 0x704   :  { %v1657_v44 = vsel %vm73_vm0, %v1652_v43, 0.0 }
 0x705   :  { %1658 = vadd.xlane.f32.xlu0 %v1657_v44 }
 0x770   :  { %v1656_v42 = vpop.xlane.xlu2 %1655 }
 0x771   :  { %v1660_v45 = vmul.f32 %v1656_v42, %v4224_v15 }
 0x773   :  { %v1662_v10 = vsub.f32 %v1650_v2, %v1660_v45 }
 0x775   :  { %v1664_v7 = vmul.f32 %v1662_v10, %v1662_v10 }
 0x777   :  { %v1666_v46 = vsel %vm73_vm0, %v1664_v7, 0.0 }
 0x778   :  { %v1659_v11 = vpop.xlane.xlu0 %1658  ;;  %1667 = vadd.xlane.f32.xlu1 %v1666_v46 }
 0x779   :  { %v1661_v47 = vmul.f32 %v1659_v11, %v4224_v15 }
 0x77b   :  { %v1663_v5 = vsub.f32 %v1652_v43, %v1661_v47 }
 0x77d   :  { %v1665_v18 = vmul.f32 %v1663_v5, %v1663_v5 }
 0x77f   :  { %v1669_v40 = vsel %vm73_vm0, %v1665_v18, 0.0 }
 0x780   :  { %1670 = vadd.xlane.f32.xlu2 %v1669_v40 }
 0x7eb   :  { %v1668_v48 = vpop.xlane.xlu1 %1667 }
 0x7ec   :  { %v1672_v49 = vmul.f32 %v1668_v48, %v4224_v15 }
 0x7ee   :  { %v1674_v26 = vadd.f32 1e-05, %v1672_v49 }
 0x7f0   :  { %3536 = vrsqrt.f32 %v1674_v26  ;;  %vm1682_vm15 = vweird.f32 %v1674_v26 }
 0x7f3   :  { %v1671_v50 = vpop.xlane.xlu2 %1670 }
 0x7f4   :  { %v1673_v51 = vmul.f32 %v1671_v50, %v4224_v15 }
 0x7f6   :  { %v3537_v52 = vpop.eup %3536  ;;  %v1675_v53 = vadd.f32 1e-05, %v1673_v51 }
 0x7f7   :  { %v1677_v54 = vmul.f32 %v3537_v52, %v1674_v26  ;;  %vm1683_vm14 = vweird.f32 %v3537_v52 }
 0x7f8   :  { %3538 = vrsqrt.f32 %v1675_v53  ;;  %vm1684_vm7 = vmor %vm1682_vm15, %vm1683_vm14  ;;  %vm1692_vm8 = vweird.f32 %v1675_v53 }
 0x7f9   :  { %v1678_v36 = vmul.f32 %v3537_v52, %v1677_v54 }
 0x7fb   :  { %v1679_v38 = vmul.f32 0.5, %v1678_v36 }
 0x7fd   :  { %v1680_v56 = vsub.f32 1.5, %v1679_v38 }
 0x7fe   :  { %v3539_v55 = vpop.eup %3538 }
 0x7ff   :  { %v1687_v57 = vmul.f32 %v3539_v55, %v1675_v53  ;;  %v1681_v60 = vmul.f32 %v3537_v52, %v1680_v56  ;;  %vm1693_vm6 = vweird.f32 %v3539_v55 }
 0x800   :  { %vm1694_vm9 = vmor %vm1692_vm8, %vm1693_vm6 }
 0x801   :  { %v1688_v58 = vmul.f32 %v3539_v55, %v1687_v57  ;;  %v1685_v62 = vsel %vm1684_vm7, %v3537_v52, %v1681_v60 }
 0x802   :  { %v4254_v1 = vmul.f32 %v1685_v62, %v1662_v10 }
 0x803   :  { %v1689_v61 = vmul.f32 0.5, %v1688_v58 }
 0x805   :  { %v1690_v6 = vsub.f32 1.5, %v1689_v61 }
 0x807   :  { %v1691_v63 = vmul.f32 %v3539_v55, %v1690_v6 }
 0x809   :  { %v1695_v0 = vsel %vm1694_vm9, %v3539_v55, %v1691_v63 }
 0x80a   :  { %v4256_v3 = vmul.f32 %v1695_v0, %v1663_v5 }
 0x80c   :  { %v1698_v8 = vpack.c.bf16 %v4256_v3, %v4254_v1 }
 0x80e   :  { %3343 = vmatmul.msk.bf16.vlgmr.msrb.gmra.mxu0 %vm73_vm0, %v1698_v8 }
 0x88b   :  { %v1711_v27 = vpop.f32.mrf.mxu0 }
 0x88c   :  { %1730 = vrot.lane.b32.xlu2 %v1711_v27, %s3647_s7  ;;  %1724 = vrot.lane.b32.xlu1 %v1711_v27, %s3649_s9  ;;  %v1738_v29 = vrot.slane %v1711_v27, 4 }
 0x88d   :  { %1718 = vrot.lane.b32.xlu0 %v1711_v27, %s3648_s8 }
 0x893   :  { %v4264_v9 = vpop.f32.mrf.mxu0 }
 0x894   :  { %1726 = vrot.lane.b32.xlu1 %v4264_v9, %s3649_s9 }
 0x895   :  { %1720 = vrot.lane.b32.xlu0 %v4264_v9, %s3648_s8 }
 0x89d   :  { %1732 = vrot.lane.b32.xlu0 %v4264_v9, %s3647_s7 }
 0x8e6   :  { %v1731_v24 = vpop.permute.xlu2 %1730 }
 0x8e7   :  { %v1748_v59 = vrot.slane %v1731_v24, 4 }
 0x8fe   :  { %v1725_v28 = vpop.permute.xlu1 %1724 }
 0x8ff   :  { %v1736_v14 = vrot.slane %v1725_v28, 4  ;;  %v1739_v32 = vsel %vm112_vm1, %v1725_v28, %v1738_v29  ;;  %v1719_v12 = vpop.permute.xlu0 %1718  ;;  %v4273_v4 = vpack.i.bf16 %v1731_v24, %v1725_v28 }
 0x900   :  { %v1747_v23 = vperm.slane %v1739_v32, %v3726_v17  ;;  %v1749_v13 = vsel %vm112_vm1, %v1748_v59, %v1719_v12  ;;  %v1750_v16 = vrot.slane %v1719_v12, 4  ;;  %v3443_v19 = vpack.i.bf16 %v1719_v12, %v1711_v27 }
 0x901   :  { %v1737_v20 = vsel %vm112_vm1, %v1736_v14, %v1711_v27  ;;  %v1755_v22 = vperm.slane %v1749_v13, %v3726_v17  ;;  %3449 = vrot.lane.b32.xlu1 %v4273_v4, %s3651_s10 }
 0x902   :  { %v1743_v21 = vperm.slane %v1737_v20, %v3726_v17  ;;  %v1774_v25 = vrot.slane %v1747_v23, 4  ;;  %v1751_v30 = vsel %vm112_vm1, %v1731_v24, %v1750_v16  ;;  %3444 = vrot.lane.b32.xlu2 %v3443_v19, %s3651_s10 }
 0x903   :  { %v1759_v31 = vperm.slane %v1751_v30, %v3726_v17  ;;  %v1760_v34 = vrot.slane %v1755_v22, 4  ;;  %v1794_v30 = vrot.slane %v4264_v9, 4 }
 0x904   :  { %v1762_v35 = vrot.slane %v1743_v21, 4 }
 0x905   :  { %v1761_v37 = vsel %vm112_vm1, %v1760_v34, %v1743_v21  ;;  %v1772_v2 = vrot.slane %v1759_v31, 4  ;;  %v1775_v39 = vsel %vm112_vm1, %v1759_v31, %v1774_v25 }
 0x906   :  { %v1763_v41 = vsel %vm112_vm1, %v1755_v22, %v1762_v35  ;;  %v1767_v43 = vperm.slane %v1761_v37, %v3746_v33  ;;  %v1783_v44 = vperm.slane %v1775_v39, %v3746_v33  ;;  %v1727_v61 = vpop.permute.xlu1 %1726 }
 0x907   :  { %v1771_v42 = vperm.slane %v1763_v41, %v3746_v33  ;;  %v1773_v45 = vsel %vm112_vm1, %v1772_v2, %v1747_v23  ;;  %v1721_v10 = vpop.permute.xlu0 %1720  ;;  %v1792_v31 = vrot.slane %v1727_v61, 4  ;;  %v1795_v34 = vsel %vm112_vm1, %v1727_v61, %v1794_v30 }
 0x908   :  { %v1779_v7 = vperm.slane %v1773_v45, %v3746_v33  ;;  %v1790_v46 = vrot.slane %v1783_v44, 4  ;;  %v1784_v11 = vrot.slane %v1767_v43, 4  ;;  %v4294_v5 = vpack.i.bf16 %v1721_v10, %v4264_v9 }
 0x909   :  { %v1786_v47 = vrot.slane %v1771_v42, 4  ;;  %v1806_v35 = vrot.slane %v1721_v10, 4  ;;  %v1793_v39 = vsel %vm112_vm1, %v1792_v31, %v4264_v9 }
 0x90a   :  { %v1788_v18 = vrot.slane %v1779_v7, 4  ;;  %v1791_v40 = vsel %vm112_vm1, 0.0, %v1790_v46  ;;  %v1859_v48 = vsel %vm112_vm1, %v1790_v46, %v1779_v7  ;;  %3454 = vrot.lane.b32.xlu0 %v4294_v5, %s3651_s10  ;;  %v1785_v36 = vsel %vm112_vm1, 0.0, %v1784_v11 }
 0x90b   :  { %v1787_v49 = vsel %vm112_vm1, 0.0, %v1786_v47  ;;  %v1848_v26 = vsel %vm112_vm1, %v1786_v47, %v1767_v43  ;;  %v1863_v50 = vperm.slane %v1859_v48, %v3726_v17  ;;  %v1864_v51 = vrot.slane %v1791_v40, 4 }
 0x90c   :  { %v1789_v52 = vsel %vm112_vm1, 0.0, %v1788_v18  ;;  %v1852_v53 = vperm.slane %v1848_v26, %v3726_v17  ;;  %v1853_v54 = vrot.slane %v1787_v49, 4  ;;  %v1799_v44 = vperm.slane %v1793_v39, %v3726_v17 }
 0x90d   :  { %v1865_v38 = vsel %vm112_vm1, %v1864_v51, %v1789_v52  ;;  %v1884_v55 = vrot.slane %v1863_v50, 4 }
 0x90e   :  { %v1854_v56 = vsel %vm112_vm1, %v1853_v54, %v1785_v36  ;;  %v1872_v57 = vrot.slane %v1852_v53, 4  ;;  %v1869_v58 = vperm.slane %v1865_v38, %v3726_v17  ;;  %v1818_v46 = vrot.slane %v1799_v44, 4 }
 0x90f   :  { %v1858_v60 = vperm.slane %v1854_v56, %v3726_v17  ;;  %v1733_v6 = vpop.permute.xlu0 %1732 }
 0x910   :  { %v4310_v62 = vpack.i.bf16 %v1733_v6, %v1727_v61  ;;  %v1885_v63 = vsel %vm112_vm1, %v1869_v58, %v1884_v55  ;;  %v1882_v29 = vrot.slane %v1869_v58, 4  ;;  %v1804_v37 = vrot.slane %v1733_v6, 4 }
 0x911   :  { %v1873_v0 = vsel %vm112_vm1, %v1858_v60, %v1872_v57  ;;  %v1893_v8 = vperm.slane %v1885_v63, %v3746_v33  ;;  %v1870_v27 = vrot.slane %v1858_v60, 4  ;;  %v1807_v2 = vsel %vm112_vm1, %v1733_v6, %v1806_v35 }
 0x912   :  { %3459 = vrot.lane.b32.xlu2 %v4310_v62, %s3651_s10  ;;  %v1881_v24 = vperm.slane %v1873_v0, %v3746_v33  ;;  %v1883_v14 = vsel %vm112_vm1, %v1882_v29, %v1863_v50  ;;  %v1805_v41 = vsel %vm112_vm1, %v1804_v37, %v1721_v10  ;;  %v1815_v43 = vperm.slane %v1807_v2, %v3726_v17 }
 0x913   :  { %v1898_v59 = vrot.slane %v1893_v8, 4  ;;  %v1871_v28 = vsel %vm112_vm1, %v1870_v27, %v1852_v53  ;;  %v1889_v23 = vperm.slane %v1883_v14, %v3746_v33  ;;  %v1811_v45 = vperm.slane %v1805_v41, %v3726_v17 }
 0x914   :  { %v1900_v32 = vrot.slane %v1881_v24, 4  ;;  %v1877_v16 = vperm.slane %v1871_v28, %v3746_v33  ;;  %v1828_v11 = vrot.slane %v1815_v43, 4 }
 0x915   :  { %v4321_v12 = vsel %vm112_vm1, %v1898_v59, %v1881_v24  ;;  %v1894_v20 = vrot.slane %v1889_v23, 4  ;;  %v1816_v47 = vrot.slane %v1811_v45, 4  ;;  %v1819_v18 = vsel %vm112_vm1, %v1811_v45, %v1818_v46 }
 0x916   :  { %v4325_v13 = vsel %vm112_vm1, %v1893_v8, %v1900_v32  ;;  %v1896_v21 = vrot.slane %v1877_v16, 4  ;;  %v1827_v10 = vperm.slane %v1819_v18, %v3746_v33 }
 0x917   :  { %v4330_v22 = vsel %vm112_vm1, %v1894_v20, %v1877_v16  ;;  %v1817_v48 = vsel %vm112_vm1, %v1816_v47, %v1799_v44 }
 0x918   :  { %v4333_v25 = vsel %vm112_vm1, %v1889_v23, %v1896_v21  ;;  %v1823_v51 = vperm.slane %v1817_v48, %v3746_v33  ;;  %v1842_v52 = vrot.slane %v1827_v10, 4 }
 0x91a   :  { %3464 = vrot.lane.b32.xlu2 %v3443_v19, %s3645_s23  ;;  %v1803_v19 = vperm.slane %v1795_v34, %v3726_v17  ;;  %v1843_v55 = vsel %vm112_vm1, 0.0, %v1842_v52  ;;  %v1902_v56 = vsel %vm112_vm1, %v1842_v52, %v1823_v51  ;;  %v1840_v0 = vrot.slane %v1823_v51, 4 }
 0x91b   :  { %v4361_v14 = vperm.slane %v1902_v56, %v3726_v17  ;;  %v1907_v32 = vrot.slane %v1843_v55, 4 }
 0x91c   :  { %v1830_v42 = vrot.slane %v1803_v19, 4  ;;  %v1829_v40 = vsel %vm112_vm1, %v1828_v11, %v1803_v19  ;;  %v1841_v19 = vsel %vm112_vm1, 0.0, %v1840_v0 }
 0x91d   :  { %v1835_v26 = vperm.slane %v1829_v40, %v3746_v33  ;;  %v4385_v48 = vsel %vm112_vm1, %v1907_v32, %v1841_v19 }
 0x91e   :  { %v1831_v7 = vsel %vm112_vm1, %v1815_v43, %v1830_v42 }
 0x91f   :  { %v1839_v9 = vperm.slane %v1831_v7, %v3746_v33  ;;  %v1844_v38 = vrot.slane %v1835_v26, 4 }
 0x921   :  { %v1846_v49 = vrot.slane %v1839_v9, 4  ;;  %v1845_v8 = vsel %vm112_vm1, 0.0, %v1844_v38 }
 0x923   :  { %v1847_v53 = vsel %vm112_vm1, 0.0, %v1846_v49  ;;  %v1913_v27 = vsel %vm112_vm1, %v1846_v49, %v1835_v26  ;;  %v1926_v49 = vrot.slane %v4361_v14, 4 }
 0x924   :  { %v1918_v57 = vrot.slane %v1847_v53, 4  ;;  %v4366_v21 = vperm.slane %v1913_v27, %v3726_v17 }
 0x926   :  { %v1919_v30 = vsel %vm112_vm1, %v1918_v57, %v1845_v8  ;;  %v1938_v11 = vrot.slane %v4366_v21, 4 }
 0x927   :  { %v4377_v46 = vperm.slane %v1919_v30, %v3726_v17 }
 0x95c   :  { %v3445_v50 = vpop.permute.xlu2 %3444 }
 0x95d   :  { %v3447_v54 = vunpack.i.h.bf16 %v3445_v50  ;;  %v3446_v36 = vunpack.i.l.bf16 %v3445_v50 }
 0x95f   :  { %v1994_v60 = vrot.slane %v3447_v54, 4  ;;  %v1982_v61 = vrot.slane %v3446_v36, 4 }
 0x96c   :  { %v3460_v23 = vpop.permute.xlu2 %3459 }
 0x96d   :  { %v3462_v41 = vunpack.i.h.bf16 %v3460_v23  ;;  %v3461_v43 = vunpack.i.l.bf16 %v3460_v23 }
 0x96f   :  { %v2048_v53 = vrot.slane %v3462_v41, 4 }
 0x973   :  { %v3450_v58 = vpop.permute.xlu1 %3449 }
 0x974   :  { %v3452_v6 = vunpack.i.h.bf16 %v3450_v58  ;;  %v3451_v63 = vunpack.i.l.bf16 %v3450_v58 }
 0x976   :  { %v1992_v24 = vrot.slane %v3452_v6, 4  ;;  %v1995_v29 = vsel %vm112_vm1, %v3452_v6, %v1994_v60  ;;  %v1980_v59 = vrot.slane %v3451_v63, 4  ;;  %v1983_v28 = vsel %vm112_vm1, %v3451_v63, %v1982_v61 }
 0x977   :  { %v2003_v16 = vperm.slane %v1995_v29, %v3726_v17  ;;  %v1991_v20 = vperm.slane %v1983_v28, %v3726_v17 }
 0x978   :  { %v1993_v31 = vsel %vm112_vm1, %v1992_v24, %v3447_v54  ;;  %v1981_v34 = vsel %vm112_vm1, %v1980_v59, %v3446_v36  ;;  %v2036_v54 = vrot.slane %v3461_v43, 4 }
 0x979   :  { %v1999_v35 = vperm.slane %v1993_v31, %v3726_v17  ;;  %v2016_v37 = vrot.slane %v2003_v16, 4  ;;  %v1987_v2 = vperm.slane %v1981_v34, %v3726_v17  ;;  %v2018_v39 = vrot.slane %v1991_v20, 4 }
 0x97b   :  { %v2004_v44 = vrot.slane %v1999_v35, 4  ;;  %v2006_v42 = vrot.slane %v1987_v2, 4  ;;  %v2017_v45 = vsel %vm112_vm1, %v2016_v37, %v1991_v20  ;;  %v2019_v7 = vsel %vm112_vm1, %v2003_v16, %v2018_v39 }
 0x97c   :  { %v2023_v47 = vperm.slane %v2017_v45, %v3746_v33  ;;  %v2027_v18 = vperm.slane %v2019_v7, %v3746_v33  ;;  %v3455_v10 = vpop.permute.xlu0 %3454 }
 0x97d   :  { %v2005_v9 = vsel %vm112_vm1, %v2004_v44, %v1987_v2  ;;  %v2007_v40 = vsel %vm112_vm1, %v1999_v35, %v2006_v42  ;;  %v3457_v36 = vunpack.i.h.bf16 %v3455_v10  ;;  %v3456_v38 = vunpack.i.l.bf16 %v3455_v10 }
 0x97e   :  { %v2011_v26 = vperm.slane %v2005_v9, %v3746_v33  ;;  %v2015_v50 = vperm.slane %v2007_v40, %v3746_v33  ;;  %v2032_v51 = vrot.slane %v2023_v47, 4  ;;  %v2034_v52 = vrot.slane %v2027_v18, 4 }
 0x97f   :  { %v2049_v6 = vsel %vm112_vm1, %v2048_v53, %v3457_v36  ;;  %v2050_v63 = vrot.slane %v3457_v36, 4  ;;  %v2037_v28 = vsel %vm112_vm1, %v2036_v54, %v3456_v38  ;;  %v2038_v32 = vrot.slane %v3456_v38, 4 }
 0x980   :  { %v2028_v55 = vrot.slane %v2011_v26, 4  ;;  %v2030_v56 = vrot.slane %v2015_v50, 4  ;;  %v2033_v57 = vsel %vm112_vm1, 0.0, %v2032_v51  ;;  %v2035_v58 = vsel %vm112_vm1, 0.0, %v2034_v52 }
 0x981   :  { %v2103_v60 = vsel %vm112_vm1, %v2034_v52, %v2023_v47  ;;  %v2108_v61 = vrot.slane %v2035_v58, 4  ;;  %v2055_v24 = vperm.slane %v2049_v6, %v3726_v17  ;;  %v2051_v59 = vsel %vm112_vm1, %v3462_v41, %v2050_v63 }
 0x982   :  { %v2029_v0 = vsel %vm112_vm1, 0.0, %v2028_v55  ;;  %v2031_v8 = vsel %vm112_vm1, 0.0, %v2030_v56  ;;  %v2107_v27 = vperm.slane %v2103_v60, %v3726_v17  ;;  %v2059_v23 = vperm.slane %v2051_v59, %v3726_v17 }
 0x983   :  { %v2097_v29 = vrot.slane %v2031_v8, 4  ;;  %v2060_v16 = vrot.slane %v2055_v24, 4  ;;  %v2043_v20 = vperm.slane %v2037_v28, %v3726_v17  ;;  %v2092_v30 = vsel %vm112_vm1, %v2030_v56, %v2011_v26 }
 0x984   :  { %v2039_v31 = vsel %vm112_vm1, %v3461_v43, %v2038_v32  ;;  %v2096_v34 = vperm.slane %v2092_v30, %v3726_v17  ;;  %v2109_v37 = vsel %vm112_vm1, %v2108_v61, %v2033_v57  ;;  %v2072_v2 = vrot.slane %v2059_v23, 4 }
 0x985   :  { %v2098_v35 = vsel %vm112_vm1, %v2097_v29, %v2029_v0  ;;  %v2047_v39 = vperm.slane %v2039_v31, %v3726_v17  ;;  %v2061_v19 = vsel %vm112_vm1, %v2060_v16, %v2043_v20  ;;  %v2062_v41 = vrot.slane %v2043_v20, 4 }
 0x986   :  { %v2067_v44 = vperm.slane %v2061_v19, %v3746_v33  ;;  %v2102_v42 = vperm.slane %v2098_v35, %v3726_v17  ;;  %v2113_v45 = vperm.slane %v2109_v37, %v3726_v17  ;;  %v2116_v7 = vrot.slane %v2096_v34, 4 }
 0x987   :  { %v2063_v43 = vsel %vm112_vm1, %v2055_v24, %v2062_v41  ;;  %v2073_v47 = vsel %vm112_vm1, %v2072_v2, %v2047_v39  ;;  %v2074_v18 = vrot.slane %v2047_v39, 4  ;;  %v2128_v9 = vrot.slane %v2107_v27, 4 }
 0x988   :  { %v2071_v40 = vperm.slane %v2063_v43, %v3746_v33  ;;  %v2079_v10 = vperm.slane %v2073_v47, %v3746_v33  ;;  %v2084_v26 = vrot.slane %v2067_v44, 4  ;;  %v2117_v50 = vsel %vm112_vm1, %v2102_v42, %v2116_v7 }
 0x989   :  { %v2075_v51 = vsel %vm112_vm1, %v2059_v23, %v2074_v18  ;;  %v2125_v52 = vperm.slane %v2117_v50, %v3746_v33  ;;  %v2129_v53 = vsel %vm112_vm1, %v2113_v45, %v2128_v9  ;;  %v2114_v54 = vrot.slane %v2102_v42, 4 }
 0x98a   :  { %v2083_v36 = vperm.slane %v2075_v51, %v3746_v33  ;;  %v2085_v38 = vsel %vm112_vm1, 0.0, %v2084_v26  ;;  %v2086_v55 = vrot.slane %v2071_v40, 4  ;;  %v2088_v56 = vrot.slane %v2079_v10, 4 }
 0x98b   :  { %v2137_v57 = vperm.slane %v2129_v53, %v3746_v33  ;;  %v2115_v58 = vsel %vm112_vm1, %v2114_v54, %v2096_v34  ;;  %v2126_v60 = vrot.slane %v2113_v45, 4  ;;  %v2144_v61 = vrot.slane %v2125_v52, 4 }
 0x98c   :  { %v2087_v6 = vsel %vm112_vm1, 0.0, %v2086_v55  ;;  %v2089_v63 = vsel %vm112_vm1, 0.0, %v2088_v56  ;;  %v2090_v0 = vrot.slane %v2083_v36, 4  ;;  %v2146_v8 = vsel %vm112_vm1, %v2086_v55, %v2067_v44 }
 0x98d   :  { %v2150_v24 = vperm.slane %v2146_v8, %v3726_v17  ;;  %v2151_v29 = vrot.slane %v2087_v6, 4  ;;  %v2142_v59 = vrot.slane %v2137_v57, 4  ;;  %v2121_v28 = vperm.slane %v2115_v58, %v3746_v33 }
 0x98e   :  { %v2091_v32 = vsel %vm112_vm1, 0.0, %v2090_v0  ;;  %v2127_v23 = vsel %vm112_vm1, %v2126_v60, %v2107_v27  ;;  %v2145_v16 = vsel %vm112_vm1, %v2137_v57, %v2144_v61  ;;  %v2157_v20 = vsel %vm112_vm1, %v2090_v0, %v2079_v10 }
 0x98f   :  { %v2162_v30 = vrot.slane %v2091_v32, 4  ;;  %v2143_v31 = vsel %vm112_vm1, %v2142_v59, %v2125_v52  ;;  %v2133_v34 = vperm.slane %v2127_v23, %v3746_v33  ;;  %v2455_v35 = vpack.c.bf16 %v2145_v16, %v2145_v16 }
 0x990   :  { %v2454_v37 = vpack.c.bf16 %v2143_v31, %v2143_v31  ;;  %v2140_v2 = vrot.slane %v2121_v28, 4  ;;  %v2152_v39 = vsel %vm112_vm1, %v2151_v29, %v2085_v38  ;;  %v2161_v19 = vperm.slane %v2157_v20, %v3726_v17 }
 0x991   :  { %v2138_v41 = vrot.slane %v2133_v34, 4  ;;  %v2521_v44 = vsel %vm836_vm2, %v2455_v35, 0  ;;  %v2156_v27 = vperm.slane %v2152_v39, %v3726_v17  ;;  %v2163_v42 = vsel %vm112_vm1, %v2162_v30, %v2089_v63 }
 0x992   :  { %v2502_v45 = vsel %vm836_vm2, %v2454_v37, 0  ;;  %2530 = vmatpush.bf16.xpose.msra.mxu0 %v2521_v44  ;;  %v2141_v7 = vsel %vm112_vm1, %v2133_v34, %v2140_v2  ;;  %v2167_v43 = vperm.slane %v2163_v42, %v3726_v17  ;;  %v2170_v47 = vrot.slane %v2150_v24, 4 }
 0x993   :  { %2511 = vmatpush.bf16.xpose.msrb.mxu3 %v2502_v45  ;;  %v2139_v18 = vsel %vm112_vm1, %v2138_v41, %v2121_v28  ;;  %v2453_v9 = vpack.c.bf16 %v2141_v7, %v2141_v7  ;;  %v2182_v40 = vrot.slane %v2161_v19, 4  ;;  %v2168_v10 = vrot.slane %v2156_v27, 4 }
 0x994   :  { %v2452_v26 = vpack.c.bf16 %v2139_v18, %v2139_v18  ;;  %v2171_v50 = vsel %vm112_vm1, %v2156_v27, %v2170_v47  ;;  %v2180_v51 = vrot.slane %v2167_v43, 4  ;;  %v1912_v52 = vperm.slane %v4385_v48, %v3726_v17 }
 0x995   :  { %v2483_v53 = vsel %vm836_vm2, %v2453_v9, 0  ;;  %v2179_v54 = vperm.slane %v2171_v50, %v3746_v33  ;;  %v2183_v36 = vsel %vm112_vm1, %v2167_v43, %v2182_v40  ;;  %v2169_v38 = vsel %vm112_vm1, %v2168_v10, %v2150_v24 }
 0x996   :  { %v2464_v55 = vsel %vm836_vm2, %v2452_v26, 0  ;;  %2492 = vmatpush.bf16.xpose.msrb.mxu2 %v2483_v53  ;;  %v2191_v56 = vperm.slane %v2183_v36, %v3746_v33  ;;  %v2175_v57 = vperm.slane %v2169_v38, %v3746_v33  ;;  %v2181_v58 = vsel %vm112_vm1, %v2180_v51, %v2161_v19 }
 0x997   :  { %2473 = vmatpush.bf16.xpose.msrb.mxu1 %v2464_v55  ;;  %v2198_v60 = vrot.slane %v2179_v54, 4  ;;  %v2447_v48 = vpack.c.bf16 %v4325_v13, %v4325_v13  ;;  %v2187_v61 = vperm.slane %v2181_v58, %v3746_v33  ;;  %v1936_v6 = vrot.slane %v4377_v46, 4 }
 0x998   :  { %v2446_v63 = vpack.c.bf16 %v4321_v12, %v4321_v12  ;;  %v2194_v0 = vrot.slane %v2175_v57, 4  ;;  %v2196_v8 = vrot.slane %v2191_v56, 4  ;;  %v1927_v59 = vsel %vm112_vm1, %v1912_v52, %v1926_v49 }
 0x999   :  { %v2199_v24 = vsel %vm112_vm1, %v2191_v56, %v2198_v60  ;;  %3347 = vmatmul.msk.bf16.vlgmr.msra.gmra.mxu0 %vm836_vm2, %v2447_v48  ;;  %v2192_v29 = vrot.slane %v2187_v61, 4  ;;  %v1924_v28 = vrot.slane %v1912_v52, 4  ;;  %v1939_v12 = vsel %vm112_vm1, %v4377_v46, %v1938_v11 }
 0x99a   :  { %3346 = vmatmul.msk.bf16.vlgmr.msrb.gmra.mxu3 %vm836_vm2, %v2446_v63  ;;  %v2459_v13 = vpack.c.bf16 %v2199_v24, %v2199_v24  ;;  %v2195_v32 = vsel %vm112_vm1, %v2187_v61, %v2194_v0  ;;  %v2197_v23 = vsel %vm112_vm1, %v2196_v8, %v2179_v54  ;;  %v2445_v30 = vpack.c.bf16 %v4333_v25, %v4333_v25 }
 0x99b   :  { %v2457_v16 = vpack.c.bf16 %v2195_v32, %v2195_v32  ;;  %v2458_v20 = vpack.c.bf16 %v2197_v23, %v2197_v23  ;;  %v2193_v49 = vsel %vm112_vm1, %v2192_v29, %v2175_v57  ;;  %v2444_v34 = vpack.c.bf16 %v4330_v22, %v4330_v22 }
 0x99c   :  { %v2597_v31 = vsel %vm836_vm2, %v2459_v13, 0  ;;  %v2456_v35 = vpack.c.bf16 %v2193_v49, %v2193_v49  ;;  %v1935_v37 = vperm.slane %v1927_v59, %v3746_v33  ;;  %v1947_v11 = vperm.slane %v1939_v12, %v3746_v33  ;;  %v4514_v13 = vpop.permute.xlu2 %3464 }
 0x99d   :  { %2606 = vmatpush.bf16.xpose.msrb.mxu0 %v2597_v31  ;;  %v2559_v2 = vsel %vm836_vm2, %v2457_v16, 0  ;;  %v2578_v46 = vsel %vm836_vm2, %v2458_v20, 0  ;;  %3345 = vmatmul.msk.bf16.vlgmr.msrb.gmra.mxu2 %vm836_vm2, %v2445_v30  ;;  %v1925_v25 = vsel %vm112_vm1, %v1924_v28, %v4361_v14  ;;  %v1937_v39 = vsel %vm112_vm1, %v1936_v6, %v4366_v21 }
 0x99e   :  { %3344 = vmatmul.msk.bf16.vlgmr.msrb.gmra.mxu1 %vm836_vm2, %v2444_v34  ;;  %2568 = vmatpush.bf16.xpose.msra.mxu2 %v2559_v2  ;;  %v2540_v22 = vsel %vm836_vm2, %v2456_v35, 0  ;;  %v1931_v19 = vperm.slane %v1925_v25, %v3746_v33  ;;  %v1954_v41 = vrot.slane %v1935_v37, 4  ;;  %v1952_v44 = vrot.slane %v1947_v11, 4 }
 0x99f   :  { %2587 = vmatpush.bf16.xpose.msra.mxu3 %v2578_v46  ;;  %2549 = vmatpush.bf16.xpose.msra.mxu1 %v2540_v22  ;;  %v1943_v27 = vperm.slane %v1937_v39, %v3746_v33 }
 0x9a0   :  { %v1955_v42 = vsel %vm112_vm1, %v1947_v11, %v1954_v41  ;;  %v1950_v45 = vrot.slane %v1931_v19, 4  ;;  %v1953_v14 = vsel %vm112_vm1, %v1952_v44, %v1935_v37 }
 0x9a1   :  { %v1948_v7 = vrot.slane %v1943_v27, 4  ;;  %v2451_v43 = vpack.c.bf16 %v1955_v42, %v1955_v42  ;;  %v2450_v47 = vpack.c.bf16 %v1953_v14, %v1953_v14 }
 0x9a2   :  { %v1951_v18 = vsel %vm112_vm1, %v1943_v27, %v1950_v45 }
 0x9a3   :  { %v1949_v21 = vsel %vm112_vm1, %v1948_v7, %v1931_v19  ;;  %v2449_v9 = vpack.c.bf16 %v1951_v18, %v1951_v18 }
 0x9a4   :  { %v2448_v40 = vpack.c.bf16 %v1949_v21, %v1949_v21 }
 0x9a9   :  { %3351 = vmatmul.msk.bf16.vlgmr.msrb.gmra.mxu0 %vm836_vm2, %v2451_v43 }
 0x9aa   :  { %3350 = vmatmul.msk.bf16.vlgmr.msra.gmra.mxu3 %vm836_vm2, %v2450_v47 }
 0x9ad   :  { %3349 = vmatmul.msk.bf16.vlgmr.msra.gmra.mxu2 %vm836_vm2, %v2449_v9 }
 0x9ae   :  { %3348 = vmatmul.msk.bf16.vlgmr.msra.gmra.mxu1 %vm836_vm2, %v2448_v40 }
 0xa16   :  { %v2532_v10 = vpop.f32.mrf.mxu0 }
 0xa17   :  { %v2621_v26 = vsel %vm836_vm2, %v2532_v10, -inf }
 0xa18   :  { %2622 = vmax.xlane.f32.xlu1 %v2621_v26 }
 0xa1b   :  { %v2475_v50 = vpop.f32.mrf.mxu1 }
 0xa1c   :  { %v2612_v51 = vsel %vm836_vm2, %v2475_v50, -inf }
 0xa1d   :  { %2613 = vmax.xlane.f32.xlu2 %v2612_v51  ;;  %v2513_v52 = vpop.f32.mrf.mxu3 }
 0xa1e   :  { %v2534_v53 = vpop.f32.mrf.mxu0  ;;  %v2618_v54 = vsel %vm836_vm2, %v2513_v52, -inf }
 0xa1f   :  { %v3467_v53 = vunpack.i.h.bf16 %v4514_v13 }
 0xa20   :  { %v2494_v36 = vpop.f32.mrf.mxu2  ;;  %2619 = vmax.xlane.f32.xlu1 %v2618_v54  ;;  %v3466_v54 = vunpack.i.l.bf16 %v4514_v13 }
 0xa21   :  { %v2615_v38 = vsel %vm836_vm2, %v2494_v36, -inf }
 0xa22   :  { %2616 = vmax.xlane.f32.xlu0 %v2615_v38 }
 0xa23   :  { %v2477_v55 = vpop.f32.mrf.mxu1 }
 0xa25   :  { %v2515_v56 = vpop.f32.mrf.mxu3 }
 0xa26   :  { %v2608_v57 = vpop.f32.mrf.mxu0  ;;  %v2238_v56 = vrot.slane %v3467_v53, 4 }
 0xa27   :  { %v2633_v58 = vsel %vm836_vm2, %v2608_v57, -inf }
 0xa28   :  { %v2496_v60 = vpop.f32.mrf.mxu2 }
 0xa2a   :  { %2634 = vmax.xlane.f32.xlu0 %v2633_v58 }
 0xa2b   :  { %v2551_v48 = vpop.f32.mrf.mxu1 }
 0xa2c   :  { %v2624_v61 = vsel %vm836_vm2, %v2551_v48, -inf }
 0xa2d   :  { %2625 = vmax.xlane.f32.xlu1 %v2624_v61  ;;  %v2589_v6 = vpop.f32.mrf.mxu3 }
 0xa2e   :  { %v2610_v63 = vpop.f32.mrf.mxu0  ;;  %v2630_v8 = vsel %vm836_vm2, %v2589_v6, -inf }
 0xa30   :  { %v2570_v0 = vpop.f32.mrf.mxu2 }
 0xa31   :  { %v2627_v24 = vsel %vm836_vm2, %v2570_v0, -inf }
 0xa32   :  { %2631 = vmax.xlane.f32.xlu0 %v2630_v8  ;;  %2628 = vmax.xlane.f32.xlu2 %v2627_v24 }
 0xa33   :  { %v2553_v29 = vpop.f32.mrf.mxu1 }
 0xa35   :  { %v2591_v59 = vpop.f32.mrf.mxu3 }
 0xa38   :  { %v2572_v28 = vpop.f32.mrf.mxu2 }
 0xa46   :  { %3469 = vrot.lane.b32.xlu1 %v4273_v4, %s3645_s23  ;;  %3474 = vrot.lane.b32.xlu0 %v4294_v5, %s3645_s23 }
 0xa4a   :  { %3479 = vrot.lane.b32.xlu2 %v4310_v62, %s3645_s23 }
 0xa8b   :  { %v2623_v32 = vpop.xlane.xlu1 %2622 }
 0xa8c   :  { %v2639_v31 = vsub.f32 %v2532_v10, %v2623_v32 }
 0xa8e   :  { %v2650_v37 = vmul.f32 1.442695, %v2639_v31 }
 0xa90   :  { %v2614_v23 = vpop.xlane.xlu2 %2613 }
 0xa91   :  { %v2636_v12 = vsub.f32 %v2475_v50, %v2614_v23 }
 0xa93   :  { %v2644_v16 = vmul.f32 1.442695, %v2636_v12  ;;  %v2620_v20 = vpop.xlane.xlu1 %2619 }
 0xa94   :  { %v2638_v30 = vsub.f32 %v2513_v52, %v2620_v20 }
 0xa95   :  { %3540 = vpow2.f32 %v2644_v16  ;;  %v2617_v49 = vpop.xlane.xlu0 %2616 }
 0xa96   :  { %v2648_v34 = vmul.f32 1.442695, %v2638_v30  ;;  %v2637_v35 = vsub.f32 %v2494_v36, %v2617_v49 }
 0xa98   :  { %3542 = vpow2.f32 %v2648_v34  ;;  %v2646_v4 = vmul.f32 1.442695, %v2637_v35 }
 0xa9a   :  { %3544 = vpow2.f32 %v2646_v4 }
 0xa9b   :  { %v4516_v5 = vpop.eup %3540  ;;  %3546 = vpow2.f32 %v2650_v37 }
 0xa9c   :  { %v2660_v62 = vsel %vm836_vm2, %v4516_v5, 0.0 }
 0xa9d   :  { %2661 = vadd.xlane.f32.xlu2 %v2660_v62  ;;  %v2635_v2 = vpop.xlane.xlu0 %2634 }
 0xa9e   :  { %v4520_v46 = vpop.eup %3542  ;;  %v2643_v7 = vsub.f32 %v2608_v57, %v2635_v2  ;;  %v2226_v57 = vrot.slane %v3466_v54, 4 }
 0xa9f   :  { %v2666_v11 = vsel %vm836_vm2, %v4520_v46, 0.0 }
 0xaa0   :  { %v4524_v25 = vpop.eup %3544  ;;  %v2626_v22 = vpop.xlane.xlu1 %2625  ;;  %2667 = vadd.xlane.f32.xlu0 %v2666_v11  ;;  %v2658_v21 = vmul.f32 1.442695, %v2643_v7 }
 0xaa1   :  { %v2640_v39 = vsub.f32 %v2551_v48, %v2626_v22  ;;  %v2663_v19 = vsel %vm836_vm2, %v4524_v25, 0.0  ;;  %v4528_v44 = vpop.eup %3546 }
 0xaa2   :  { %2664 = vadd.xlane.f32.xlu1 %v2663_v19  ;;  %v2669_v43 = vsel %vm836_vm2, %v4528_v44, 0.0 }
 0xaa3   :  { %v2652_v41 = vmul.f32 1.442695, %v2640_v39 }
 0xaa5   :  { %v2632_v27 = vpop.xlane.xlu0 %2631  ;;  %v2629_v42 = vpop.xlane.xlu2 %2628  ;;  %3548 = vpow2.f32 %v2652_v41 }
 0xaa6   :  { %v2642_v45 = vsub.f32 %v2589_v6, %v2632_v27  ;;  %v2641_v14 = vsub.f32 %v2570_v0, %v2629_v42 }
 0xaa8   :  { %v2656_v47 = vmul.f32 1.442695, %v2642_v45  ;;  %v2654_v18 = vmul.f32 1.442695, %v2641_v14  ;;  %2670 = vadd.xlane.f32.xlu0 %v2669_v43 }
 0xaaa   :  { %3550 = vpow2.f32 %v2656_v47 }
 0xaab   :  { %3552 = vpow2.f32 %v2654_v18  ;;  %v4532_v9 = vpop.eup %3548 }
 0xaac   :  { %3554 = vpow2.f32 %v2658_v21  ;;  %v2672_v40 = vsel %vm836_vm2, %v4532_v9, 0.0 }
 0xaad   :  { %v3480_v52 = vpop.permute.xlu2 %3479 }
 0xaae   :  { %v3482_v38 = vunpack.i.h.bf16 %v3480_v52  ;;  %v3481_v55 = vunpack.i.l.bf16 %v3480_v52 }
 0xab0   :  { %v4536_v10 = vpop.eup %3550  ;;  %2673 = vadd.xlane.f32.xlu0 %v2672_v40  ;;  %v2292_v8 = vrot.slane %v3482_v38, 4  ;;  %v2280_v24 = vrot.slane %v3481_v55, 4 }
 0xab1   :  { %v4538_v26 = vpop.eup %3552  ;;  %v2678_v50 = vsel %vm836_vm2, %v4536_v10, 0.0 }
 0xab2   :  { %2679 = vadd.xlane.f32.xlu2 %v2678_v50  ;;  %v2675_v51 = vsel %vm836_vm2, %v4538_v26, 0.0  ;;  %v4546_v36 = vpop.eup %3554 }
 0xab3   :  { %2676 = vadd.xlane.f32.xlu1 %v2675_v51  ;;  %v2681_v48 = vsel %vm836_vm2, %v4546_v36, 0.0 }
 0xab8   :  { %v3470_v58 = vpop.permute.xlu1 %3469  ;;  %v3475_v60 = vpop.permute.xlu0 %3474 }
 0xab9   :  { %v3472_v61 = vunpack.i.h.bf16 %v3470_v58  ;;  %v3471_v6 = vunpack.i.l.bf16 %v3470_v58  ;;  %v3477_v63 = vunpack.i.h.bf16 %v3475_v60  ;;  %v3476_v0 = vunpack.i.l.bf16 %v3475_v60 }
 0xaba   :  { %2682 = vadd.xlane.f32.xlu2 %v2681_v48 }
 0xabb   :  { %v2236_v29 = vrot.slane %v3472_v61, 4  ;;  %v2239_v59 = vsel %vm112_vm1, %v3472_v61, %v2238_v56  ;;  %v2224_v28 = vrot.slane %v3471_v6, 4  ;;  %v2227_v13 = vsel %vm112_vm1, %v3471_v6, %v2226_v57 }
 0xabc   :  { %v2247_v32 = vperm.slane %v2239_v59, %v3726_v17  ;;  %v2235_v23 = vperm.slane %v2227_v13, %v3726_v17  ;;  %v2294_v12 = vrot.slane %v3477_v63, 4  ;;  %v2281_v16 = vsel %vm112_vm1, %v2280_v24, %v3476_v0 }
 0xabd   :  { %v2237_v20 = vsel %vm112_vm1, %v2236_v29, %v3467_v53  ;;  %v2225_v30 = vsel %vm112_vm1, %v2224_v28, %v3466_v54  ;;  %v2282_v49 = vrot.slane %v3476_v0, 4  ;;  %v2287_v31 = vperm.slane %v2281_v16, %v3726_v17 }
 0xabe   :  { %v2243_v34 = vperm.slane %v2237_v20, %v3726_v17  ;;  %v2260_v35 = vrot.slane %v2247_v32, 4  ;;  %v2231_v4 = vperm.slane %v2225_v30, %v3726_v17  ;;  %v2262_v37 = vrot.slane %v2235_v23, 4 }
 0xabf   :  { %v2283_v62 = vsel %vm112_vm1, %v3481_v55, %v2282_v49  ;;  %v2293_v2 = vsel %vm112_vm1, %v2292_v8, %v3477_v63  ;;  %v2295_v11 = vsel %vm112_vm1, %v3482_v38, %v2294_v12  ;;  %v2306_v22 = vrot.slane %v2287_v31, 4 }
 0xac0   :  { %v2248_v39 = vrot.slane %v2243_v34, 4  ;;  %v2250_v19 = vrot.slane %v2231_v4, 4  ;;  %v2261_v41 = vsel %vm112_vm1, %v2260_v35, %v2235_v23  ;;  %v2263_v27 = vsel %vm112_vm1, %v2247_v32, %v2262_v37 }
 0xac1   :  { %v2267_v42 = vperm.slane %v2261_v41, %v3746_v33  ;;  %v2271_v45 = vperm.slane %v2263_v27, %v3746_v33  ;;  %v2291_v14 = vperm.slane %v2283_v62, %v3726_v17  ;;  %v2299_v7 = vperm.slane %v2293_v2, %v3726_v17 }
 0xac2   :  { %v2249_v43 = vsel %vm112_vm1, %v2248_v39, %v2231_v4  ;;  %v2251_v47 = vsel %vm112_vm1, %v2243_v34, %v2250_v19  ;;  %v2303_v18 = vperm.slane %v2295_v11, %v3726_v17 }
 0xac3   :  { %v2255_v21 = vperm.slane %v2249_v43, %v3746_v33  ;;  %v2259_v40 = vperm.slane %v2251_v47, %v3746_v33  ;;  %v2276_v50 = vrot.slane %v2267_v42, 4  ;;  %v2278_v51 = vrot.slane %v2271_v45, 4 }
 0xac4   :  { %v2304_v52 = vrot.slane %v2299_v7, 4  ;;  %v2307_v53 = vsel %vm112_vm1, %v2299_v7, %v2306_v22  ;;  %v2316_v54 = vrot.slane %v2303_v18, 4  ;;  %v2318_v38 = vrot.slane %v2291_v14, 4 }
 0xac5   :  { %v2272_v55 = vrot.slane %v2255_v21, 4  ;;  %v2274_v56 = vrot.slane %v2259_v40, 4  ;;  %v2277_v57 = vsel %vm112_vm1, 0.0, %v2276_v50  ;;  %v2279_v58 = vsel %vm112_vm1, 0.0, %v2278_v51 }
 0xac6   :  { %v2347_v60 = vsel %vm112_vm1, %v2278_v51, %v2267_v42  ;;  %v2352_v48 = vrot.slane %v2279_v58, 4  ;;  %v2305_v61 = vsel %vm112_vm1, %v2304_v52, %v2287_v31  ;;  %v2315_v6 = vperm.slane %v2307_v53, %v3746_v33 }
 0xac7   :  { %v2273_v63 = vsel %vm112_vm1, 0.0, %v2272_v55  ;;  %v2275_v0 = vsel %vm112_vm1, 0.0, %v2274_v56  ;;  %v2351_v8 = vperm.slane %v2347_v60, %v3726_v17  ;;  %v2311_v24 = vperm.slane %v2305_v61, %v3746_v33 }
 0xac8   :  { %v2341_v29 = vrot.slane %v2275_v0, 4  ;;  %v2317_v59 = vsel %vm112_vm1, %v2316_v54, %v2291_v14  ;;  %v2319_v28 = vsel %vm112_vm1, %v2303_v18, %v2318_v38  ;;  %v2330_v13 = vrot.slane %v2315_v6, 4 }
 0xac9   :  { %v2323_v32 = vperm.slane %v2317_v59, %v3746_v33  ;;  %v2327_v23 = vperm.slane %v2319_v28, %v3746_v33  ;;  %v2328_v12 = vrot.slane %v2311_v24, 4  ;;  %v2336_v16 = vsel %vm112_vm1, %v2274_v56, %v2255_v21 }
 0xaca   :  { %v2331_v20 = vsel %vm112_vm1, 0.0, %v2330_v13  ;;  %v2390_v30 = vsel %vm112_vm1, %v2330_v13, %v2311_v24  ;;  %v2340_v49 = vperm.slane %v2336_v16, %v3726_v17  ;;  %v2342_v31 = vsel %vm112_vm1, %v2341_v29, %v2273_v63 }
 0xacb   :  { %v2329_v34 = vsel %vm112_vm1, 0.0, %v2328_v12  ;;  %v2332_v35 = vrot.slane %v2323_v32, 4  ;;  %v2334_v4 = vrot.slane %v2327_v23, 4  ;;  %v2394_v37 = vperm.slane %v2390_v30, %v3726_v17 }
 0xacc   :  { %v2395_v62 = vrot.slane %v2331_v20, 4  ;;  %v2346_v2 = vperm.slane %v2342_v31, %v3726_v17  ;;  %v2353_v11 = vsel %vm112_vm1, %v2352_v48, %v2277_v57  ;;  %v2360_v22 = vrot.slane %v2340_v49, 4 }
 0xacd   :  { %v2333_v39 = vsel %vm112_vm1, 0.0, %v2332_v35  ;;  %v2335_v19 = vsel %vm112_vm1, 0.0, %v2334_v4  ;;  %v2357_v41 = vperm.slane %v2353_v11, %v3726_v17  ;;  %v2372_v27 = vrot.slane %v2351_v8, 4 }
 0xace   :  { %v2406_v42 = vrot.slane %v2335_v19, 4  ;;  %v2361_v45 = vsel %vm112_vm1, %v2346_v2, %v2360_v22  ;;  %v2358_v14 = vrot.slane %v2346_v2, 4  ;;  %v2396_v7 = vsel %vm112_vm1, %v2395_v62, %v2329_v34 }
 0xacf   :  { %v2369_v43 = vperm.slane %v2361_v45, %v3746_v33  ;;  %v2373_v47 = vsel %vm112_vm1, %v2357_v41, %v2372_v27  ;;  %v2370_v18 = vrot.slane %v2357_v41, 4  ;;  %v2400_v21 = vperm.slane %v2396_v7, %v3726_v17 }
 0xad0   :  { %v2381_v40 = vperm.slane %v2373_v47, %v3746_v33  ;;  %v2359_v50 = vsel %vm112_vm1, %v2358_v14, %v2340_v49  ;;  %v2401_v51 = vsel %vm112_vm1, %v2334_v4, %v2323_v32  ;;  %v2407_v52 = vsel %vm112_vm1, %v2406_v42, %v2333_v39 }
 0xad1   :  { %v2365_v53 = vperm.slane %v2359_v50, %v3746_v33  ;;  %v2371_v54 = vsel %vm112_vm1, %v2370_v18, %v2351_v8  ;;  %v2388_v38 = vrot.slane %v2369_v43, 4  ;;  %v2405_v55 = vperm.slane %v2401_v51, %v3726_v17 }
 0xad2   :  { %v2386_v56 = vrot.slane %v2381_v40, 4  ;;  %v2377_v57 = vperm.slane %v2371_v54, %v3746_v33  ;;  %v2411_v58 = vperm.slane %v2407_v52, %v3726_v17  ;;  %v2414_v60 = vrot.slane %v2394_v37, 4 }
 0xad3   :  { %v2389_v48 = vsel %vm112_vm1, %v2381_v40, %v2388_v38  ;;  %v2426_v61 = vrot.slane %v2405_v55, 4  ;;  %v2384_v6 = vrot.slane %v2365_v53, 4  ;;  %v2412_v63 = vrot.slane %v2400_v21, 4 }
 0xad4   :  { %v2387_v0 = vsel %vm112_vm1, %v2386_v56, %v2369_v43  ;;  %v2382_v24 = vrot.slane %v2377_v57, 4  ;;  %v2711_v29 = vpack.c.bf16 %v2389_v48, %v2389_v48  ;;  %v2415_v8 = vsel %vm112_vm1, %v2400_v21, %v2414_v60 }
 0xad5   :  { %v2710_v59 = vpack.c.bf16 %v2387_v0, %v2387_v0  ;;  %v2423_v28 = vperm.slane %v2415_v8, %v3746_v33  ;;  %v2427_v13 = vsel %vm112_vm1, %v2411_v58, %v2426_v61  ;;  %v2385_v32 = vsel %vm112_vm1, %v2377_v57, %v2384_v6  ;;  %v3584_v6 = vld [vmem:[%s4794_s2 + $0x8] sm:$0xff]  ;;  %v3588_v8 = vld [vmem:[%s4796_s4 + $0x10] sm:$0xff] }
 0xad6   :  { %v2383_v23 = vsel %vm112_vm1, %v2382_v24, %v2365_v53  ;;  %v2777_v12 = vsel %vm1096_vm3, %v2711_v29, 0  ;;  %v2435_v16 = vperm.slane %v2427_v13, %v3746_v33  ;;  %v2709_v20 = vpack.c.bf16 %v2385_v32, %v2385_v32  ;;  %v3587_v0 = vld [vmem:[#allocation2 + $0x8] sm:$0xff]  ;;  %v3589_v32 = vld [vmem:[#allocation2] sm:$0xff] }
 0xad7   :  { %v2758_v30 = vsel %vm1096_vm3, %v2710_v59, 0  ;;  %v2708_v49 = vpack.c.bf16 %v2383_v23, %v2383_v23  ;;  %2786 = vmatpush.bf16.msra.mxu0 %v2777_v12  ;;  %v2442_v31 = vrot.slane %v2423_v28, 4  ;;  %v2413_v34 = vsel %vm112_vm1, %v2412_v63, %v2394_v37 }
 0xad8   :  { %2767 = vmatpush.bf16.msrb.mxu3 %v2758_v30  ;;  %v2739_v35 = vsel %vm1096_vm3, %v2709_v20, 0  ;;  %v2419_v4 = vperm.slane %v2413_v34, %v3746_v33  ;;  %v2424_v62 = vrot.slane %v2411_v58, 4  ;;  %v2440_v2 = vrot.slane %v2435_v16, 4  ;;  %v3591_v20 = vld [vmem:[%s4796_s4] sm:$0xff] }
 0xad9   :  { %v2720_v11 = vsel %vm1096_vm3, %v2708_v49, 0  ;;  %v2443_v22 = vsel %vm112_vm1, %v2435_v16, %v2442_v31  ;;  %2748 = vmatpush.bf16.msrb.mxu2 %v2739_v35 }
 0xada   :  { %2729 = vmatpush.bf16.msrb.mxu1 %v2720_v11  ;;  %v2715_v39 = vpack.c.bf16 %v2443_v22, %v2443_v22  ;;  %v2425_v19 = vsel %vm112_vm1, %v2424_v62, %v2405_v55  ;;  %v2438_v41 = vrot.slane %v2419_v4, 4  ;;  %v2441_v27 = vsel %vm112_vm1, %v2440_v2, %v2423_v28 }
 0xadb   :  { %v2431_v37 = vperm.slane %v2425_v19, %v3746_v33  ;;  %v2714_v42 = vpack.c.bf16 %v2441_v27, %v2441_v27 }
 0xadc   :  { %v2853_v45 = vsel %vm1096_vm3, %v2715_v39, 0 }
 0xadd   :  { %2862 = vmatpush.bf16.msrb.mxu0 %v2853_v45  ;;  %v2439_v14 = vsel %vm112_vm1, %v2431_v37, %v2438_v41  ;;  %v2834_v7 = vsel %vm1096_vm3, %v2714_v42, 0  ;;  %v2436_v43 = vrot.slane %v2431_v37, 4 }
 0xade   :  { %v2713_v47 = vpack.c.bf16 %v2439_v14, %v2439_v14  ;;  %2843 = vmatpush.bf16.msra.mxu3 %v2834_v7 }
 0xadf   :  { %v2437_v18 = vsel %vm112_vm1, %v2436_v43, %v2419_v4 }
 0xae0   :  { %v2815_v21 = vsel %vm1096_vm3, %v2713_v47, 0  ;;  %v2712_v40 = vpack.c.bf16 %v2437_v18, %v2437_v18 }
 0xae1   :  { %2824 = vmatpush.bf16.msra.mxu2 %v2815_v21 }
 0xae2   :  { %v2796_v50 = vsel %vm1096_vm3, %v2712_v40, 0 }
 0xae3   :  { %2805 = vmatpush.bf16.msra.mxu1 %v2796_v50 }
 0xb10   :  { %v2662_v51 = vpop.xlane.xlu2 %2661 }
 0xb11   :  { %3556 = vrcp.f32 %v2662_v51 }
 0xb13   :  { %v2668_v52 = vpop.xlane.xlu0 %2667 }
 0xb14   :  { %3558 = vrcp.f32 %v2668_v52 }
 0xb15   :  { %v2665_v53 = vpop.xlane.xlu1 %2664 }
 0xb16   :  { %3560 = vrcp.f32 %v2665_v53 }
 0xb17   :  { %v3557_v54 = vpop.eup %3556 }
 0xb18   :  { %v2692_v38 = vmul.f32 %v3557_v54, %v4516_v5  ;;  %v3585_v5 = vld [vmem:[%s4796_s4 + $0x18] sm:$0xff] }
 0xb1a   :  { %v3559_v55 = vpop.eup %3558  ;;  %v2700_v56 = vpack.c.bf16 %v2692_v38, %v2692_v38 }
 0xb1b   :  { %v2694_v57 = vmul.f32 %v3559_v55, %v4520_v46  ;;  %v2671_v58 = vpop.xlane.xlu0 %2670  ;;  %v3586_v46 = vld [vmem:[%s4794_s2] sm:$0xff] }
 0xb1c   :  { %v3561_v60 = vpop.eup %3560  ;;  %3352 = vmatmul.msk.bf16.vlgmr.msrb.gmra.mxu1 %vm836_vm2, %v2700_v56  ;;  %3562 = vrcp.f32 %v2671_v58 }
 0xb1d   :  { %v2702_v48 = vpack.c.bf16 %v2694_v57, %v2694_v57  ;;  %v2693_v61 = vmul.f32 %v3561_v60, %v4524_v25  ;;  %3128 = vmatpush.bf16.msrb.mxu1 %v3584_v6 }
 0xb1f   :  { %v2701_v63 = vpack.c.bf16 %v2693_v61, %v2693_v61  ;;  %3354 = vmatmul.msk.bf16.vlgmr.msrb.gmra.mxu3 %vm836_vm2, %v2702_v48 }
 0xb20   :  { %3208 = vmatpush.bf16.msrb.mxu3 %v3585_v5 }
 0xb21   :  { %3353 = vmatmul.msk.bf16.vlgmr.msrb.gmra.mxu2 %vm836_vm2, %v2701_v63  ;;  %3129 = vmatpush.bf16.msrb.mxu1 %v3586_v46 }
 0xb22   :  { %v3563_v25 = vpop.eup %3562  ;;  %3190 = vmatpush.bf16.msrb.mxu2 %v3587_v0 }
 0xb23   :  { %v2695_v24 = vmul.f32 %v3563_v25, %v4528_v44  ;;  %v2674_v29 = vpop.xlane.xlu0 %2673  ;;  %v3590_v44 = vld [vmem:[%s4796_s4 + $0x8] sm:$0xff] }
 0xb24   :  { %3564 = vrcp.f32 %v2674_v29  ;;  %3209 = vmatpush.bf16.msrb.mxu3 %v3588_v8 }
 0xb25   :  { %v2703_v59 = vpack.c.bf16 %v2695_v24, %v2695_v24  ;;  %v2680_v28 = vpop.xlane.xlu2 %2679 }
 0xb26   :  { %3566 = vrcp.f32 %v2680_v28  ;;  %v2677_v13 = vpop.xlane.xlu1 %2676  ;;  %3191 = vmatpush.bf16.msrb.mxu2 %v3589_v32 }
 0xb27   :  { %3568 = vrcp.f32 %v2677_v13  ;;  %3355 = vmatmul.msk.bf16.vlgmr.msra.gmra.mxu0 %vm836_vm2, %v2703_v59 }
 0xb28   :  { %3210 = vmatpush.bf16.msrb.mxu3 %v3590_v44 }
 0xb2a   :  { %v3565_v23 = vpop.eup %3564 }
 0xb2b   :  { %v2696_v12 = vmul.f32 %v3565_v23, %v4532_v9 }
 0xb2c   :  { %v3567_v16 = vpop.eup %3566  ;;  %3211 = vmatpush.bf16.msrb.mxu3 %v3591_v20 }
 0xb2d   :  { %v3569_v30 = vpop.eup %3568  ;;  %v2698_v49 = vmul.f32 %v3567_v16, %v4536_v10  ;;  %v2704_v31 = vpack.c.bf16 %v2696_v12, %v2696_v12  ;;  %v2683_v34 = vpop.xlane.xlu2 %2682 }
 0xb2e   :  { %v2697_v35 = vmul.f32 %v3569_v30, %v4538_v26  ;;  %3570 = vrcp.f32 %v2683_v34 }
 0xb2f   :  { %v2706_v4 = vpack.c.bf16 %v2698_v49, %v2698_v49  ;;  %3356 = vmatmul.msk.bf16.vlgmr.msra.gmra.mxu1 %vm836_vm2, %v2704_v31 }
 0xb30   :  { %v2705_v62 = vpack.c.bf16 %v2697_v35, %v2697_v35 }
 0xb31   :  { %3358 = vmatmul.msk.bf16.vlgmr.msra.gmra.mxu3 %vm836_vm2, %v2706_v4 }
 0xb32   :  { %3357 = vmatmul.msk.bf16.vlgmr.msra.gmra.mxu2 %vm836_vm2, %v2705_v62 }
 0xb34   :  { %v3571_v9 = vpop.eup %3570 }
 0xb35   :  { %v2699_v2 = vmul.f32 %v3571_v9, %v4546_v36 }
 0xb37   :  { %v2707_v11 = vpack.c.bf16 %v2699_v2, %v2699_v2 }
 0xb39   :  { %3359 = vmatmul.msk.bf16.vlgmr.msrb.gmra.mxu0 %vm836_vm2, %v2707_v11 }
 0xb99   :  { %v2731_v10 = vpop.f32.mrf.mxu1 }
 0xb9a   :  { %v2870_v22 = vrot.slane %v2731_v10, 4 }
 0xba1   :  { %v2733_v39 = vpop.f32.mrf.mxu1 }
 0xba2   :  { %v2769_v19 = vpop.f32.mrf.mxu3 }
 0xba3   :  { %v2868_v26 = vrot.slane %v2769_v19, 4  ;;  %v2871_v41 = vsel %vm112_vm1, %v2769_v19, %v2870_v22 }
 0xba4   :  { %v2750_v27 = vpop.f32.mrf.mxu2  ;;  %v2879_v37 = vperm.slane %v2871_v41, %v3726_v17  ;;  %v2788_v42 = vpop.f32.mrf.mxu0 }
 0xba5   :  { %v2882_v45 = vrot.slane %v2750_v27, 4  ;;  %v2869_v14 = vsel %vm112_vm1, %v2868_v26, %v2731_v10  ;;  %v2880_v7 = vrot.slane %v2788_v42, 4 }
 0xba6   :  { %v2875_v36 = vperm.slane %v2869_v14, %v3726_v17  ;;  %v2906_v43 = vrot.slane %v2879_v37, 4 }
 0xba7   :  { %v2881_v47 = vsel %vm112_vm1, %v2880_v7, %v2750_v27  ;;  %v2883_v18 = vsel %vm112_vm1, %v2788_v42, %v2882_v45 }
 0xba8   :  { %v2894_v21 = vrot.slane %v2875_v36, 4  ;;  %v2887_v40 = vperm.slane %v2881_v47, %v3726_v17  ;;  %v2891_v50 = vperm.slane %v2883_v18, %v3726_v17 }
 0xbaa   :  { %v2892_v51 = vrot.slane %v2887_v40, 4  ;;  %v2895_v52 = vsel %vm112_vm1, %v2887_v40, %v2894_v21  ;;  %v2904_v53 = vrot.slane %v2891_v50, 4  ;;  %v2907_v54 = vsel %vm112_vm1, %v2891_v50, %v2906_v43  ;;  %v2771_v38 = vpop.f32.mrf.mxu3 }
 0xbab   :  { %v2903_v55 = vperm.slane %v2895_v52, %v3746_v33  ;;  %v2915_v56 = vperm.slane %v2907_v54, %v3746_v33 }
 0xbac   :  { %v2893_v57 = vsel %vm112_vm1, %v2892_v51, %v2875_v36  ;;  %v2905_v58 = vsel %vm112_vm1, %v2904_v53, %v2879_v37  ;;  %v2752_v60 = vpop.f32.mrf.mxu2  ;;  %v2790_v48 = vpop.f32.mrf.mxu0 }
 0xbad   :  { %v2899_v61 = vperm.slane %v2893_v57, %v3746_v33  ;;  %v2911_v6 = vperm.slane %v2905_v58, %v3746_v33  ;;  %v2918_v63 = vrot.slane %v2903_v55, 4  ;;  %v2922_v5 = vrot.slane %v2915_v56, 4  ;;  %v2807_v46 = vpop.f32.mrf.mxu1 }
 0xbae   :  { %v2926_v49 = vrot.slane %v2807_v46, 4 }
 0xbaf   :  { %v2916_v25 = vrot.slane %v2899_v61, 4  ;;  %v2919_v0 = vsel %vm112_vm1, 0.0, %v2918_v63  ;;  %v2920_v24 = vrot.slane %v2911_v6, 4  ;;  %v2923_v29 = vsel %vm112_vm1, 0.0, %v2922_v5 }
 0xbb0   :  { %v2980_v8 = vsel %vm112_vm1, %v2918_v63, %v2899_v61  ;;  %v2985_v59 = vrot.slane %v2919_v0, 4  ;;  %v2991_v28 = vsel %vm112_vm1, %v2922_v5, %v2911_v6  ;;  %v2996_v13 = vrot.slane %v2923_v29, 4 }
 0xbb1   :  { %v2921_v32 = vsel %vm112_vm1, 0.0, %v2920_v24  ;;  %v2917_v44 = vsel %vm112_vm1, 0.0, %v2916_v25  ;;  %v2995_v23 = vperm.slane %v2991_v28, %v3726_v17  ;;  %v2984_v16 = vperm.slane %v2980_v8, %v3726_v17 }
 0xbb2   :  { %v2997_v12 = vsel %vm112_vm1, %v2996_v13, %v2921_v32  ;;  %v2986_v20 = vsel %vm112_vm1, %v2985_v59, %v2917_v44 }
 0xbb3   :  { %v3001_v30 = vperm.slane %v2997_v12, %v3726_v17  ;;  %v2990_v31 = vperm.slane %v2986_v20, %v3726_v17  ;;  %v3016_v2 = vrot.slane %v2995_v23, 4  ;;  %v3004_v39 = vrot.slane %v2984_v16, 4 }
 0xbb4   :  { %v2845_v34 = vpop.f32.mrf.mxu3 }
 0xbb5   :  { %v2826_v35 = vpop.f32.mrf.mxu2  ;;  %v2924_v4 = vrot.slane %v2845_v34, 4  ;;  %v2927_v62 = vsel %vm112_vm1, %v2845_v34, %v2926_v49  ;;  %v2809_v9 = vpop.f32.mrf.mxu1  ;;  %v3002_v41 = vrot.slane %v2990_v31, 4  ;;  %v3014_v27 = vrot.slane %v3001_v30, 4 }
 0xbb6   :  { %v2938_v11 = vrot.slane %v2826_v35, 4  ;;  %v2935_v10 = vperm.slane %v2927_v62, %v3726_v17  ;;  %v2864_v22 = vpop.f32.mrf.mxu0  ;;  %v3005_v18 = vsel %vm112_vm1, %v2990_v31, %v3004_v39  ;;  %v3017_v21 = vsel %vm112_vm1, %v3001_v30, %v3016_v2 }
 0xbb7   :  { %v2925_v19 = vsel %vm112_vm1, %v2924_v4, %v2807_v46  ;;  %v2936_v26 = vrot.slane %v2864_v22, 4  ;;  %v3003_v36 = vsel %vm112_vm1, %v3002_v41, %v2984_v16  ;;  %v3015_v52 = vsel %vm112_vm1, %v3014_v27, %v2995_v23 }
 0xbb8   :  { %v2931_v37 = vperm.slane %v2925_v19, %v3726_v17  ;;  %v2962_v42 = vrot.slane %v2935_v10, 4  ;;  %v2939_v45 = vsel %vm112_vm1, %v2864_v22, %v2938_v11  ;;  %v4713_v51 = vperm.slane %v3003_v36, %v3746_v33 }
 0xbb9   :  { %v2937_v14 = vsel %vm112_vm1, %v2936_v26, %v2826_v35  ;;  %v2947_v7 = vperm.slane %v2939_v45, %v3726_v17  ;;  %v3021_v56 = vperm.slane %v3015_v52, %v3746_v33  ;;  %v3013_v0 = vperm.slane %v3005_v18, %v3746_v33 }
 0xbba   :  { %v2950_v43 = vrot.slane %v2931_v37, 4  ;;  %v2943_v47 = vperm.slane %v2937_v14, %v3726_v17  ;;  %v3025_v24 = vperm.slane %v3017_v21, %v3746_v33  ;;  %v3028_v27 = vrot.slane %v4713_v51, 4 }
 0xbbb   :  { %v2960_v40 = vrot.slane %v2947_v7, 4  ;;  %v2963_v50 = vsel %vm112_vm1, %v2947_v7, %v2962_v42  ;;  %v3026_v5 = vrot.slane %v3021_v56, 4  ;;  %v3032_v11 = vrot.slane %v3013_v0, 4 }
 0xbbc   :  { %v2948_v53 = vrot.slane %v2943_v47, 4  ;;  %v2951_v54 = vsel %vm112_vm1, %v2943_v47, %v2950_v43  ;;  %v2971_v38 = vperm.slane %v2963_v50, %v3746_v33  ;;  %v2847_v55 = vpop.f32.mrf.mxu3  ;;  %v3030_v2 = vrot.slane %v3025_v24, 4 }
 0xbbd   :  { %v2959_v57 = vperm.slane %v2951_v54, %v3746_v33  ;;  %v2961_v58 = vsel %vm112_vm1, %v2960_v40, %v2935_v10  ;;  %v2828_v60 = vpop.f32.mrf.mxu2  ;;  %v3027_v28 = vsel %vm112_vm1, %v3026_v5, %v4713_v51  ;;  %v3033_v43 = vsel %vm112_vm1, %v3025_v24, %v3032_v11 }
 0xbbe   :  { %v2949_v48 = vsel %vm112_vm1, %v2948_v53, %v2931_v37  ;;  %v2967_v61 = vperm.slane %v2961_v58, %v3746_v33  ;;  %v2978_v6 = vrot.slane %v2971_v38, 4  ;;  %v2866_v63 = vpop.f32.mrf.mxu0  ;;  %v3031_v36 = vsel %vm112_vm1, %v3030_v2, %v3013_v0 }
 0xbbf   :  { %v2955_v46 = vperm.slane %v2949_v48, %v3746_v33  ;;  %v2974_v25 = vrot.slane %v2959_v57, 4  ;;  %v3029_v52 = vsel %vm112_vm1, %v3021_v56, %v3028_v27 }
 0xbc0   :  { %v2976_v29 = vrot.slane %v2967_v61, 4  ;;  %v2979_v8 = vsel %vm112_vm1, 0.0, %v2978_v6  ;;  %v3045_v59 = vsel %vm112_vm1, %v2978_v6, %v2967_v61 }
 0xbc1   :  { %v2972_v13 = vrot.slane %v2955_v46, 4  ;;  %v2975_v32 = vsel %vm112_vm1, 0.0, %v2974_v25  ;;  %v3034_v44 = vsel %vm112_vm1, %v2974_v25, %v2955_v46  ;;  %v3049_v23 = vperm.slane %v3045_v59, %v3726_v17 }
 0xbc2   :  { %v2977_v12 = vsel %vm112_vm1, 0.0, %v2976_v29  ;;  %v3039_v16 = vrot.slane %v2975_v32, 4  ;;  %v3050_v20 = vrot.slane %v2979_v8, 4  ;;  %v3038_v30 = vperm.slane %v3034_v44, %v3726_v17 }
 0xbc3   :  { %v3070_v49 = vrot.slane %v3049_v23, 4  ;;  %v2973_v31 = vsel %vm112_vm1, 0.0, %v2972_v13 }
 0xbc4   :  { %v3051_v34 = vsel %vm112_vm1, %v3050_v20, %v2977_v12  ;;  %v3040_v35 = vsel %vm112_vm1, %v3039_v16, %v2973_v31  ;;  %v3058_v4 = vrot.slane %v3038_v30, 4 }
 0xbc5   :  { %v3055_v62 = vperm.slane %v3051_v34, %v3726_v17  ;;  %v3044_v9 = vperm.slane %v3040_v35, %v3726_v17 }
 0xbc7   :  { %v3059_v10 = vsel %vm112_vm1, %v3044_v9, %v3058_v4  ;;  %v3071_v22 = vsel %vm112_vm1, %v3055_v62, %v3070_v49  ;;  %v3056_v39 = vrot.slane %v3044_v9, 4  ;;  %v3068_v19 = vrot.slane %v3055_v62, 4 }
 0xbc8   :  { %v3067_v26 = vperm.slane %v3059_v10, %v3746_v33  ;;  %v3079_v41 = vperm.slane %v3071_v22, %v3746_v33 }
 0xbc9   :  { %v3057_v37 = vsel %vm112_vm1, %v3056_v39, %v3038_v30  ;;  %v3069_v42 = vsel %vm112_vm1, %v3068_v19, %v3049_v23 }
 0xbca   :  { %v3084_v45 = vrot.slane %v3079_v41, 4  ;;  %v3086_v17 = vrot.slane %v3067_v26, 4  ;;  %v3063_v14 = vperm.slane %v3057_v37, %v3746_v33  ;;  %v3075_v7 = vperm.slane %v3069_v42, %v3746_v33 }
 0xbcc   :  { %v3085_v47 = vsel %vm112_vm1, %v3084_v45, %v3067_v26  ;;  %v3087_v18 = vsel %vm112_vm1, %v3079_v41, %v3086_v17  ;;  %v3080_v21 = vrot.slane %v3075_v7, 4  ;;  %v3082_v40 = vrot.slane %v3063_v14, 4 }
 0xbcd   :  { %v3488_v50 = vpack.i.bf16 %v3085_v47, %v3031_v36  ;;  %v3493_v51 = vpack.i.bf16 %v3087_v18, %v3033_v43 }
 0xbce   :  { %v3083_v53 = vsel %vm112_vm1, %v3075_v7, %v3082_v40  ;;  %v3081_v54 = vsel %vm112_vm1, %v3080_v21, %v3063_v14 }
 0xbcf   :  { %3489 = vrot.lane.b32.xlu0 %v3488_v50, %s3653_s1  ;;  %3494 = vrot.lane.b32.xlu2 %v3493_v51, %s3654_s15  ;;  %v3483_v33 = vpack.i.bf16 %v3083_v53, %v3029_v52  ;;  %s3270_s15 = sshll.u32 %s4797_s5, 4  ;;  %s3271_s15 = int_to_ptr.hbm [resolvable:$true] %s3270_s15 }
 0xbd1   :  { %3484 = vrot.lane.b32.xlu1 %v3483_v33, %s3655_s16 }
 0xc29   :  { %v3495_v55 = vpop.permute.xlu2 %3494 }
 0xc2a   :  { %v3497_v6 = vunpack.i.h.bf16 %v3495_v55  ;;  %v3496_v56 = vunpack.i.l.bf16 %v3495_v55 }
 0xc41   :  { %v3490_v38 = vpop.permute.xlu0 %3489 }
 0xc42   :  { %v3492_v48 = vunpack.i.h.bf16 %v3490_v38  ;;  %v3491_v61 = vunpack.i.l.bf16 %v3490_v38 }
 0xc43   :  { %v3485_v57 = vpop.permute.xlu1 %3484 }
 0xc44   :  { %v3487_v58 = vunpack.i.h.bf16 %v3485_v57  ;;  %v3486_v60 = vunpack.i.l.bf16 %v3485_v57 }
 0xc46   :  { %v3112_v63 = vsel %vm836_vm2, %v3027_v28, %v3486_v60  ;;  %v3113_v5 = vsel %vm836_vm2, %v3081_v54, %v3487_v58 }
 0xc47   :  { %v3114_v46 = vsel %vm1492_vm4, %v3112_v63, %v3491_v61  ;;  %v3115_v25 = vsel %vm1492_vm4, %v3113_v5, %v3492_v48 }
 0xc48   :  { %v3116_v0 = vsel %vm1495_vm5, %v3114_v46, %v3496_v56  ;;  %v3117_v24 = vsel %vm1495_vm5, %v3115_v25, %v3497_v6 }
 0xc49   :  { %v3118_v29 = vpack.c.bf16 %v3117_v24, %v3116_v0 }
 0xc4b   :  { %3360 = vmatmul.msk.bf16.vlgmr.msrb.gmra.mxu1 %vm73_vm0, %v3118_v29 }
 0xcc8   :  { %v3131_v8 = vpop.f32.mrf.mxu1 }
 0xcc9   :  { %v3132_v59 = vadd.f32 %v3131_v8, %v4254_v1 }
 0xccb   :  { %v3136_v13 = vsel %vm73_vm0, %v3132_v59, 0.0 }
 0xccc   :  { %3137 = vadd.xlane.f32.xlu0 %v3136_v13 }
 0xcd0   :  { %v3133_v28 = vpop.f32.mrf.mxu1 }
 0xcd1   :  { %v3134_v32 = vadd.f32 %v3133_v28, %v4256_v3 }
 0xcd3   :  { %v3139_v44 = vsel %vm73_vm0, %v3134_v32, 0.0 }
 0xcd4   :  { %3140 = vadd.xlane.f32.xlu1 %v3139_v44 }
 0xd3f   :  { %v3138_v23 = vpop.xlane.xlu0 %3137 }
 0xd40   :  { %v3142_v12 = vmul.f32 %v3138_v23, %v4224_v15 }
 0xd42   :  { %v3144_v16 = vsub.f32 %v3132_v59, %v3142_v12 }
 0xd44   :  { %v3146_v20 = vmul.f32 %v3144_v16, %v3144_v16 }
 0xd46   :  { %v3148_v30 = vsel %vm73_vm0, %v3146_v20, 0.0 }
 0xd47   :  { %v3141_v49 = vpop.xlane.xlu1 %3140  ;;  %3149 = vadd.xlane.f32.xlu2 %v3148_v30 }
 0xd48   :  { %v3143_v1 = vmul.f32 %v3141_v49, %v4224_v15 }
 0xd4a   :  { %v3145_v31 = vsub.f32 %v3134_v32, %v3143_v1 }
 0xd4c   :  { %v3147_v34 = vmul.f32 %v3145_v31, %v3145_v31 }
 0xd4e   :  { %v3151_v35 = vsel %vm73_vm0, %v3147_v34, 0.0 }
 0xd4f   :  { %3152 = vadd.xlane.f32.xlu0 %v3151_v35 }
 0xdba   :  { %v3150_v3 = vpop.xlane.xlu2 %3149 }
 0xdbb   :  { %v3154_v4 = vmul.f32 %v3150_v3, %v4224_v15 }
 0xdbd   :  { %v3156_v62 = vadd.f32 1e-05, %v3154_v4 }
 0xdbf   :  { %3572 = vrsqrt.f32 %v3156_v62  ;;  %vm3164_vm2 = vweird.f32 %v3156_v62 }
 0xdc2   :  { %v3153_v9 = vpop.xlane.xlu0 %3152 }
 0xdc3   :  { %v3155_v2 = vmul.f32 %v3153_v9, %v4224_v15 }
 0xdc5   :  { %v3573_v11 = vpop.eup %3572  ;;  %v3157_v10 = vadd.f32 1e-05, %v3155_v2 }
 0xdc6   :  { %v3159_v22 = vmul.f32 %v3573_v11, %v3156_v62  ;;  %vm3165_vm1 = vweird.f32 %v3573_v11 }
 0xdc7   :  { %3574 = vrsqrt.f32 %v3157_v10  ;;  %vm3166_vm4 = vmor %vm3164_vm2, %vm3165_vm1  ;;  %vm3174_vm5 = vweird.f32 %v3157_v10 }
 0xdc8   :  { %v3160_v39 = vmul.f32 %v3573_v11, %v3159_v22 }
 0xdca   :  { %v3161_v19 = vmul.f32 0.5, %v3160_v39 }
 0xdcc   :  { %v3162_v41 = vsub.f32 1.5, %v3161_v19 }
 0xdcd   :  { %v3575_v26 = vpop.eup %3574 }
 0xdce   :  { %v3169_v27 = vmul.f32 %v3575_v26, %v3157_v10  ;;  %v3163_v42 = vmul.f32 %v3573_v11, %v3162_v41  ;;  %vm3175_vm3 = vweird.f32 %v3575_v26 }
 0xdcf   :  { %vm3176_vm10 = vmor %vm3174_vm5, %vm3175_vm3 }
 0xdd0   :  { %v3170_v37 = vmul.f32 %v3575_v26, %v3169_v27  ;;  %v3167_v14 = vsel %vm3166_vm4, %v3573_v11, %v3163_v42 }
 0xdd1   :  { %v3178_v43 = vmul.f32 %v3167_v14, %v3144_v16 }
 0xdd2   :  { %v3171_v45 = vmul.f32 0.5, %v3170_v37 }
 0xdd4   :  { %v3172_v17 = vsub.f32 1.5, %v3171_v45 }
 0xdd6   :  { %v3173_v7 = vmul.f32 %v3575_v26, %v3172_v17 }
 0xdd8   :  { %v3177_v36 = vsel %vm3176_vm10, %v3575_v26, %v3173_v7 }
 0xdd9   :  { %v3179_v47 = vmul.f32 %v3177_v36, %v3145_v31 }
 0xddb   :  { %v3180_v18 = vpack.c.bf16 %v3179_v47, %v3178_v43 }
 0xddd   :  { %3361 = vmatmul.msk.bf16.vlgmr.msrb.gmra.mxu2 %vm73_vm0, %v3180_v18 }
 0xe60   :  { %v3193_v21 = vpop.f32.mrf.mxu2 }
 0xe61   :  { %v3198_v50 = vmax.f32 %v3193_v21, 0.0 }
 0xe68   :  { %v3195_v40 = vpop.f32.mrf.mxu2 }
 0xe69   :  { %v3199_v51 = vmax.f32 %v3195_v40, 0.0 }
 0xe6b   :  { %v3200_v52 = vpack.c.bf16 %v3199_v51, %v3198_v50 }
 0xe6d   :  { %3362 = vmatmul.msk.bf16.vlgmr.msrb.gmra.mxu3 %vm1636_vm13, %v3200_v52 }
 0xef0   :  { %v3213_v53 = vpop.f32.mrf.mxu3 }
 0xef1   :  { %v3214_v54 = vadd.f32 %v3213_v53, %v3178_v43 }
 0xef3   :  { %v3218_v33 = vsel %vm73_vm0, %v3214_v54, 0.0 }
 0xef4   :  { %3219 = vadd.xlane.f32.xlu1 %v3218_v33 }
 0xef8   :  { %v3215_v38 = vpop.f32.mrf.mxu3 }
 0xef9   :  { %v3216_v55 = vadd.f32 %v3215_v38, %v3179_v47 }
 0xefb   :  { %v3221_v57 = vsel %vm73_vm0, %v3216_v55, 0.0 }
 0xefc   :  { %3222 = vadd.xlane.f32.xlu2 %v3221_v57 }
 0xf67   :  { %v3220_v58 = vpop.xlane.xlu1 %3219 }
 0xf68   :  { %v3224_v60 = vmul.f32 %v3220_v58, %v4224_v15 }
 0xf6a   :  { %v3226_v48 = vsub.f32 %v3214_v54, %v3224_v60 }
 0xf6c   :  { %v3228_v61 = vmul.f32 %v3226_v48, %v3226_v48 }
 0xf6e   :  { %v3230_v6 = vsel %vm73_vm0, %v3228_v61, 0.0 }
 0xf6f   :  { %v3223_v56 = vpop.xlane.xlu2 %3222  ;;  %3231 = vadd.xlane.f32.xlu0 %v3230_v6 }
 0xf70   :  { %v3225_v63 = vmul.f32 %v3223_v56, %v4224_v15 }
 0xf72   :  { %v3227_v5 = vsub.f32 %v3216_v55, %v3225_v63 }
 0xf74   :  { %v3229_v46 = vmul.f32 %v3227_v5, %v3227_v5 }
 0xf76   :  { %v3233_v25 = vsel %vm73_vm0, %v3229_v46, 0.0 }
 0xf77   :  { %3234 = vadd.xlane.f32.xlu1 %v3233_v25 }
 0xfe2   :  { %v3232_v0 = vpop.xlane.xlu0 %3231 }
 0xfe3   :  { %v3236_v24 = vmul.f32 %v3232_v0, %v4224_v15 }
 0xfe5   :  { %v3238_v29 = vadd.f32 1e-05, %v3236_v24 }
 0xfe7   :  { %3576 = vrsqrt.f32 %v3238_v29  ;;  %vm3246_vm12 = vweird.f32 %v3238_v29 }
 0xfea   :  { %v3235_v8 = vpop.xlane.xlu1 %3234 }
 0xfeb   :  { %v3237_v59 = vmul.f32 %v3235_v8, %v4224_v15 }
 0xfed   :  { %v3577_v13 = vpop.eup %3576  ;;  %v3239_v28 = vadd.f32 1e-05, %v3237_v59 }
 0xfee   :  { %v3241_v32 = vmul.f32 %v3577_v13, %v3238_v29  ;;  %vm3247_vm11 = vweird.f32 %v3577_v13 }
 0xfef   :  { %3578 = vrsqrt.f32 %v3239_v28  ;;  %vm3248_vm13 = vmor %vm3246_vm12, %vm3247_vm11  ;;  %vm3256_vm15 = vweird.f32 %v3239_v28 }
 0xff0   :  { %v3242_v44 = vmul.f32 %v3577_v13, %v3241_v32 }
 0xff2   :  { %v3243_v23 = vmul.f32 0.5, %v3242_v44 }
 0xff4   :  { %v3244_v12 = vsub.f32 1.5, %v3243_v23 }
 0xff5   :  { %v3579_v16 = vpop.eup %3578 }
 0xff6   :  { %v3245_v20 = vmul.f32 %v3577_v13, %v3244_v12  ;;  %v3251_v30 = vmul.f32 %v3579_v16, %v3239_v28  ;;  %vm3257_vm14 = vweird.f32 %v3579_v16 }
 0xff7   :  { %vm3258_vm6 = vmor %vm3256_vm15, %vm3257_vm14 }
 0xff8   :  { %v3249_v49 = vsel %vm3248_vm13, %v3577_v13, %v3245_v20  ;;  %v3252_v1 = vmul.f32 %v3579_v16, %v3251_v30 }
 0xff9   :  { %v3260_v31 = vmul.f32 %v3249_v49, %v3226_v48 }
 0xffa   :  { %v3253_v34 = vmul.f32 0.5, %v3252_v1 }
 0xffb   :  { %3262 = vst.msk [vmem:[#allocation5] sm:$0xff] %vm73_vm0, %v3260_v31 }
 0xffc   :  { %v3254_v15 = vsub.f32 1.5, %v3253_v34 }
 0xffe   :  { %v3255_v35 = vmul.f32 %v3579_v16, %v3254_v15 }
0x1000   :  { %v3259_v3 = vsel %vm3258_vm6, %v3579_v16, %v3255_v35 }
0x1001   :  { %v3261_v4 = vmul.f32 %v3259_v3, %v3227_v5 }
0x1003   :  { %3263 = vst.msk [vmem:[#allocation5 + $0x8] sm:$0xff] %vm73_vm0, %v3261_v4 }
0x1004   :  { %3276 = dma.vmem_to_hbm [thread:$0]  %s3269_s20, 256, %s3271_s15, [#allocation4], %s3658_s21, %s3658_s21, %s3655_s16  }
0x1005   :  { %3642 = dma.done.wait [#allocation4], 256  }
0x1006   :  { %3643 = vsyncadd [#allocation4], 4294967040 }
0x1007   :  { %3281 = vsyncpa [#allocation3], 1 }
0x1008   :  { %3282 = vsyncpa [#allocation4], 1 }

</bundles_post_ra>
